<compile_context>
chip_gen: v5e
topology: v5e:2x2
jax: 0.10.0
libtpu: 0.0.40
codegen_flags: <defaults>
</compile_context>

<pallas_src>
import jax
import jax.numpy as jnp
from jax import lax
from jax.experimental import pallas as pl
from jax.experimental.pallas import tpu as pltpu

# ----------------------------- model hyperparams (small, synthetic) -----------
B = 2        # batch (number of prompts)
S = 8        # sequence length (context length)
D = 32       # transformer width
NH = 4       # attention heads
HD = D // NH
Z = B * NH   # batched attention leading dim
LAYERS = 2   # transformer depth
P = 16       # text projection output dim
PADN = 4 * D # 128: lane-dense padded width for qkv / b1 / projection
EPS = 1e-5
NEG_INF = -1e30
ATTN_SCALE = 1.0 / (HD ** 0.5)


def _layernorm(h, g, b):
    m = jnp.mean(h, axis=-1, keepdims=True)
    v = jnp.mean(jnp.square(h - m), axis=-1, keepdims=True)
    return (h - m) * lax.rsqrt(v + EPS) * g + b


def _bf16(x):
    return x.astype(jnp.bfloat16)


def _split_heads(m):
    """[B*S, D] -> [Z=B*NH, S, HD], z ordered (b, n). Static 2D slices + leading stack."""
    return jnp.stack(
        [m[b * S:(b + 1) * S, n * HD:(n + 1) * HD]
         for b in range(B) for n in range(NH)], axis=0)


def _merge_heads(z):
    """[Z, S, HD] -> [B*S, D] with head n on lane cols n*HD:(n+1)*HD."""
    rows = [jnp.concatenate([z[b * NH + n] for n in range(NH)], axis=-1)
            for b in range(B)]
    return jnp.concatenate(rows, axis=0)


# ----------------------------- fused TextEncoder kernel -----------------------
# f32 params-slab row layout (per layer): [ln1_g, ln1_b, bqkv, bout, ln2_g, ln2_b, b1, b2]
def _encoder_kernel(eot_ref,                 # SMEM (B,) int32 EOT indices
                    x_ref, pos_ref,          # [B*S, D] f32 / [S, D] f32
                    wqkv_ref,                # [L, D, PADN] bf16 (cols 3D:PADN zero)
                    wout_ref,                # [L, D, D]    bf16
                    w1_ref,                  # [L, D, 4D]   bf16
                    w2_ref,                  # [L, 4D, D]   bf16
                    fp_ref,                  # [L, 8, PADN] f32 (LN params + biases)
                    lnf_ref,                 # [2, D] f32 (ln_final gamma, beta)
                    proj_ref,                # [D, PADN] bf16 (cols P:PADN zero)
                    o_ref,                   # [B, PADN] f32
                    xn_vmem, eot_vmem):      # scratch: [B*S, D] f32, [B, D] f32
    # ---- prompts + positional embedding (pos broadcast over batch in-kernel) ----
    pos = pos_ref[...]
    xf = x_ref[...] + jnp.concatenate([pos] * B, axis=0)          # [B*S, D] f32

    qi = lax.broadcasted_iota(jnp.int32, (S, S), 0)
    ki = lax.broadcasted_iota(jnp.int32, (S, S), 1)
    causal = (ki <= qi)[None]                                     # [1, S, S]

    for li in range(LAYERS):                                      # unrolled, LAYERS=2
        fp = fp_ref[li]                                           # [8, PADN] f32
        ln1_g, ln1_b = fp[0:1, :D], fp[1:2, :D]
        bqkv = fp[2:3, :]                                         # [1, PADN]
        bout = fp[3:4, :D]
        ln2_g, ln2_b = fp[4:5, :D], fp[5:6, :D]
        b1 = fp[6:7, :]                                           # [1, 4D]
        b2 = fp[7:8, :D]

        # -------- pre-LN causal multi-head self-attention --------
        h = _bf16(_layernorm(xf, ln1_g, ln1_b))                   # [B*S, D] bf16
        qkv = jnp.dot(h, wqkv_ref[li],
                      preferred_element_type=jnp.float32) + bqkv  # [B*S, PADN] f32
        q = qkv[:, 0 * D:1 * D] * ATTN_SCALE                      # [B*S, D]
        k = qkv[:, 1 * D:2 * D]
        v = qkv[:, 2 * D:3 * D]
        qz = _split_heads(q)                                      # [Z, S, HD]
        kz = _split_heads(k)
        vz = _split_heads(v)

        s = jnp.einsum('zqh,zkh->zqk', _bf16(qz), _bf16(kz),
                       preferred_element_type=jnp.float32)        # [Z, S, S]
        s = jnp.where(causal, s, NEG_INF)
        p = jax.nn.softmax(s, axis=-1)                            # f32
        ctx = jnp.einsum('zqk,zkh->zqh', _bf16(p), _bf16(vz),
                         preferred_element_type=jnp.float32)      # [Z, S, HD]

        ctx_rows = _merge_heads(ctx)                              # [B*S, D]
        attn = jnp.dot(_bf16(ctx_rows), wout_ref[li],
                       preferred_element_type=jnp.float32) + bout # [B*S, D]
        xf = xf + attn

        # -------- pre-LN MLP with QuickGELU --------
        h2 = _bf16(_layernorm(xf, ln2_g, ln2_b))
        h2 = jnp.dot(h2, w1_ref[li],
                     preferred_element_type=jnp.float32) + b1     # [B*S, 4D]
        h2 = h2 * jax.nn.sigmoid(1.702 * h2)                      # QuickGELU (f32)
        h2 = jnp.dot(_bf16(h2), w2_ref[li],
                     preferred_element_type=jnp.float32) + b2     # [B*S, D]
        xf = xf + h2

    # ---- ln_final + EOT-token gather (dynamic row reads) + text projection ----
    lnf = lnf_ref[...]
    xn_vmem[...] = _layernorm(xf, lnf[0:1, :], lnf[1:2, :])       # [B*S, D]
    for b in range(B):                                            # unrolled, B=2
        idx = b * S + eot_ref[b]
        eot_vmem[b:b + 1, :] = xn_vmem[pl.ds(idx, 1), :]          # [1, D]
    o_ref[...] = jnp.dot(_bf16(eot_vmem[...]), proj_ref[...],
                         preferred_element_type=jnp.float32)      # [B, PADN]


# ----------------------------- wrapper: pack weights (once) & call -----------
def _pack_params(params):
    """One-time, eager layout prep: stacked lane-dense bf16 weight slabs and one
    f32 slab for all LN params / biases.  Kept OUT of the jitted forward path."""
    def padrow(v):   # [1, n] -> [1, PADN]
        return jnp.pad(v, ((0, 0), (0, PADN - v.shape[1])))

    layers = params["layers"]
    wqkv = jnp.stack([_bf16(jnp.pad(lp["wqkv"], ((0, 0), (0, PADN - 3 * D))))
                      for lp in layers])                               # [L, D, PADN]
    wout = jnp.stack([_bf16(lp["wout"]) for lp in layers])             # [L, D, D]
    w1 = jnp.stack([_bf16(lp["w1"]) for lp in layers])                 # [L, D, 4D]
    w2 = jnp.stack([_bf16(lp["w2"]) for lp in layers])                 # [L, 4D, D]
    fparams = jnp.stack([
        jnp.concatenate([padrow(lp["ln1_g"]), padrow(lp["ln1_b"]),
                         padrow(lp["bqkv"]), padrow(lp["bout"]),
                         padrow(lp["ln2_g"]), padrow(lp["ln2_b"]),
                         lp["b1"], padrow(lp["b2"])], axis=0)
        for lp in layers])                                             # [L, 8, PADN]
    lnf = jnp.concatenate([params["lnf_g"], params["lnf_b"]], axis=0)  # [2, D]
    proj = _bf16(jnp.pad(params["text_projection"],
                         ((0, 0), (0, PADN - P))))                     # [D, PADN]
    return (params["pos_emb"], wqkv, wout, w1, w2, fparams, lnf, proj)


def _encoder_call(eot, xf, packed):
    vmem = lambda: pl.BlockSpec(memory_space=pltpu.MemorySpace.VMEM)
    smem = pl.BlockSpec(memory_space=pltpu.MemorySpace.SMEM)
    return pl.pallas_call(
        _encoder_kernel,
        out_shape=jax.ShapeDtypeStruct((B, PADN), jnp.float32),
        in_specs=[smem] + [vmem() for _ in range(1 + len(packed))],
        out_specs=vmem(),
        scratch_shapes=[pltpu.VMEM((B * S, D), jnp.float32),
                        pltpu.VMEM((B, D), jnp.float32)],
    )(eot, xf, *packed)


@jax.jit
def text_encoder_forward(prompts, tokenized_prompts, packed):
    eot = jnp.argmax(tokenized_prompts, axis=-1).astype(jnp.int32)   # (B,) EOT idx
    xf = prompts.reshape(B * S, D)                                   # flatten rows
    out_full = _encoder_call(eot, xf, packed)                        # [B, PADN]
    return out_full[:, :P]


# ----------------------------- pure-JAX reference (same bf16 dot boundaries) --
def ref_forward(prompts, tokenized_prompts, params):
    x = prompts + params["pos_emb"]
    for lp in params["layers"]:
        h = _layernorm(x, lp["ln1_g"], lp["ln1_b"])
        qkv = jnp.einsum("bsd,de->bse", _bf16(h), _bf16(lp["wqkv"]),
                         preferred_element_type=jnp.float32) + lp["bqkv"]
        q, k, v = jnp.split(qkv, 3, axis=-1)
        q = q.reshape(B, S, NH, HD).transpose(0, 2, 1, 3) * ATTN_SCALE
        k = k.reshape(B, S, NH, HD).transpose(0, 2, 1, 3)
        v = v.reshape(B, S, NH, HD).transpose(0, 2, 1, 3)
        s = jnp.einsum("bhqd,bhkd->bhqk", _bf16(q), _bf16(k),
                       preferred_element_type=jnp.float32)
        mask = jnp.tril(jnp.ones((S, S), bool))
        s = jnp.where(mask, s, NEG_INF)
        p = jax.nn.softmax(s, axis=-1)
        a = jnp.einsum("bhqk,bhkd->bhqd", _bf16(p), _bf16(v),
                       preferred_element_type=jnp.float32)
        a = a.transpose(0, 2, 1, 3).reshape(B, S, D)
        x = x + jnp.einsum("bsd,de->bse", _bf16(a), _bf16(lp["wout"]),
                           preferred_element_type=jnp.float32) + lp["bout"]
        h2 = _layernorm(x, lp["ln2_g"], lp["ln2_b"])
        h2 = jnp.einsum("bsd,de->bse", _bf16(h2), _bf16(lp["w1"]),
                        preferred_element_type=jnp.float32) + lp["b1"]
        h2 = h2 * jax.nn.sigmoid(1.702 * h2)
        x = x + jnp.einsum("bsd,de->bse", _bf16(h2), _bf16(lp["w2"]),
                           preferred_element_type=jnp.float32) + lp["b2"]
    x = _layernorm(x, params["lnf_g"], params["lnf_b"])
    eot = jnp.argmax(tokenized_prompts, axis=-1)
    rows = x[jnp.arange(B), eot]
    return jnp.dot(_bf16(rows), _bf16(params["text_projection"]),
                   preferred_element_type=jnp.float32)


# ----------------------------- deterministic parameter init -------------------
def init_params(key):
    def nrm(k, shape, scale=0.02):
        return (scale * jax.random.normal(k, shape)).astype(jnp.float32)

    keys = jax.random.split(key, 4 + LAYERS)
    params = {
        "pos_emb": nrm(keys[0], (S, D)),
        "lnf_g": jnp.ones((1, D), jnp.float32),
        "lnf_b": jnp.zeros((1, D), jnp.float32),
        "text_projection": nrm(keys[1], (D, P), scale=D ** -0.5),
        "layers": [],
    }
    for li in range(LAYERS):
        lk = jax.random.split(keys[4 + li], 4)
        params["layers"].append({
            "ln1_g": jnp.ones((1, D), jnp.float32),
            "ln1_b": jnp.zeros((1, D), jnp.float32),
            # Linear weights stored pre-transposed: y = x @ W (+ b)
            "wqkv": nrm(lk[0], (D, 3 * D)),
            "bqkv": jnp.zeros((1, 3 * D), jnp.float32),
            "wout": nrm(lk[1], (D, D)),
            "bout": jnp.zeros((1, D), jnp.float32),
            "ln2_g": jnp.ones((1, D), jnp.float32),
            "ln2_b": jnp.zeros((1, D), jnp.float32),
            "w1": nrm(lk[2], (D, 4 * D)),
            "b1": jnp.zeros((1, 4 * D), jnp.float32),
            "w2": nrm(lk[3], (4 * D, D)),
            "b2": jnp.zeros((1, D), jnp.float32),
        })
    return params


if __name__ == "__main__":
    key = jax.random.PRNGKey(0)
    k_params, k_prompts, k_tok = jax.random.split(key, 3)

    params = init_params(k_params)
    packed = _pack_params(params)          # one-time weight repack, outside jit
    prompts = (0.1 * jax.random.normal(k_prompts, (B, S, D))).astype(jnp.float32)
    tokenized_prompts = jax.random.randint(k_tok, (B, S), 0, 1000, dtype=jnp.int32)

    out = text_encoder_forward(prompts, tokenized_prompts, packed)
    out = jax.block_until_ready(out)

    ref = ref_forward(prompts, tokenized_prompts, params)
    assert out.shape == (B, P), out.shape
    assert jnp.allclose(out, ref, rtol=1e-3, atol=1e-3), (
        f"mismatch: max abs diff {jnp.max(jnp.abs(out - ref))}")

    print("KERNEL_OK")
</pallas_src>

<mosaic_0001>
module attributes {stable_mosaic.version = 11 : i64} {
  func.func @_encoder_kernel(%arg0: memref<2xi32, #tpu.memory_space<smem>>, %arg1: memref<16x32xf32, #tpu.memory_space<vmem>>, %arg2: memref<8x32xf32, #tpu.memory_space<vmem>>, %arg3: memref<2x32x128xbf16, #tpu.memory_space<vmem>>, %arg4: memref<2x32x32xbf16, #tpu.memory_space<vmem>>, %arg5: memref<2x32x128xbf16, #tpu.memory_space<vmem>>, %arg6: memref<2x128x32xbf16, #tpu.memory_space<vmem>>, %arg7: memref<2x8x128xf32, #tpu.memory_space<vmem>>, %arg8: memref<2x32xf32, #tpu.memory_space<vmem>>, %arg9: memref<32x128xbf16, #tpu.memory_space<vmem>>, %arg10: memref<2x128xf32, #tpu.memory_space<vmem>>, %arg11: memref<16x32xf32, #tpu.memory_space<vmem>>, %arg12: memref<2x32xf32, #tpu.memory_space<vmem>>) attributes {dimension_semantics = [], scalar_prefetch = 0 : i64, scratch_operands = 2 : i64, tpu.core_type = #tpu.core_type<tc>} {
    %c0 = arith.constant 0 : index
    %c0_0 = arith.constant 0 : index
    %0 = vector.load %arg2[%c0, %c0_0] : memref<8x32xf32, #tpu.memory_space<vmem>>, vector<8x32xf32>
    %c0_1 = arith.constant 0 : index
    %c0_2 = arith.constant 0 : index
    %1 = vector.load %arg1[%c0_1, %c0_2] : memref<16x32xf32, #tpu.memory_space<vmem>>, vector<16x32xf32>
    %2 = tpu.concatenate %0, %0 in 0 : vector<8x32xf32>, vector<8x32xf32> -> vector<16x32xf32>
    %3 = arith.addf %1, %2 : vector<16x32xf32>
    %4 = tpu.iota {dimensions = array<i32: 0>} : vector<8x8xi32>
    %5 = tpu.iota {dimensions = array<i32: 1>} : vector<8x8xi32>
    %6 = arith.cmpi sle, %5, %4 : vector<8x8xi32>
    %7 = vector.shape_cast %6 : vector<8x8xi1> to vector<1x8x8xi1>
    %c0_3 = arith.constant 0 : index
    %c0_4 = arith.constant 0 : index
    %c0_5 = arith.constant 0 : index
    %8 = vector.load %arg7[%c0_3, %c0_4, %c0_5] : memref<2x8x128xf32, #tpu.memory_space<vmem>>, vector<1x8x128xf32>
    %9 = vector.shape_cast %8 : vector<1x8x128xf32> to vector<8x128xf32>
    %10 = vector.extract_strided_slice %9 {offsets = [0, 0], sizes = [1, 32], strides = [1, 1]} : vector<8x128xf32> to vector<1x32xf32>
    %11 = vector.extract_strided_slice %9 {offsets = [1, 0], sizes = [1, 32], strides = [1, 1]} : vector<8x128xf32> to vector<1x32xf32>
    %12 = vector.extract_strided_slice %9 {offsets = [2, 0], sizes = [1, 128], strides = [1, 1]} : vector<8x128xf32> to vector<1x128xf32>
    %13 = vector.extract_strided_slice %9 {offsets = [3, 0], sizes = [1, 32], strides = [1, 1]} : vector<8x128xf32> to vector<1x32xf32>
    %14 = vector.extract_strided_slice %9 {offsets = [4, 0], sizes = [1, 32], strides = [1, 1]} : vector<8x128xf32> to vector<1x32xf32>
    %15 = vector.extract_strided_slice %9 {offsets = [5, 0], sizes = [1, 32], strides = [1, 1]} : vector<8x128xf32> to vector<1x32xf32>
    %16 = vector.extract_strided_slice %9 {offsets = [6, 0], sizes = [1, 128], strides = [1, 1]} : vector<8x128xf32> to vector<1x128xf32>
    %17 = vector.extract_strided_slice %9 {offsets = [7, 0], sizes = [1, 32], strides = [1, 1]} : vector<8x128xf32> to vector<1x32xf32>
    %cst = arith.constant dense<0.000000e+00> : vector<16xf32>
    %18 = vector.multi_reduction <add>, %3, %cst [1] : vector<16x32xf32> to vector<16xf32>
    %19 = vector.shape_cast %18 : vector<16xf32> to vector<16x1xf32>
    %cst_6 = arith.constant 3.200000e+01 : f32
    %20 = vector.broadcast %cst_6 : f32 to vector<16x1xf32>
    %21 = arith.divf %19, %20 : vector<16x1xf32>
    %22 = vector.broadcast %21 : vector<16x1xf32> to vector<16x32xf32>
    %23 = arith.subf %3, %22 : vector<16x32xf32>
    %24 = arith.mulf %23, %23 : vector<16x32xf32>
    %cst_7 = arith.constant dense<0.000000e+00> : vector<16xf32>
    %25 = vector.multi_reduction <add>, %24, %cst_7 [1] : vector<16x32xf32> to vector<16xf32>
    %26 = vector.shape_cast %25 : vector<16xf32> to vector<16x1xf32>
    %cst_8 = arith.constant 3.200000e+01 : f32
    %27 = vector.broadcast %cst_8 : f32 to vector<16x1xf32>
    %28 = arith.divf %26, %27 : vector<16x1xf32>
    %29 = vector.broadcast %21 : vector<16x1xf32> to vector<16x32xf32>
    %30 = arith.subf %3, %29 : vector<16x32xf32>
    %cst_9 = arith.constant 9.99999974E-6 : f32
    %31 = vector.broadcast %cst_9 : f32 to vector<16x1xf32>
    %32 = arith.addf %28, %31 : vector<16x1xf32>
    %33 = math.rsqrt %32 : vector<16x1xf32>
    %34 = vector.broadcast %33 : vector<16x1xf32> to vector<16x32xf32>
    %35 = arith.mulf %30, %34 : vector<16x32xf32>
    %36 = vector.broadcast %10 : vector<1x32xf32> to vector<16x32xf32>
    %37 = arith.mulf %35, %36 : vector<16x32xf32>
    %38 = vector.broadcast %11 : vector<1x32xf32> to vector<16x32xf32>
    %39 = arith.addf %37, %38 : vector<16x32xf32>
    %40 = arith.truncf %39 : vector<16x32xf32> to vector<16x32xbf16>
    %c0_10 = arith.constant 0 : index
    %c0_11 = arith.constant 0 : index
    %c0_12 = arith.constant 0 : index
    %41 = vector.load %arg3[%c0_10, %c0_11, %c0_12] : memref<2x32x128xbf16, #tpu.memory_space<vmem>>, vector<1x32x128xbf16>
    %42 = vector.shape_cast %41 : vector<1x32x128xbf16> to vector<32x128xbf16>
    %cst_13 = arith.constant dense<0.000000e+00> : vector<16x128xf32>
    %43 = tpu.matmul %40, %42, %cst_13 {dimension_numbers = #tpu.dot_dimension_numbers<[1], [0], [0], [1], [0, 0, 1, 1], [], []>} : vector<16x32xbf16>, vector<32x128xbf16>, vector<16x128xf32> -> vector<16x128xf32>
    %44 = vector.broadcast %12 : vector<1x128xf32> to vector<16x128xf32>
    %45 = arith.addf %43, %44 : vector<16x128xf32>
    %46 = vector.extract_strided_slice %45 {offsets = [0, 0], sizes = [16, 32], strides = [1, 1]} : vector<16x128xf32> to vector<16x32xf32>
    %cst_14 = arith.constant 0.353553385 : f32
    %47 = vector.broadcast %cst_14 : f32 to vector<16x32xf32>
    %48 = arith.mulf %46, %47 : vector<16x32xf32>
    %49 = vector.extract_strided_slice %45 {offsets = [0, 32], sizes = [16, 32], strides = [1, 1]} : vector<16x128xf32> to vector<16x32xf32>
    %50 = vector.extract_strided_slice %45 {offsets = [0, 64], sizes = [16, 32], strides = [1, 1]} : vector<16x128xf32> to vector<16x32xf32>
    %51 = vector.extract_strided_slice %48 {offsets = [0, 0], sizes = [8, 8], strides = [1, 1]} : vector<16x32xf32> to vector<8x8xf32>
    %52 = vector.extract_strided_slice %48 {offsets = [0, 8], sizes = [8, 8], strides = [1, 1]} : vector<16x32xf32> to vector<8x8xf32>
    %53 = vector.extract_strided_slice %48 {offsets = [0, 16], sizes = [8, 8], strides = [1, 1]} : vector<16x32xf32> to vector<8x8xf32>
    %54 = vector.extract_strided_slice %48 {offsets = [0, 24], sizes = [8, 8], strides = [1, 1]} : vector<16x32xf32> to vector<8x8xf32>
    %55 = vector.extract_strided_slice %48 {offsets = [8, 0], sizes = [8, 8], strides = [1, 1]} : vector<16x32xf32> to vector<8x8xf32>
    %56 = vector.extract_strided_slice %48 {offsets = [8, 8], sizes = [8, 8], strides = [1, 1]} : vector<16x32xf32> to vector<8x8xf32>
    %57 = vector.extract_strided_slice %48 {offsets = [8, 16], sizes = [8, 8], strides = [1, 1]} : vector<16x32xf32> to vector<8x8xf32>
    %58 = vector.extract_strided_slice %48 {offsets = [8, 24], sizes = [8, 8], strides = [1, 1]} : vector<16x32xf32> to vector<8x8xf32>
    %59 = vector.shape_cast %51 : vector<8x8xf32> to vector<1x8x8xf32>
    %60 = vector.shape_cast %52 : vector<8x8xf32> to vector<1x8x8xf32>
    %61 = vector.shape_cast %53 : vector<8x8xf32> to vector<1x8x8xf32>
    %62 = vector.shape_cast %54 : vector<8x8xf32> to vector<1x8x8xf32>
    %63 = vector.shape_cast %55 : vector<8x8xf32> to vector<1x8x8xf32>
    %64 = vector.shape_cast %56 : vector<8x8xf32> to vector<1x8x8xf32>
    %65 = vector.shape_cast %57 : vector<8x8xf32> to vector<1x8x8xf32>
    %66 = vector.shape_cast %58 : vector<8x8xf32> to vector<1x8x8xf32>
    %67 = tpu.concatenate %59, %60, %61, %62, %63, %64, %65, %66 in 0 : vector<1x8x8xf32>, vector<1x8x8xf32>, vector<1x8x8xf32>, vector<1x8x8xf32>, vector<1x8x8xf32>, vector<1x8x8xf32>, vector<1x8x8xf32>, vector<1x8x8xf32> -> vector<8x8x8xf32>
    %68 = vector.extract_strided_slice %49 {offsets = [0, 0], sizes = [8, 8], strides = [1, 1]} : vector<16x32xf32> to vector<8x8xf32>
    %69 = vector.extract_strided_slice %49 {offsets = [0, 8], sizes = [8, 8], strides = [1, 1]} : vector<16x32xf32> to vector<8x8xf32>
    %70 = vector.extract_strided_slice %49 {offsets = [0, 16], sizes = [8, 8], strides = [1, 1]} : vector<16x32xf32> to vector<8x8xf32>
    %71 = vector.extract_strided_slice %49 {offsets = [0, 24], sizes = [8, 8], strides = [1, 1]} : vector<16x32xf32> to vector<8x8xf32>
    %72 = vector.extract_strided_slice %49 {offsets = [8, 0], sizes = [8, 8], strides = [1, 1]} : vector<16x32xf32> to vector<8x8xf32>
    %73 = vector.extract_strided_slice %49 {offsets = [8, 8], sizes = [8, 8], strides = [1, 1]} : vector<16x32xf32> to vector<8x8xf32>
    %74 = vector.extract_strided_slice %49 {offsets = [8, 16], sizes = [8, 8], strides = [1, 1]} : vector<16x32xf32> to vector<8x8xf32>
    %75 = vector.extract_strided_slice %49 {offsets = [8, 24], sizes = [8, 8], strides = [1, 1]} : vector<16x32xf32> to vector<8x8xf32>
    %76 = vector.shape_cast %68 : vector<8x8xf32> to vector<1x8x8xf32>
    %77 = vector.shape_cast %69 : vector<8x8xf32> to vector<1x8x8xf32>
    %78 = vector.shape_cast %70 : vector<8x8xf32> to vector<1x8x8xf32>
    %79 = vector.shape_cast %71 : vector<8x8xf32> to vector<1x8x8xf32>
    %80 = vector.shape_cast %72 : vector<8x8xf32> to vector<1x8x8xf32>
    %81 = vector.shape_cast %73 : vector<8x8xf32> to vector<1x8x8xf32>
    %82 = vector.shape_cast %74 : vector<8x8xf32> to vector<1x8x8xf32>
    %83 = vector.shape_cast %75 : vector<8x8xf32> to vector<1x8x8xf32>
    %84 = tpu.concatenate %76, %77, %78, %79, %80, %81, %82, %83 in 0 : vector<1x8x8xf32>, vector<1x8x8xf32>, vector<1x8x8xf32>, vector<1x8x8xf32>, vector<1x8x8xf32>, vector<1x8x8xf32>, vector<1x8x8xf32>, vector<1x8x8xf32> -> vector<8x8x8xf32>
    %85 = vector.extract_strided_slice %50 {offsets = [0, 0], sizes = [8, 8], strides = [1, 1]} : vector<16x32xf32> to vector<8x8xf32>
    %86 = vector.extract_strided_slice %50 {offsets = [0, 8], sizes = [8, 8], strides = [1, 1]} : vector<16x32xf32> to vector<8x8xf32>
    %87 = vector.extract_strided_slice %50 {offsets = [0, 16], sizes = [8, 8], strides = [1, 1]} : vector<16x32xf32> to vector<8x8xf32>
    %88 = vector.extract_strided_slice %50 {offsets = [0, 24], sizes = [8, 8], strides = [1, 1]} : vector<16x32xf32> to vector<8x8xf32>
    %89 = vector.extract_strided_slice %50 {offsets = [8, 0], sizes = [8, 8], strides = [1, 1]} : vector<16x32xf32> to vector<8x8xf32>
    %90 = vector.extract_strided_slice %50 {offsets = [8, 8], sizes = [8, 8], strides = [1, 1]} : vector<16x32xf32> to vector<8x8xf32>
    %91 = vector.extract_strided_slice %50 {offsets = [8, 16], sizes = [8, 8], strides = [1, 1]} : vector<16x32xf32> to vector<8x8xf32>
    %92 = vector.extract_strided_slice %50 {offsets = [8, 24], sizes = [8, 8], strides = [1, 1]} : vector<16x32xf32> to vector<8x8xf32>
    %93 = vector.shape_cast %85 : vector<8x8xf32> to vector<1x8x8xf32>
    %94 = vector.shape_cast %86 : vector<8x8xf32> to vector<1x8x8xf32>
    %95 = vector.shape_cast %87 : vector<8x8xf32> to vector<1x8x8xf32>
    %96 = vector.shape_cast %88 : vector<8x8xf32> to vector<1x8x8xf32>
    %97 = vector.shape_cast %89 : vector<8x8xf32> to vector<1x8x8xf32>
    %98 = vector.shape_cast %90 : vector<8x8xf32> to vector<1x8x8xf32>
    %99 = vector.shape_cast %91 : vector<8x8xf32> to vector<1x8x8xf32>
    %100 = vector.shape_cast %92 : vector<8x8xf32> to vector<1x8x8xf32>
    %101 = tpu.concatenate %93, %94, %95, %96, %97, %98, %99, %100 in 0 : vector<1x8x8xf32>, vector<1x8x8xf32>, vector<1x8x8xf32>, vector<1x8x8xf32>, vector<1x8x8xf32>, vector<1x8x8xf32>, vector<1x8x8xf32>, vector<1x8x8xf32> -> vector<8x8x8xf32>
    %102 = arith.truncf %67 : vector<8x8x8xf32> to vector<8x8x8xbf16>
    %103 = arith.truncf %84 : vector<8x8x8xf32> to vector<8x8x8xbf16>
    "tpu.trace_start"() <{level = 10 : i32, message = "zqh,zkh->zqk"}> : () -> ()
    %cst_15 = arith.constant dense<0.000000e+00> : vector<8x8x8xf32>
    %104 = tpu.matmul %102, %103, %cst_15 {dimension_numbers = #tpu.dot_dimension_numbers<[2], [2], [1], [1], [0, 0, 0, 1, 1, 1], [0], [0]>} : vector<8x8x8xbf16>, vector<8x8x8xbf16>, vector<8x8x8xf32> -> vector<8x8x8xf32>
    %cst_16 = arith.constant -1.000000e+30 : f32
    "tpu.trace_stop"() : () -> ()
    %105 = vector.shape_cast %7 : vector<1x8x8xi1> to vector<1x8x8xi1>
    %106 = vector.broadcast %105 : vector<1x8x8xi1> to vector<8x8x8xi1>
    %107 = vector.broadcast %cst_16 : f32 to vector<8x8x8xf32>
    %108 = arith.select %106, %104, %107 : vector<8x8x8xi1>, vector<8x8x8xf32>
    %cst_17 = arith.constant dense<0xFF800000> : vector<8x8xf32>
    %109 = vector.multi_reduction <maximumf>, %108, %cst_17 [2] : vector<8x8x8xf32> to vector<8x8xf32>
    %cst_18 = arith.constant 0xFF800000 : f32
    %110 = vector.broadcast %cst_18 : f32 to vector<8x8xf32>
    %111 = arith.maximumf %110, %109 : vector<8x8xf32>
    %112 = vector.shape_cast %111 : vector<8x8xf32> to vector<8x8x1xf32>
    %113 = vector.broadcast %112 : vector<8x8x1xf32> to vector<8x8x8xf32>
    %114 = arith.subf %108, %113 : vector<8x8x8xf32>
    %115 = math.exp %114 : vector<8x8x8xf32>
    %cst_19 = arith.constant dense<0.000000e+00> : vector<8x8xf32>
    %116 = vector.multi_reduction <add>, %115, %cst_19 [2] : vector<8x8x8xf32> to vector<8x8xf32>
    %117 = vector.shape_cast %116 : vector<8x8xf32> to vector<8x8x1xf32>
    %118 = vector.broadcast %117 : vector<8x8x1xf32> to vector<8x8x8xf32>
    %119 = arith.divf %115, %118 : vector<8x8x8xf32>
    %120 = arith.truncf %119 : vector<8x8x8xf32> to vector<8x8x8xbf16>
    %121 = arith.truncf %101 : vector<8x8x8xf32> to vector<8x8x8xbf16>
    "tpu.trace_start"() <{level = 10 : i32, message = "zqk,zkh->zqh"}> : () -> ()
    %cst_20 = arith.constant dense<0.000000e+00> : vector<8x8x8xf32>
    %122 = tpu.matmul %120, %121, %cst_20 {dimension_numbers = #tpu.dot_dimension_numbers<[2], [1], [1], [2], [0, 0, 0, 1, 1, 2], [0], [0]>} : vector<8x8x8xbf16>, vector<8x8x8xbf16>, vector<8x8x8xf32> -> vector<8x8x8xf32>
    "tpu.trace_stop"() : () -> ()
    %123 = vector.extract_strided_slice %122 {offsets = [0, 0, 0], sizes = [1, 8, 8], strides = [1, 1, 1]} : vector<8x8x8xf32> to vector<1x8x8xf32>
    %124 = vector.shape_cast %123 : vector<1x8x8xf32> to vector<8x8xf32>
    %125 = vector.extract_strided_slice %122 {offsets = [1, 0, 0], sizes = [1, 8, 8], strides = [1, 1, 1]} : vector<8x8x8xf32> to vector<1x8x8xf32>
    %126 = vector.shape_cast %125 : vector<1x8x8xf32> to vector<8x8xf32>
    %127 = vector.extract_strided_slice %122 {offsets = [2, 0, 0], sizes = [1, 8, 8], strides = [1, 1, 1]} : vector<8x8x8xf32> to vector<1x8x8xf32>
    %128 = vector.shape_cast %127 : vector<1x8x8xf32> to vector<8x8xf32>
    %129 = vector.extract_strided_slice %122 {offsets = [3, 0, 0], sizes = [1, 8, 8], strides = [1, 1, 1]} : vector<8x8x8xf32> to vector<1x8x8xf32>
    %130 = vector.shape_cast %129 : vector<1x8x8xf32> to vector<8x8xf32>
    %131 = tpu.concatenate %124, %126, %128, %130 in 1 : vector<8x8xf32>, vector<8x8xf32>, vector<8x8xf32>, vector<8x8xf32> -> vector<8x32xf32>
    %132 = vector.extract_strided_slice %122 {offsets = [4, 0, 0], sizes = [1, 8, 8], strides = [1, 1, 1]} : vector<8x8x8xf32> to vector<1x8x8xf32>
    %133 = vector.shape_cast %132 : vector<1x8x8xf32> to vector<8x8xf32>
    %134 = vector.extract_strided_slice %122 {offsets = [5, 0, 0], sizes = [1, 8, 8], strides = [1, 1, 1]} : vector<8x8x8xf32> to vector<1x8x8xf32>
    %135 = vector.shape_cast %134 : vector<1x8x8xf32> to vector<8x8xf32>
    %136 = vector.extract_strided_slice %122 {offsets = [6, 0, 0], sizes = [1, 8, 8], strides = [1, 1, 1]} : vector<8x8x8xf32> to vector<1x8x8xf32>
    %137 = vector.shape_cast %136 : vector<1x8x8xf32> to vector<8x8xf32>
    %138 = vector.extract_strided_slice %122 {offsets = [7, 0, 0], sizes = [1, 8, 8], strides = [1, 1, 1]} : vector<8x8x8xf32> to vector<1x8x8xf32>
    %139 = vector.shape_cast %138 : vector<1x8x8xf32> to vector<8x8xf32>
    %140 = tpu.concatenate %133, %135, %137, %139 in 1 : vector<8x8xf32>, vector<8x8xf32>, vector<8x8xf32>, vector<8x8xf32> -> vector<8x32xf32>
    %141 = tpu.concatenate %131, %140 in 0 : vector<8x32xf32>, vector<8x32xf32> -> vector<16x32xf32>
    %142 = arith.truncf %141 : vector<16x32xf32> to vector<16x32xbf16>
    %c0_21 = arith.constant 0 : index
    %c0_22 = arith.constant 0 : index
    %c0_23 = arith.constant 0 : index
    %143 = vector.load %arg4[%c0_21, %c0_22, %c0_23] : memref<2x32x32xbf16, #tpu.memory_space<vmem>>, vector<1x32x32xbf16>
    %144 = vector.shape_cast %143 : vector<1x32x32xbf16> to vector<32x32xbf16>
    %cst_24 = arith.constant dense<0.000000e+00> : vector<16x32xf32>
    %145 = tpu.matmul %142, %144, %cst_24 {dimension_numbers = #tpu.dot_dimension_numbers<[1], [0], [0], [1], [0, 0, 1, 1], [], []>} : vector<16x32xbf16>, vector<32x32xbf16>, vector<16x32xf32> -> vector<16x32xf32>
    %146 = vector.broadcast %13 : vector<1x32xf32> to vector<16x32xf32>
    %147 = arith.addf %145, %146 : vector<16x32xf32>
    %148 = arith.addf %3, %147 : vector<16x32xf32>
    %cst_25 = arith.constant dense<0.000000e+00> : vector<16xf32>
    %149 = vector.multi_reduction <add>, %148, %cst_25 [1] : vector<16x32xf32> to vector<16xf32>
    %150 = vector.shape_cast %149 : vector<16xf32> to vector<16x1xf32>
    %cst_26 = arith.constant 3.200000e+01 : f32
    %151 = vector.broadcast %cst_26 : f32 to vector<16x1xf32>
    %152 = arith.divf %150, %151 : vector<16x1xf32>
    %153 = vector.broadcast %152 : vector<16x1xf32> to vector<16x32xf32>
    %154 = arith.subf %148, %153 : vector<16x32xf32>
    %155 = arith.mulf %154, %154 : vector<16x32xf32>
    %cst_27 = arith.constant dense<0.000000e+00> : vector<16xf32>
    %156 = vector.multi_reduction <add>, %155, %cst_27 [1] : vector<16x32xf32> to vector<16xf32>
    %157 = vector.shape_cast %156 : vector<16xf32> to vector<16x1xf32>
    %cst_28 = arith.constant 3.200000e+01 : f32
    %158 = vector.broadcast %cst_28 : f32 to vector<16x1xf32>
    %159 = arith.divf %157, %158 : vector<16x1xf32>
    %160 = vector.broadcast %152 : vector<16x1xf32> to vector<16x32xf32>
    %161 = arith.subf %148, %160 : vector<16x32xf32>
    %cst_29 = arith.constant 9.99999974E-6 : f32
    %162 = vector.broadcast %cst_29 : f32 to vector<16x1xf32>
    %163 = arith.addf %159, %162 : vector<16x1xf32>
    %164 = math.rsqrt %163 : vector<16x1xf32>
    %165 = vector.broadcast %164 : vector<16x1xf32> to vector<16x32xf32>
    %166 = arith.mulf %161, %165 : vector<16x32xf32>
    %167 = vector.broadcast %14 : vector<1x32xf32> to vector<16x32xf32>
    %168 = arith.mulf %166, %167 : vector<16x32xf32>
    %169 = vector.broadcast %15 : vector<1x32xf32> to vector<16x32xf32>
    %170 = arith.addf %168, %169 : vector<16x32xf32>
    %171 = arith.truncf %170 : vector<16x32xf32> to vector<16x32xbf16>
    %c0_30 = arith.constant 0 : index
    %c0_31 = arith.constant 0 : index
    %c0_32 = arith.constant 0 : index
    %172 = vector.load %arg5[%c0_30, %c0_31, %c0_32] : memref<2x32x128xbf16, #tpu.memory_space<vmem>>, vector<1x32x128xbf16>
    %173 = vector.shape_cast %172 : vector<1x32x128xbf16> to vector<32x128xbf16>
    %cst_33 = arith.constant dense<0.000000e+00> : vector<16x128xf32>
    %174 = tpu.matmul %171, %173, %cst_33 {dimension_numbers = #tpu.dot_dimension_numbers<[1], [0], [0], [1], [0, 0, 1, 1], [], []>} : vector<16x32xbf16>, vector<32x128xbf16>, vector<16x128xf32> -> vector<16x128xf32>
    %175 = vector.broadcast %16 : vector<1x128xf32> to vector<16x128xf32>
    %176 = arith.addf %174, %175 : vector<16x128xf32>
    %cst_34 = arith.constant 1.702000e+00 : f32
    %177 = vector.broadcast %cst_34 : f32 to vector<16x128xf32>
    %178 = arith.mulf %177, %176 : vector<16x128xf32>
    %179 = arith.negf %178 : vector<16x128xf32>
    %180 = math.exp %179 : vector<16x128xf32>
    %cst_35 = arith.constant 1.000000e+00 : f32
    %181 = vector.broadcast %cst_35 : f32 to vector<16x128xf32>
    %182 = arith.addf %181, %180 : vector<16x128xf32>
    %183 = arith.divf %181, %182 : vector<16x128xf32>
    %184 = arith.mulf %176, %183 : vector<16x128xf32>
    %185 = arith.truncf %184 : vector<16x128xf32> to vector<16x128xbf16>
    %c0_36 = arith.constant 0 : index
    %c0_37 = arith.constant 0 : index
    %c0_38 = arith.constant 0 : index
    %186 = vector.load %arg6[%c0_36, %c0_37, %c0_38] : memref<2x128x32xbf16, #tpu.memory_space<vmem>>, vector<1x128x32xbf16>
    %187 = vector.shape_cast %186 : vector<1x128x32xbf16> to vector<128x32xbf16>
    %cst_39 = arith.constant dense<0.000000e+00> : vector<16x32xf32>
    %188 = tpu.matmul %185, %187, %cst_39 {dimension_numbers = #tpu.dot_dimension_numbers<[1], [0], [0], [1], [0, 0, 1, 1], [], []>} : vector<16x128xbf16>, vector<128x32xbf16>, vector<16x32xf32> -> vector<16x32xf32>
    %189 = vector.broadcast %17 : vector<1x32xf32> to vector<16x32xf32>
    %190 = arith.addf %188, %189 : vector<16x32xf32>
    %191 = arith.addf %148, %190 : vector<16x32xf32>
    %c1 = arith.constant 1 : index
    %c0_40 = arith.constant 0 : index
    %c0_41 = arith.constant 0 : index
    %192 = vector.load %arg7[%c1, %c0_40, %c0_41] : memref<2x8x128xf32, #tpu.memory_space<vmem>>, vector<1x8x128xf32>
    %193 = vector.shape_cast %192 : vector<1x8x128xf32> to vector<8x128xf32>
    %194 = vector.extract_strided_slice %193 {offsets = [0, 0], sizes = [1, 32], strides = [1, 1]} : vector<8x128xf32> to vector<1x32xf32>
    %195 = vector.extract_strided_slice %193 {offsets = [1, 0], sizes = [1, 32], strides = [1, 1]} : vector<8x128xf32> to vector<1x32xf32>
    %196 = vector.extract_strided_slice %193 {offsets = [2, 0], sizes = [1, 128], strides = [1, 1]} : vector<8x128xf32> to vector<1x128xf32>
    %197 = vector.extract_strided_slice %193 {offsets = [3, 0], sizes = [1, 32], strides = [1, 1]} : vector<8x128xf32> to vector<1x32xf32>
    %198 = vector.extract_strided_slice %193 {offsets = [4, 0], sizes = [1, 32], strides = [1, 1]} : vector<8x128xf32> to vector<1x32xf32>
    %199 = vector.extract_strided_slice %193 {offsets = [5, 0], sizes = [1, 32], strides = [1, 1]} : vector<8x128xf32> to vector<1x32xf32>
    %200 = vector.extract_strided_slice %193 {offsets = [6, 0], sizes = [1, 128], strides = [1, 1]} : vector<8x128xf32> to vector<1x128xf32>
    %201 = vector.extract_strided_slice %193 {offsets = [7, 0], sizes = [1, 32], strides = [1, 1]} : vector<8x128xf32> to vector<1x32xf32>
    %cst_42 = arith.constant dense<0.000000e+00> : vector<16xf32>
    %202 = vector.multi_reduction <add>, %191, %cst_42 [1] : vector<16x32xf32> to vector<16xf32>
    %203 = vector.shape_cast %202 : vector<16xf32> to vector<16x1xf32>
    %cst_43 = arith.constant 3.200000e+01 : f32
    %204 = vector.broadcast %cst_43 : f32 to vector<16x1xf32>
    %205 = arith.divf %203, %204 : vector<16x1xf32>
    %206 = vector.broadcast %205 : vector<16x1xf32> to vector<16x32xf32>
    %207 = arith.subf %191, %206 : vector<16x32xf32>
    %208 = arith.mulf %207, %207 : vector<16x32xf32>
    %cst_44 = arith.constant dense<0.000000e+00> : vector<16xf32>
    %209 = vector.multi_reduction <add>, %208, %cst_44 [1] : vector<16x32xf32> to vector<16xf32>
    %210 = vector.shape_cast %209 : vector<16xf32> to vector<16x1xf32>
    %cst_45 = arith.constant 3.200000e+01 : f32
    %211 = vector.broadcast %cst_45 : f32 to vector<16x1xf32>
    %212 = arith.divf %210, %211 : vector<16x1xf32>
    %213 = vector.broadcast %205 : vector<16x1xf32> to vector<16x32xf32>
    %214 = arith.subf %191, %213 : vector<16x32xf32>
    %cst_46 = arith.constant 9.99999974E-6 : f32
    %215 = vector.broadcast %cst_46 : f32 to vector<16x1xf32>
    %216 = arith.addf %212, %215 : vector<16x1xf32>
    %217 = math.rsqrt %216 : vector<16x1xf32>
    %218 = vector.broadcast %217 : vector<16x1xf32> to vector<16x32xf32>
    %219 = arith.mulf %214, %218 : vector<16x32xf32>
    %220 = vector.broadcast %194 : vector<1x32xf32> to vector<16x32xf32>
    %221 = arith.mulf %219, %220 : vector<16x32xf32>
    %222 = vector.broadcast %195 : vector<1x32xf32> to vector<16x32xf32>
    %223 = arith.addf %221, %222 : vector<16x32xf32>
    %224 = arith.truncf %223 : vector<16x32xf32> to vector<16x32xbf16>
    %c1_47 = arith.constant 1 : index
    %c0_48 = arith.constant 0 : index
    %c0_49 = arith.constant 0 : index
    %225 = vector.load %arg3[%c1_47, %c0_48, %c0_49] : memref<2x32x128xbf16, #tpu.memory_space<vmem>>, vector<1x32x128xbf16>
    %226 = vector.shape_cast %225 : vector<1x32x128xbf16> to vector<32x128xbf16>
    %cst_50 = arith.constant dense<0.000000e+00> : vector<16x128xf32>
    %227 = tpu.matmul %224, %226, %cst_50 {dimension_numbers = #tpu.dot_dimension_numbers<[1], [0], [0], [1], [0, 0, 1, 1], [], []>} : vector<16x32xbf16>, vector<32x128xbf16>, vector<16x128xf32> -> vector<16x128xf32>
    %228 = vector.broadcast %196 : vector<1x128xf32> to vector<16x128xf32>
    %229 = arith.addf %227, %228 : vector<16x128xf32>
    %230 = vector.extract_strided_slice %229 {offsets = [0, 0], sizes = [16, 32], strides = [1, 1]} : vector<16x128xf32> to vector<16x32xf32>
    %cst_51 = arith.constant 0.353553385 : f32
    %231 = vector.broadcast %cst_51 : f32 to vector<16x32xf32>
    %232 = arith.mulf %230, %231 : vector<16x32xf32>
    %233 = vector.extract_strided_slice %229 {offsets = [0, 32], sizes = [16, 32], strides = [1, 1]} : vector<16x128xf32> to vector<16x32xf32>
    %234 = vector.extract_strided_slice %229 {offsets = [0, 64], sizes = [16, 32], strides = [1, 1]} : vector<16x128xf32> to vector<16x32xf32>
    %235 = vector.extract_strided_slice %232 {offsets = [0, 0], sizes = [8, 8], strides = [1, 1]} : vector<16x32xf32> to vector<8x8xf32>
    %236 = vector.extract_strided_slice %232 {offsets = [0, 8], sizes = [8, 8], strides = [1, 1]} : vector<16x32xf32> to vector<8x8xf32>
    %237 = vector.extract_strided_slice %232 {offsets = [0, 16], sizes = [8, 8], strides = [1, 1]} : vector<16x32xf32> to vector<8x8xf32>
    %238 = vector.extract_strided_slice %232 {offsets = [0, 24], sizes = [8, 8], strides = [1, 1]} : vector<16x32xf32> to vector<8x8xf32>
    %239 = vector.extract_strided_slice %232 {offsets = [8, 0], sizes = [8, 8], strides = [1, 1]} : vector<16x32xf32> to vector<8x8xf32>
    %240 = vector.extract_strided_slice %232 {offsets = [8, 8], sizes = [8, 8], strides = [1, 1]} : vector<16x32xf32> to vector<8x8xf32>
    %241 = vector.extract_strided_slice %232 {offsets = [8, 16], sizes = [8, 8], strides = [1, 1]} : vector<16x32xf32> to vector<8x8xf32>
    %242 = vector.extract_strided_slice %232 {offsets = [8, 24], sizes = [8, 8], strides = [1, 1]} : vector<16x32xf32> to vector<8x8xf32>
    %243 = vector.shape_cast %235 : vector<8x8xf32> to vector<1x8x8xf32>
    %244 = vector.shape_cast %236 : vector<8x8xf32> to vector<1x8x8xf32>
    %245 = vector.shape_cast %237 : vector<8x8xf32> to vector<1x8x8xf32>
    %246 = vector.shape_cast %238 : vector<8x8xf32> to vector<1x8x8xf32>
    %247 = vector.shape_cast %239 : vector<8x8xf32> to vector<1x8x8xf32>
    %248 = vector.shape_cast %240 : vector<8x8xf32> to vector<1x8x8xf32>
    %249 = vector.shape_cast %241 : vector<8x8xf32> to vector<1x8x8xf32>
    %250 = vector.shape_cast %242 : vector<8x8xf32> to vector<1x8x8xf32>
    %251 = tpu.concatenate %243, %244, %245, %246, %247, %248, %249, %250 in 0 : vector<1x8x8xf32>, vector<1x8x8xf32>, vector<1x8x8xf32>, vector<1x8x8xf32>, vector<1x8x8xf32>, vector<1x8x8xf32>, vector<1x8x8xf32>, vector<1x8x8xf32> -> vector<8x8x8xf32>
    %252 = vector.extract_strided_slice %233 {offsets = [0, 0], sizes = [8, 8], strides = [1, 1]} : vector<16x32xf32> to vector<8x8xf32>
    %253 = vector.extract_strided_slice %233 {offsets = [0, 8], sizes = [8, 8], strides = [1, 1]} : vector<16x32xf32> to vector<8x8xf32>
    %254 = vector.extract_strided_slice %233 {offsets = [0, 16], sizes = [8, 8], strides = [1, 1]} : vector<16x32xf32> to vector<8x8xf32>
    %255 = vector.extract_strided_slice %233 {offsets = [0, 24], sizes = [8, 8], strides = [1, 1]} : vector<16x32xf32> to vector<8x8xf32>
    %256 = vector.extract_strided_slice %233 {offsets = [8, 0], sizes = [8, 8], strides = [1, 1]} : vector<16x32xf32> to vector<8x8xf32>
    %257 = vector.extract_strided_slice %233 {offsets = [8, 8], sizes = [8, 8], strides = [1, 1]} : vector<16x32xf32> to vector<8x8xf32>
    %258 = vector.extract_strided_slice %233 {offsets = [8, 16], sizes = [8, 8], strides = [1, 1]} : vector<16x32xf32> to vector<8x8xf32>
    %259 = vector.extract_strided_slice %233 {offsets = [8, 24], sizes = [8, 8], strides = [1, 1]} : vector<16x32xf32> to vector<8x8xf32>
    %260 = vector.shape_cast %252 : vector<8x8xf32> to vector<1x8x8xf32>
    %261 = vector.shape_cast %253 : vector<8x8xf32> to vector<1x8x8xf32>
    %262 = vector.shape_cast %254 : vector<8x8xf32> to vector<1x8x8xf32>
    %263 = vector.shape_cast %255 : vector<8x8xf32> to vector<1x8x8xf32>
    %264 = vector.shape_cast %256 : vector<8x8xf32> to vector<1x8x8xf32>
    %265 = vector.shape_cast %257 : vector<8x8xf32> to vector<1x8x8xf32>
    %266 = vector.shape_cast %258 : vector<8x8xf32> to vector<1x8x8xf32>
    %267 = vector.shape_cast %259 : vector<8x8xf32> to vector<1x8x8xf32>
    %268 = tpu.concatenate %260, %261, %262, %263, %264, %265, %266, %267 in 0 : vector<1x8x8xf32>, vector<1x8x8xf32>, vector<1x8x8xf32>, vector<1x8x8xf32>, vector<1x8x8xf32>, vector<1x8x8xf32>, vector<1x8x8xf32>, vector<1x8x8xf32> -> vector<8x8x8xf32>
    %269 = vector.extract_strided_slice %234 {offsets = [0, 0], sizes = [8, 8], strides = [1, 1]} : vector<16x32xf32> to vector<8x8xf32>
    %270 = vector.extract_strided_slice %234 {offsets = [0, 8], sizes = [8, 8], strides = [1, 1]} : vector<16x32xf32> to vector<8x8xf32>
    %271 = vector.extract_strided_slice %234 {offsets = [0, 16], sizes = [8, 8], strides = [1, 1]} : vector<16x32xf32> to vector<8x8xf32>
    %272 = vector.extract_strided_slice %234 {offsets = [0, 24], sizes = [8, 8], strides = [1, 1]} : vector<16x32xf32> to vector<8x8xf32>
    %273 = vector.extract_strided_slice %234 {offsets = [8, 0], sizes = [8, 8], strides = [1, 1]} : vector<16x32xf32> to vector<8x8xf32>
    %274 = vector.extract_strided_slice %234 {offsets = [8, 8], sizes = [8, 8], strides = [1, 1]} : vector<16x32xf32> to vector<8x8xf32>
    %275 = vector.extract_strided_slice %234 {offsets = [8, 16], sizes = [8, 8], strides = [1, 1]} : vector<16x32xf32> to vector<8x8xf32>
    %276 = vector.extract_strided_slice %234 {offsets = [8, 24], sizes = [8, 8], strides = [1, 1]} : vector<16x32xf32> to vector<8x8xf32>
    %277 = vector.shape_cast %269 : vector<8x8xf32> to vector<1x8x8xf32>
    %278 = vector.shape_cast %270 : vector<8x8xf32> to vector<1x8x8xf32>
    %279 = vector.shape_cast %271 : vector<8x8xf32> to vector<1x8x8xf32>
    %280 = vector.shape_cast %272 : vector<8x8xf32> to vector<1x8x8xf32>
    %281 = vector.shape_cast %273 : vector<8x8xf32> to vector<1x8x8xf32>
    %282 = vector.shape_cast %274 : vector<8x8xf32> to vector<1x8x8xf32>
    %283 = vector.shape_cast %275 : vector<8x8xf32> to vector<1x8x8xf32>
    %284 = vector.shape_cast %276 : vector<8x8xf32> to vector<1x8x8xf32>
    %285 = tpu.concatenate %277, %278, %279, %280, %281, %282, %283, %284 in 0 : vector<1x8x8xf32>, vector<1x8x8xf32>, vector<1x8x8xf32>, vector<1x8x8xf32>, vector<1x8x8xf32>, vector<1x8x8xf32>, vector<1x8x8xf32>, vector<1x8x8xf32> -> vector<8x8x8xf32>
    %286 = arith.truncf %251 : vector<8x8x8xf32> to vector<8x8x8xbf16>
    %287 = arith.truncf %268 : vector<8x8x8xf32> to vector<8x8x8xbf16>
    "tpu.trace_start"() <{level = 10 : i32, message = "zqh,zkh->zqk"}> : () -> ()
    %cst_52 = arith.constant dense<0.000000e+00> : vector<8x8x8xf32>
    %288 = tpu.matmul %286, %287, %cst_52 {dimension_numbers = #tpu.dot_dimension_numbers<[2], [2], [1], [1], [0, 0, 0, 1, 1, 1], [0], [0]>} : vector<8x8x8xbf16>, vector<8x8x8xbf16>, vector<8x8x8xf32> -> vector<8x8x8xf32>
    %cst_53 = arith.constant -1.000000e+30 : f32
    "tpu.trace_stop"() : () -> ()
    %289 = vector.shape_cast %7 : vector<1x8x8xi1> to vector<1x8x8xi1>
    %290 = vector.broadcast %289 : vector<1x8x8xi1> to vector<8x8x8xi1>
    %291 = vector.broadcast %cst_53 : f32 to vector<8x8x8xf32>
    %292 = arith.select %290, %288, %291 : vector<8x8x8xi1>, vector<8x8x8xf32>
    %cst_54 = arith.constant dense<0xFF800000> : vector<8x8xf32>
    %293 = vector.multi_reduction <maximumf>, %292, %cst_54 [2] : vector<8x8x8xf32> to vector<8x8xf32>
    %cst_55 = arith.constant 0xFF800000 : f32
    %294 = vector.broadcast %cst_55 : f32 to vector<8x8xf32>
    %295 = arith.maximumf %294, %293 : vector<8x8xf32>
    %296 = vector.shape_cast %295 : vector<8x8xf32> to vector<8x8x1xf32>
    %297 = vector.broadcast %296 : vector<8x8x1xf32> to vector<8x8x8xf32>
    %298 = arith.subf %292, %297 : vector<8x8x8xf32>
    %299 = math.exp %298 : vector<8x8x8xf32>
    %cst_56 = arith.constant dense<0.000000e+00> : vector<8x8xf32>
    %300 = vector.multi_reduction <add>, %299, %cst_56 [2] : vector<8x8x8xf32> to vector<8x8xf32>
    %301 = vector.shape_cast %300 : vector<8x8xf32> to vector<8x8x1xf32>
    %302 = vector.broadcast %301 : vector<8x8x1xf32> to vector<8x8x8xf32>
    %303 = arith.divf %299, %302 : vector<8x8x8xf32>
    %304 = arith.truncf %303 : vector<8x8x8xf32> to vector<8x8x8xbf16>
    %305 = arith.truncf %285 : vector<8x8x8xf32> to vector<8x8x8xbf16>
    "tpu.trace_start"() <{level = 10 : i32, message = "zqk,zkh->zqh"}> : () -> ()
    %cst_57 = arith.constant dense<0.000000e+00> : vector<8x8x8xf32>
    %306 = tpu.matmul %304, %305, %cst_57 {dimension_numbers = #tpu.dot_dimension_numbers<[2], [1], [1], [2], [0, 0, 0, 1, 1, 2], [0], [0]>} : vector<8x8x8xbf16>, vector<8x8x8xbf16>, vector<8x8x8xf32> -> vector<8x8x8xf32>
    "tpu.trace_stop"() : () -> ()
    %307 = vector.extract_strided_slice %306 {offsets = [0, 0, 0], sizes = [1, 8, 8], strides = [1, 1, 1]} : vector<8x8x8xf32> to vector<1x8x8xf32>
    %308 = vector.shape_cast %307 : vector<1x8x8xf32> to vector<8x8xf32>
    %309 = vector.extract_strided_slice %306 {offsets = [1, 0, 0], sizes = [1, 8, 8], strides = [1, 1, 1]} : vector<8x8x8xf32> to vector<1x8x8xf32>
    %310 = vector.shape_cast %309 : vector<1x8x8xf32> to vector<8x8xf32>
    %311 = vector.extract_strided_slice %306 {offsets = [2, 0, 0], sizes = [1, 8, 8], strides = [1, 1, 1]} : vector<8x8x8xf32> to vector<1x8x8xf32>
    %312 = vector.shape_cast %311 : vector<1x8x8xf32> to vector<8x8xf32>
    %313 = vector.extract_strided_slice %306 {offsets = [3, 0, 0], sizes = [1, 8, 8], strides = [1, 1, 1]} : vector<8x8x8xf32> to vector<1x8x8xf32>
    %314 = vector.shape_cast %313 : vector<1x8x8xf32> to vector<8x8xf32>
    %315 = tpu.concatenate %308, %310, %312, %314 in 1 : vector<8x8xf32>, vector<8x8xf32>, vector<8x8xf32>, vector<8x8xf32> -> vector<8x32xf32>
    %316 = vector.extract_strided_slice %306 {offsets = [4, 0, 0], sizes = [1, 8, 8], strides = [1, 1, 1]} : vector<8x8x8xf32> to vector<1x8x8xf32>
    %317 = vector.shape_cast %316 : vector<1x8x8xf32> to vector<8x8xf32>
    %318 = vector.extract_strided_slice %306 {offsets = [5, 0, 0], sizes = [1, 8, 8], strides = [1, 1, 1]} : vector<8x8x8xf32> to vector<1x8x8xf32>
    %319 = vector.shape_cast %318 : vector<1x8x8xf32> to vector<8x8xf32>
    %320 = vector.extract_strided_slice %306 {offsets = [6, 0, 0], sizes = [1, 8, 8], strides = [1, 1, 1]} : vector<8x8x8xf32> to vector<1x8x8xf32>
    %321 = vector.shape_cast %320 : vector<1x8x8xf32> to vector<8x8xf32>
    %322 = vector.extract_strided_slice %306 {offsets = [7, 0, 0], sizes = [1, 8, 8], strides = [1, 1, 1]} : vector<8x8x8xf32> to vector<1x8x8xf32>
    %323 = vector.shape_cast %322 : vector<1x8x8xf32> to vector<8x8xf32>
    %324 = tpu.concatenate %317, %319, %321, %323 in 1 : vector<8x8xf32>, vector<8x8xf32>, vector<8x8xf32>, vector<8x8xf32> -> vector<8x32xf32>
    %325 = tpu.concatenate %315, %324 in 0 : vector<8x32xf32>, vector<8x32xf32> -> vector<16x32xf32>
    %326 = arith.truncf %325 : vector<16x32xf32> to vector<16x32xbf16>
    %c1_58 = arith.constant 1 : index
    %c0_59 = arith.constant 0 : index
    %c0_60 = arith.constant 0 : index
    %327 = vector.load %arg4[%c1_58, %c0_59, %c0_60] : memref<2x32x32xbf16, #tpu.memory_space<vmem>>, vector<1x32x32xbf16>
    %328 = vector.shape_cast %327 : vector<1x32x32xbf16> to vector<32x32xbf16>
    %cst_61 = arith.constant dense<0.000000e+00> : vector<16x32xf32>
    %329 = tpu.matmul %326, %328, %cst_61 {dimension_numbers = #tpu.dot_dimension_numbers<[1], [0], [0], [1], [0, 0, 1, 1], [], []>} : vector<16x32xbf16>, vector<32x32xbf16>, vector<16x32xf32> -> vector<16x32xf32>
    %330 = vector.broadcast %197 : vector<1x32xf32> to vector<16x32xf32>
    %331 = arith.addf %329, %330 : vector<16x32xf32>
    %332 = arith.addf %191, %331 : vector<16x32xf32>
    %cst_62 = arith.constant dense<0.000000e+00> : vector<16xf32>
    %333 = vector.multi_reduction <add>, %332, %cst_62 [1] : vector<16x32xf32> to vector<16xf32>
    %334 = vector.shape_cast %333 : vector<16xf32> to vector<16x1xf32>
    %cst_63 = arith.constant 3.200000e+01 : f32
    %335 = vector.broadcast %cst_63 : f32 to vector<16x1xf32>
    %336 = arith.divf %334, %335 : vector<16x1xf32>
    %337 = vector.broadcast %336 : vector<16x1xf32> to vector<16x32xf32>
    %338 = arith.subf %332, %337 : vector<16x32xf32>
    %339 = arith.mulf %338, %338 : vector<16x32xf32>
    %cst_64 = arith.constant dense<0.000000e+00> : vector<16xf32>
    %340 = vector.multi_reduction <add>, %339, %cst_64 [1] : vector<16x32xf32> to vector<16xf32>
    %341 = vector.shape_cast %340 : vector<16xf32> to vector<16x1xf32>
    %cst_65 = arith.constant 3.200000e+01 : f32
    %342 = vector.broadcast %cst_65 : f32 to vector<16x1xf32>
    %343 = arith.divf %341, %342 : vector<16x1xf32>
    %344 = vector.broadcast %336 : vector<16x1xf32> to vector<16x32xf32>
    %345 = arith.subf %332, %344 : vector<16x32xf32>
    %cst_66 = arith.constant 9.99999974E-6 : f32
    %346 = vector.broadcast %cst_66 : f32 to vector<16x1xf32>
    %347 = arith.addf %343, %346 : vector<16x1xf32>
    %348 = math.rsqrt %347 : vector<16x1xf32>
    %349 = vector.broadcast %348 : vector<16x1xf32> to vector<16x32xf32>
    %350 = arith.mulf %345, %349 : vector<16x32xf32>
    %351 = vector.broadcast %198 : vector<1x32xf32> to vector<16x32xf32>
    %352 = arith.mulf %350, %351 : vector<16x32xf32>
    %353 = vector.broadcast %199 : vector<1x32xf32> to vector<16x32xf32>
    %354 = arith.addf %352, %353 : vector<16x32xf32>
    %355 = arith.truncf %354 : vector<16x32xf32> to vector<16x32xbf16>
    %c1_67 = arith.constant 1 : index
    %c0_68 = arith.constant 0 : index
    %c0_69 = arith.constant 0 : index
    %356 = vector.load %arg5[%c1_67, %c0_68, %c0_69] : memref<2x32x128xbf16, #tpu.memory_space<vmem>>, vector<1x32x128xbf16>
    %357 = vector.shape_cast %356 : vector<1x32x128xbf16> to vector<32x128xbf16>
    %cst_70 = arith.constant dense<0.000000e+00> : vector<16x128xf32>
    %358 = tpu.matmul %355, %357, %cst_70 {dimension_numbers = #tpu.dot_dimension_numbers<[1], [0], [0], [1], [0, 0, 1, 1], [], []>} : vector<16x32xbf16>, vector<32x128xbf16>, vector<16x128xf32> -> vector<16x128xf32>
    %359 = vector.broadcast %200 : vector<1x128xf32> to vector<16x128xf32>
    %360 = arith.addf %358, %359 : vector<16x128xf32>
    %cst_71 = arith.constant 1.702000e+00 : f32
    %361 = vector.broadcast %cst_71 : f32 to vector<16x128xf32>
    %362 = arith.mulf %361, %360 : vector<16x128xf32>
    %363 = arith.negf %362 : vector<16x128xf32>
    %364 = math.exp %363 : vector<16x128xf32>
    %cst_72 = arith.constant 1.000000e+00 : f32
    %365 = vector.broadcast %cst_72 : f32 to vector<16x128xf32>
    %366 = arith.addf %365, %364 : vector<16x128xf32>
    %367 = arith.divf %365, %366 : vector<16x128xf32>
    %368 = arith.mulf %360, %367 : vector<16x128xf32>
    %369 = arith.truncf %368 : vector<16x128xf32> to vector<16x128xbf16>
    %c1_73 = arith.constant 1 : index
    %c0_74 = arith.constant 0 : index
    %c0_75 = arith.constant 0 : index
    %370 = vector.load %arg6[%c1_73, %c0_74, %c0_75] : memref<2x128x32xbf16, #tpu.memory_space<vmem>>, vector<1x128x32xbf16>
    %371 = vector.shape_cast %370 : vector<1x128x32xbf16> to vector<128x32xbf16>
    %cst_76 = arith.constant dense<0.000000e+00> : vector<16x32xf32>
    %372 = tpu.matmul %369, %371, %cst_76 {dimension_numbers = #tpu.dot_dimension_numbers<[1], [0], [0], [1], [0, 0, 1, 1], [], []>} : vector<16x128xbf16>, vector<128x32xbf16>, vector<16x32xf32> -> vector<16x32xf32>
    %373 = vector.broadcast %201 : vector<1x32xf32> to vector<16x32xf32>
    %374 = arith.addf %372, %373 : vector<16x32xf32>
    %375 = arith.addf %332, %374 : vector<16x32xf32>
    %c0_77 = arith.constant 0 : index
    %c0_78 = arith.constant 0 : index
    %376 = vector.load %arg8[%c0_77, %c0_78] : memref<2x32xf32, #tpu.memory_space<vmem>>, vector<2x32xf32>
    %377 = vector.extract_strided_slice %376 {offsets = [0, 0], sizes = [1, 32], strides = [1, 1]} : vector<2x32xf32> to vector<1x32xf32>
    %378 = vector.extract_strided_slice %376 {offsets = [1, 0], sizes = [1, 32], strides = [1, 1]} : vector<2x32xf32> to vector<1x32xf32>
    %cst_79 = arith.constant dense<0.000000e+00> : vector<16xf32>
    %379 = vector.multi_reduction <add>, %375, %cst_79 [1] : vector<16x32xf32> to vector<16xf32>
    %380 = vector.shape_cast %379 : vector<16xf32> to vector<16x1xf32>
    %cst_80 = arith.constant 3.200000e+01 : f32
    %381 = vector.broadcast %cst_80 : f32 to vector<16x1xf32>
    %382 = arith.divf %380, %381 : vector<16x1xf32>
    %383 = vector.broadcast %382 : vector<16x1xf32> to vector<16x32xf32>
    %384 = arith.subf %375, %383 : vector<16x32xf32>
    %385 = arith.mulf %384, %384 : vector<16x32xf32>
    %cst_81 = arith.constant dense<0.000000e+00> : vector<16xf32>
    %386 = vector.multi_reduction <add>, %385, %cst_81 [1] : vector<16x32xf32> to vector<16xf32>
    %387 = vector.shape_cast %386 : vector<16xf32> to vector<16x1xf32>
    %cst_82 = arith.constant 3.200000e+01 : f32
    %388 = vector.broadcast %cst_82 : f32 to vector<16x1xf32>
    %389 = arith.divf %387, %388 : vector<16x1xf32>
    %390 = vector.broadcast %382 : vector<16x1xf32> to vector<16x32xf32>
    %391 = arith.subf %375, %390 : vector<16x32xf32>
    %cst_83 = arith.constant 9.99999974E-6 : f32
    %392 = vector.broadcast %cst_83 : f32 to vector<16x1xf32>
    %393 = arith.addf %389, %392 : vector<16x1xf32>
    %394 = math.rsqrt %393 : vector<16x1xf32>
    %395 = vector.broadcast %394 : vector<16x1xf32> to vector<16x32xf32>
    %396 = arith.mulf %391, %395 : vector<16x32xf32>
    %397 = vector.broadcast %377 : vector<1x32xf32> to vector<16x32xf32>
    %398 = arith.mulf %396, %397 : vector<16x32xf32>
    %399 = vector.broadcast %378 : vector<1x32xf32> to vector<16x32xf32>
    %400 = arith.addf %398, %399 : vector<16x32xf32>
    %c0_84 = arith.constant 0 : index
    %c0_85 = arith.constant 0 : index
    %401 = vector.load %arg11[%c0_84, %c0_85] : memref<16x32xf32, #tpu.memory_space<vmem>>, vector<16x32xf32>
    tpu.vector_store %arg11[%c0_84, %c0_85], %400 {strides = array<i32>} : memref<16x32xf32, #tpu.memory_space<vmem>>, vector<16x32xf32>,
    %c0_86 = arith.constant 0 : index
    %402 = memref.load %arg0[%c0_86] : memref<2xi32, #tpu.memory_space<smem>>
    %c0_i32 = arith.constant 0 : i32
    %403 = arith.addi %c0_i32, %402 : i32
    %404 = arith.index_cast %403 : i32 to index
    %c0_87 = arith.constant 0 : index
    %405 = vector.load %arg11[%404, %c0_87] : memref<16x32xf32, #tpu.memory_space<vmem>>, vector<1x32xf32>
    %c0_88 = arith.constant 0 : index
    %c0_89 = arith.constant 0 : index
    %406 = vector.load %arg12[%c0_88, %c0_89] : memref<2x32xf32, #tpu.memory_space<vmem>>, vector<1x32xf32>
    tpu.vector_store %arg12[%c0_88, %c0_89], %405 {strides = array<i32>} : memref<2x32xf32, #tpu.memory_space<vmem>>, vector<1x32xf32>,
    %c1_90 = arith.constant 1 : index
    %407 = memref.load %arg0[%c1_90] : memref<2xi32, #tpu.memory_space<smem>>
    %c8_i32 = arith.constant 8 : i32
    %408 = arith.addi %c8_i32, %407 : i32
    %409 = arith.index_cast %408 : i32 to index
    %c0_91 = arith.constant 0 : index
    %410 = vector.load %arg11[%409, %c0_91] : memref<16x32xf32, #tpu.memory_space<vmem>>, vector<1x32xf32>
    %c1_92 = arith.constant 1 : index
    %c0_93 = arith.constant 0 : index
    %411 = vector.load %arg12[%c1_92, %c0_93] : memref<2x32xf32, #tpu.memory_space<vmem>>, vector<1x32xf32>
    tpu.vector_store %arg12[%c1_92, %c0_93], %410 {strides = array<i32>} : memref<2x32xf32, #tpu.memory_space<vmem>>, vector<1x32xf32>,
    %c0_94 = arith.constant 0 : index
    %c0_95 = arith.constant 0 : index
    %412 = vector.load %arg12[%c0_94, %c0_95] : memref<2x32xf32, #tpu.memory_space<vmem>>, vector<2x32xf32>
    %413 = arith.truncf %412 : vector<2x32xf32> to vector<2x32xbf16>
    %c0_96 = arith.constant 0 : index
    %c0_97 = arith.constant 0 : index
    %414 = vector.load %arg9[%c0_96, %c0_97] : memref<32x128xbf16, #tpu.memory_space<vmem>>, vector<32x128xbf16>
    %cst_98 = arith.constant dense<0.000000e+00> : vector<2x128xf32>
    %415 = tpu.matmul %413, %414, %cst_98 {dimension_numbers = #tpu.dot_dimension_numbers<[1], [0], [0], [1], [0, 0, 1, 1], [], []>} : vector<2x32xbf16>, vector<32x128xbf16>, vector<2x128xf32> -> vector<2x128xf32>
    %c0_99 = arith.constant 0 : index
    %c0_100 = arith.constant 0 : index
    %416 = vector.load %arg10[%c0_99, %c0_100] : memref<2x128xf32, #tpu.memory_space<vmem>>, vector<2x128xf32>
    tpu.vector_store %arg10[%c0_99, %c0_100], %415 {strides = array<i32>} : memref<2x128xf32, #tpu.memory_space<vmem>>, vector<2x128xf32>,
    return
  }
}

</mosaic_0001>

<bundles_post_ra>
// kernel: text_encoder_forward.1
= control target key start
LH: loop header
LB: loop body
LE: loop exit
PB: predicated region body
PF: predicated region fallthrough
CT: control target
= control target key end

     0   :  { %15 = vsyncpa [#allocation6], 0  ;;  %s3292_s0 = inlined_call_operand.vmem [shape: s32[2], index: 0, kind: input, shape index: {}]   ;;  %s3293_s1 = inlined_call_operand.vmem [shape: f32[16,32], index: 1, kind: input, shape index: {}]   ;;  %s3294_s2 = inlined_call_operand.vmem [shape: f32[8,32], index: 2, kind: input, shape index: {}]   ;;  %s3295_s3 = inlined_call_operand.vmem [shape: bf16[2,32,128], index: 3, kind: input, shape index: {}]   ;;  %s3296_s4 = inlined_call_operand.vmem [shape: bf16[2,32,32], index: 4, kind: input, shape index: {}]   ;;  %s3297_s5 = inlined_call_operand.vmem [shape: bf16[2,32,128], index: 5, kind: input, shape index: {}]   ;;  %s3298_s6 = inlined_call_operand.vmem [shape: bf16[2,128,32], index: 6, kind: input, shape index: {}]   ;;  %s3299_s7 = inlined_call_operand.vmem [shape: f32[2,8,128], index: 7, kind: input, shape index: {}]   ;;  %s3300_s8 = inlined_call_operand.vmem [shape: f32[2,32], index: 8, kind: input, shape index: {}]   ;;  %s3301_s9 = inlined_call_operand.vmem [shape: bf16[32,128], index: 9, kind: input, shape index: {}]   ;;  %s3302_s10 = inlined_call_operand.hbm [shape: f32[2,128], index: 10, kind: output, shape index: {}]  }
   0x1   :  { %16 = vsyncpa [#allocation5], 0  ;;  %s22_s15 = sshll.u32 %s3292_s0, 4  ;;  %s2582_s16 = smov [#allocation4]   ;;  %s23_s15 = int_to_ptr.vmem [resolvable:$true] %s22_s15 }
   0x2   :  { %25 = dma.vmem_to_smem %s23_s15, 16, %s2582_s16, [#allocation6]  }
   0x3   :  { %2578 = dma.done.wait [#allocation6], 16  }
   0x4   :  { %2579 = vsyncadd [#allocation6], 4294967280 }
   0x5   :  { %48 = sfence }
   0x6   :  { %v50_v0 = vld [vmem:[%s3294_s2] sm:$0xff]  ;;  %vm61_vm0 = vcmask 261120   ;;  %v52_v3 = vld [vmem:[%s3293_s1 + $0x8] sm:$0xff]  ;;  %v2583_v7 = vmov 32.0   ;;  %s2584_s26 = smov 104   ;;  %s2585_s27 = smov 120  }
   0x7   :  { %v51_v1 = vld [vmem:[%s3293_s1] sm:$0xff]  ;;  %v2664_v5 = vadd.f32 %v52_v3, %v50_v0  ;;  %2438 = vrcp.f32 %v2583_v7  ;;  %v2368_v24 = vld [vmem:[%s3295_s3 + $0x8] sm:$0xff]  ;;  %s2586_s28 = smov 112   ;;  %s2587_s29 = smov 96   ;;  %vm217_vm8 = vcmask 64512   ;;  %vm620_vm10 = vcmask 1043456  }
   0x8   :  { %v2657_v2 = vadd.f32 %v51_v1, %v50_v0  ;;  %146 = vmatpush.bf16.msra.mxu2 %v2368_v24  ;;  %v2367_v26 = vld [vmem:[%s3295_s3] sm:$0xff]  ;;  %s2588_s30 = smov 64   ;;  %s2589_s11 = smov 8  }
   0x9   :  { %v65_v6 = vsel %vm61_vm0, %v2664_v5, 0.0  ;;  %v2687_v43 = vld [vmem:[%s3299_s7] sm:$0xff]  ;;  %s2590_s12 = smov 16   ;;  %s2591_s13 = smov 24  }
   0xa   :  { %v62_v4 = vsel %vm61_vm0, %v2657_v2, 0.0  ;;  %v113_v46 = vperm.slane %v2687_v43, 0  ;;  %v116_v51 = vperm.slane %v2687_v43, 1  ;;  %v124_v56 = vperm.slane %v2687_v43, 2  ;;  %s2160_s15 = sshll.u32 %s3302_s10, 4  ;;  %s2161_s15 = int_to_ptr.hbm [resolvable:$true] %s2160_s15 }
   0xb   :  { %63 = vadd.xlane.f32.xlu0 %v62_v4 }
   0xc   :  { %147 = vmatpush.bf16.msra.mxu2 %v2367_v26 }
   0xd   :  { %v2439_v8 = vpop.eup %2438 }
   0xe   :  { %v69_v9 = vmul.f32 32.0, %v2439_v8  ;;  %vm73_vm1 = vweird.f32 %v2439_v8 }
  0x10   :  { %v70_v10 = vsub.f32 1.0, %v69_v9 }
  0x12   :  { %v71_v11 = vmul.f32 %v2439_v8, %v70_v10 }
  0x13   :  { %66 = vadd.xlane.f32.xlu0 %v65_v6 }
  0x14   :  { %v72_v12 = vadd.f32 %v2439_v8, %v71_v11 }
  0x16   :  { %v2668_v13 = vsel %vm73_vm1, %v2439_v8, %v72_v12 }
  0x7e   :  { %v64_v14 = vpop.xlane.xlu0 %63 }
  0x7f   :  { %v75_v15 = vmul.f32 %v2668_v13, %v64_v14 }
  0x81   :  { %v77_v16 = vsub.f32 %v2657_v2, %v75_v15 }
  0x83   :  { %v79_v17 = vmul.f32 %v77_v16, %v77_v16 }
  0x85   :  { %v81_v18 = vsel %vm61_vm0, %v79_v17, 0.0 }
  0x86   :  { %82 = vadd.xlane.f32.xlu1 %v81_v18  ;;  %v67_v19 = vpop.xlane.xlu0 %66 }
  0x87   :  { %v76_v20 = vmul.f32 %v2668_v13, %v67_v19 }
  0x89   :  { %v78_v21 = vsub.f32 %v2664_v5, %v76_v20 }
  0x8b   :  { %v80_v22 = vmul.f32 %v78_v21, %v78_v21 }
  0x8d   :  { %v84_v23 = vsel %vm61_vm0, %v80_v22, 0.0 }
  0x8e   :  { %85 = vadd.xlane.f32.xlu1 %v84_v23 }
  0xf9   :  { %v83_v25 = vpop.xlane.xlu1 %82 }
  0xfa   :  { %v87_v27 = vmul.f32 %v83_v25, %v2668_v13 }
  0xfc   :  { %v89_v28 = vadd.f32 1e-05, %v87_v27 }
  0xfe   :  { %2440 = vrsqrt.f32 %v89_v28  ;;  %vm97_vm3 = vweird.f32 %v89_v28 }
 0x101   :  { %v86_v29 = vpop.xlane.xlu1 %85 }
 0x102   :  { %v88_v30 = vmul.f32 %v86_v29, %v2668_v13 }
 0x104   :  { %v2441_v31 = vpop.eup %2440  ;;  %v90_v32 = vadd.f32 1e-05, %v88_v30 }
 0x105   :  { %v92_v33 = vmul.f32 %v2441_v31, %v89_v28  ;;  %vm98_vm2 = vweird.f32 %v2441_v31 }
 0x106   :  { %2442 = vrsqrt.f32 %v90_v32  ;;  %vm99_vm4 = vmor %vm97_vm3, %vm98_vm2  ;;  %vm107_vm6 = vweird.f32 %v90_v32 }
 0x107   :  { %v93_v34 = vmul.f32 %v2441_v31, %v92_v33 }
 0x109   :  { %v94_v35 = vmul.f32 0.5, %v93_v34 }
 0x10b   :  { %v95_v36 = vsub.f32 1.5, %v94_v35 }
 0x10c   :  { %v2443_v37 = vpop.eup %2442 }
 0x10d   :  { %v96_v38 = vmul.f32 %v2441_v31, %v95_v36  ;;  %v102_v39 = vmul.f32 %v2443_v37, %v90_v32  ;;  %vm108_vm5 = vweird.f32 %v2443_v37 }
 0x10e   :  { %vm109_vm7 = vmor %vm107_vm6, %vm108_vm5 }
 0x10f   :  { %v103_v40 = vmul.f32 %v2443_v37, %v102_v39  ;;  %v100_v41 = vsel %vm99_vm4, %v2441_v31, %v96_v38 }
 0x110   :  { %v111_v45 = vmul.f32 %v100_v41, %v77_v16 }
 0x111   :  { %v104_v42 = vmul.f32 0.5, %v103_v40 }
 0x112   :  { %v114_v50 = vmul.f32 %v113_v46, %v111_v45 }
 0x113   :  { %v105_v44 = vsub.f32 1.5, %v104_v42 }
 0x114   :  { %v117_v53 = vadd.f32 %v116_v51, %v114_v50 }
 0x115   :  { %v106_v47 = vmul.f32 %v2443_v37, %v105_v44 }
 0x117   :  { %v110_v48 = vsel %vm109_vm7, %v2443_v37, %v106_v47 }
 0x118   :  { %v112_v49 = vmul.f32 %v110_v48, %v78_v21 }
 0x11a   :  { %v115_v52 = vmul.f32 %v113_v46, %v112_v49 }
 0x11c   :  { %v118_v54 = vadd.f32 %v116_v51, %v115_v52 }
 0x11e   :  { %v119_v55 = vpack.c.bf16 %v118_v54, %v117_v53 }
 0x120   :  { %2181 = vmatmul.msk.bf16.vlgmr.msra.gmra.mxu2 %vm61_vm0, %v119_v55 }
 0x1a3   :  { %v149_v57 = vpop.f32.mrf.mxu2 }
 0x1a4   :  { %v150_v58 = vadd.f32 %v149_v57, %v124_v56 }
 0x1a6   :  { %183 = vrot.lane.b32.xlu0 %v150_v58, %s2584_s26  ;;  %177 = vrot.lane.b32.xlu2 %v150_v58, %s2585_s27  ;;  %v2697_v61 = vmul.f32 0.35355338, %v150_v58  ;;  %v204_v18 = vpack.c.bf16 %v150_v58, %v150_v58 }
 0x1a8   :  { %v213_v21 = vunpack.c.l.b16 %v204_v18  ;;  %v196_v55 = vpack.c.bf16 %v2697_v61, %v2697_v61 }
 0x1aa   :  { %v2727_v26 = vpack.c.b16 %v213_v21, %v213_v21 }
 0x1ab   :  { %v151_v59 = vpop.f32.mrf.mxu2 }
 0x1ac   :  { %v152_v60 = vadd.f32 %v151_v59, %v124_v56 }
 0x1ae   :  { %187 = vrot.lane.b32.xlu1 %v152_v60, %s2585_s27  ;;  %180 = vrot.lane.b32.xlu2 %v150_v58, %s2586_s28  ;;  %v2719_v17 = vmul.f32 0.35355338, %v152_v60  ;;  %v208_v29 = vpack.c.bf16 %v152_v60, %v152_v60 }
 0x1b0   :  { %v310_v30 = vunpack.c.l.b16 %v208_v29 }
 0x1b2   :  { %v2741_v31 = vpack.c.b16 %v310_v30, %v310_v30 }
 0x1b6   :  { %190 = vrot.lane.b32.xlu2 %v152_v60, %s2586_s28  ;;  %160 = vrot.lane.b32.xlu1 %v2697_v61, %s2586_s28 }
 0x1be   :  { %193 = vrot.lane.b32.xlu2 %v152_v60, %s2584_s26 }
 0x200   :  { %v178_v62 = vpop.permute.xlu2 %177 }
 0x201   :  { %v205_v63 = vpack.c.bf16 %v178_v62, %v178_v62 }
 0x203   :  { %v238_v0 = vunpack.c.l.b16 %v205_v63  ;;  %v200_v63 = vpack.c.bf16 %v2719_v17, %v2719_v17 }
 0x205   :  { %v2703_v1 = vpack.c.b16 %v238_v0, %v238_v0 }
 0x207   :  { %240 = vrot.lane.b32.xlu2 %v2703_v1, %s2587_s29 }
 0x208   :  { %v181_v3 = vpop.permute.xlu2 %180 }
 0x209   :  { %v206_v4 = vpack.c.bf16 %v181_v3, %v181_v3 }
 0x20b   :  { %v262_v6 = vunpack.c.l.b16 %v206_v4 }
 0x20d   :  { %v2707_v7 = vpack.c.b16 %v262_v6, %v262_v6 }
 0x20f   :  { %264 = vrot.lane.b32.xlu0 %v2707_v7, %s2587_s29  ;;  %157 = vrot.lane.b32.xlu2 %v2697_v61, %s2585_s27 }
 0x210   :  { %v191_v8 = vpop.permute.xlu2 %190 }
 0x211   :  { %v210_v9 = vpack.c.bf16 %v191_v8, %v191_v8 }
 0x213   :  { %v358_v10 = vunpack.c.l.b16 %v210_v9 }
 0x215   :  { %v2713_v11 = vpack.c.b16 %v358_v10, %v358_v10 }
 0x217   :  { %360 = vrot.lane.b32.xlu1 %v2713_v11, %s2587_s29 }
 0x218   :  { %v184_v12 = vpop.permute.xlu0 %183  ;;  %v194_v22 = vpop.permute.xlu2 %193 }
 0x219   :  { %v207_v14 = vpack.c.bf16 %v184_v12, %v184_v12  ;;  %v211_v24 = vpack.c.bf16 %v194_v22, %v194_v22 }
 0x21b   :  { %v286_v15 = vunpack.c.l.b16 %v207_v14  ;;  %v382_v27 = vunpack.c.l.b16 %v211_v24 }
 0x21d   :  { %v2717_v16 = vpack.c.b16 %v286_v15, %v286_v15  ;;  %v2735_v28 = vpack.c.b16 %v382_v27, %v382_v27 }
 0x21f   :  { %288 = vrot.lane.b32.xlu0 %v2717_v16, %s2587_s29  ;;  %170 = vrot.lane.b32.xlu1 %v2719_v17, %s2586_s28 }
 0x220   :  { %v188_v19 = vpop.permute.xlu1 %187 }
 0x221   :  { %v209_v20 = vpack.c.bf16 %v188_v19, %v188_v19 }
 0x223   :  { %v334_v23 = vunpack.c.l.b16 %v209_v20 }
 0x225   :  { %v2725_v25 = vpack.c.b16 %v334_v23, %v334_v23 }
 0x227   :  { %163 = vrot.lane.b32.xlu0 %v2697_v61, %s2584_s26  ;;  %215 = vrot.lane.b32.xlu1 %v2727_v26, %s2587_s29  ;;  %v55_v61 = vlaneseq }
 0x228   :  { %336 = vrot.lane.b32.xlu2 %v2725_v25, %s2587_s29  ;;  %v161_v36 = vpop.permute.xlu1 %160 }
 0x229   :  { %v198_v41 = vpack.c.bf16 %v161_v36, %v161_v36  ;;  %v56_v0 = vshrl.u32 %v55_v61, 7  ;;  %v58_v3 = vand.u32 127, %v55_v61 }
 0x22b   :  { %vm2767_vm9 = vcmp.le.s32.totalorder %v58_v3, %v56_v0 }
 0x22f   :  { %384 = vrot.lane.b32.xlu0 %v2735_v28, %s2587_s29 }
 0x230   :  { %167 = vrot.lane.b32.xlu2 %v2719_v17, %s2585_s27 }
 0x237   :  { %312 = vrot.lane.b32.xlu0 %v2741_v31, %s2587_s29 }
 0x238   :  { %173 = vrot.lane.b32.xlu2 %v2719_v17, %s2584_s26 }
 0x261   :  { %v241_v32 = vpop.permute.xlu2 %240 }
 0x262   :  { %v246_v33 = vsel %vm217_vm8, %v241_v32, 0 }
 0x263   :  { %255 = vmatpush.bf16.xpose.msrb.mxu2 %v246_v33 }
 0x269   :  { %v158_v34 = vpop.permute.xlu2 %157 }
 0x26a   :  { %v197_v35 = vpack.c.bf16 %v158_v34, %v158_v34 }
 0x26c   :  { %2183 = vmatmul.msk.bf16.vlgmr.msrb.gmra.mxu2 %vm217_vm8, %v197_v35 }
 0x281   :  { %v265_v37 = vpop.permute.xlu0 %264 }
 0x282   :  { %v337_v38 = vpop.permute.xlu2 %336  ;;  %v270_v39 = vsel %vm217_vm8, %v265_v37, 0 }
 0x283   :  { %v342_v40 = vsel %vm217_vm8, %v337_v38, 0  ;;  %279 = vmatpush.bf16.xpose.msra.mxu3 %v270_v39 }
 0x284   :  { %351 = vmatpush.bf16.xpose.msra.mxu2 %v342_v40 }
 0x289   :  { %v361_v42 = vpop.permute.xlu1 %360 }
 0x28a   :  { %v168_v44 = vpop.permute.xlu2 %167  ;;  %2184 = vmatmul.msk.bf16.vlgmr.msra.gmra.mxu3 %vm217_vm8, %v198_v41  ;;  %v366_v45 = vsel %vm217_vm8, %v361_v42, 0 }
 0x28b   :  { %v201_v46 = vpack.c.bf16 %v168_v44, %v168_v44  ;;  %375 = vmatpush.bf16.xpose.msrb.mxu3 %v366_v45 }
 0x28d   :  { %2187 = vmatmul.msk.bf16.vlgmr.msra.gmra.mxu2 %vm217_vm8, %v201_v46 }
 0x291   :  { %v289_v47 = vpop.permute.xlu0 %288  ;;  %v171_v48 = vpop.permute.xlu1 %170 }
 0x292   :  { %v294_v49 = vsel %vm217_vm8, %v289_v47, 0  ;;  %v202_v50 = vpack.c.bf16 %v171_v48, %v171_v48  ;;  %v174_v58 = vpop.permute.xlu2 %173 }
 0x293   :  { %303 = vmatpush.bf16.xpose.msra.mxu0 %v294_v49  ;;  %v203_v60 = vpack.c.bf16 %v174_v58, %v174_v58 }
 0x299   :  { %v164_v51 = vpop.permute.xlu0 %163  ;;  %v216_v52 = vpop.permute.xlu1 %215 }
 0x29a   :  { %v199_v53 = vpack.c.bf16 %v164_v51, %v164_v51  ;;  %2188 = vmatmul.msk.bf16.vlgmr.msrb.gmra.mxu3 %vm217_vm8, %v202_v50  ;;  %v222_v54 = vsel %vm217_vm8, %v216_v52, 0 }
 0x29b   :  { %231 = vmatpush.bf16.xpose.msra.mxu1 %v222_v54 }
 0x29c   :  { %2185 = vmatmul.msk.bf16.vlgmr.msra.gmra.mxu0 %vm217_vm8, %v199_v53 }
 0x2a1   :  { %v385_v56 = vpop.permute.xlu0 %384 }
 0x2a2   :  { %2182 = vmatmul.msk.bf16.vlgmr.msra.gmra.mxu1 %vm217_vm8, %v196_v55  ;;  %v390_v57 = vsel %vm217_vm8, %v385_v56, 0 }
 0x2a3   :  { %399 = vmatpush.bf16.xpose.msrb.mxu0 %v390_v57 }
 0x2a9   :  { %v313_v59 = vpop.permute.xlu0 %312 }
 0x2aa   :  { %v318_v62 = vsel %vm217_vm8, %v313_v59, 0 }
 0x2ab   :  { %327 = vmatpush.bf16.xpose.msrb.mxu1 %v318_v62 }
 0x2ac   :  { %2189 = vmatmul.msk.bf16.vlgmr.msrb.gmra.mxu0 %vm217_vm8, %v203_v60 }
 0x2b2   :  { %2186 = vmatmul.msk.bf16.vlgmr.msrb.gmra.mxu1 %vm217_vm8, %v200_v63 }
 0x2ef   :  { %v257_v6 = vpop.f32.mrf.mxu2 }
 0x2f0   :  { %v408_v8 = vsel %vm2767_vm9, %v257_v6, -1e+30 }
 0x2f1   :  { %v418_v9 = vsel %vm217_vm8, %v408_v8, -inf }
 0x2f2   :  { %419 = vmax.xlane.f32.xlu2 %v418_v9 }
 0x2f7   :  { %v259_v10 = vpop.f32.mrf.mxu2 }
 0x30d   :  { %v281_v12 = vpop.f32.mrf.mxu3 }
 0x30e   :  { %v409_v41 = vsel %vm2767_vm9, %v281_v12, -1e+30 }
 0x30f   :  { %v421_v44 = vsel %vm217_vm8, %v409_v41, -inf }
 0x310   :  { %v353_v14 = vpop.f32.mrf.mxu2 }
 0x311   :  { %v412_v30 = vsel %vm2767_vm9, %v353_v14, -1e+30 }
 0x312   :  { %v430_v34 = vsel %vm217_vm8, %v412_v30, -inf }
 0x315   :  { %v283_v15 = vpop.f32.mrf.mxu3 }
 0x318   :  { %v355_v17 = vpop.f32.mrf.mxu2 }
 0x319   :  { %v305_v18 = vpop.f32.mrf.mxu0 }
 0x31a   :  { %v410_v19 = vsel %vm2767_vm9, %v305_v18, -1e+30 }
 0x31b   :  { %v424_v20 = vsel %vm217_vm8, %v410_v19, -inf }
 0x31c   :  { %425 = vmax.xlane.f32.xlu0 %v424_v20 }
 0x31d   :  { %v377_v21 = vpop.f32.mrf.mxu3 }
 0x31e   :  { %v413_v45 = vsel %vm2767_vm9, %v377_v21, -1e+30 }
 0x31f   :  { %v233_v22 = vpop.f32.mrf.mxu1  ;;  %v433_v46 = vsel %vm217_vm8, %v413_v45, -inf }
 0x320   :  { %v2779_v23 = vsel %vm2767_vm9, %v233_v22, -1e+30 }
 0x321   :  { %v307_v24 = vpop.f32.mrf.mxu0  ;;  %v415_v27 = vsel %vm217_vm8, %v2779_v23, -inf }
 0x322   :  { %416 = vmax.xlane.f32.xlu2 %v415_v27 }
 0x325   :  { %v379_v29 = vpop.f32.mrf.mxu3 }
 0x327   :  { %v235_v32 = vpop.f32.mrf.mxu1 }
 0x329   :  { %v401_v33 = vpop.f32.mrf.mxu0 }
 0x32a   :  { %v414_v35 = vsel %vm2767_vm9, %v401_v33, -1e+30  ;;  %431 = vmax.xlane.f32.xlu2 %v430_v34 }
 0x32b   :  { %v436_v36 = vsel %vm217_vm8, %v414_v35, -inf }
 0x32c   :  { %437 = vmax.xlane.f32.xlu0 %v436_v36 }
 0x32f   :  { %v329_v37 = vpop.f32.mrf.mxu1 }
 0x330   :  { %v2791_v38 = vsel %vm2767_vm9, %v329_v37, -1e+30 }
 0x331   :  { %v403_v39 = vpop.f32.mrf.mxu0  ;;  %v427_v40 = vsel %vm217_vm8, %v2791_v38, -inf }
 0x332   :  { %428 = vmax.xlane.f32.xlu1 %v427_v40 }
 0x337   :  { %v331_v42 = vpop.f32.mrf.mxu1 }
 0x33a   :  { %422 = vmax.xlane.f32.xlu1 %v421_v44 }
 0x340   :  { %658 = vrot.lane.b32.xlu0 %v2707_v7, %s2588_s30 }
 0x342   :  { %434 = vmax.xlane.f32.xlu1 %v433_v46 }
 0x35b   :  { %637 = vrot.lane.b32.xlu1 %v2703_v1, %s2588_s30 }
 0x365   :  { %v420_v47 = vpop.xlane.xlu2 %419 }
 0x366   :  { %v440_v48 = vsub.f32 %v408_v8, %v420_v47 }
 0x368   :  { %v449_v49 = vmul.f32 1.442695, %v440_v48 }
 0x36a   :  { %2444 = vpow2.f32 %v449_v49 }
 0x370   :  { %v2805_v50 = vpop.eup %2444 }
 0x371   :  { %v466_v51 = vsel %vm217_vm8, %v2805_v50, 0.0 }
 0x385   :  { %467 = vadd.xlane.f32.xlu1 %v466_v51 }
 0x38f   :  { %v426_v52 = vpop.xlane.xlu0 %425 }
 0x390   :  { %v442_v53 = vsub.f32 %v410_v19, %v426_v52 }
 0x392   :  { %v453_v54 = vmul.f32 1.442695, %v442_v53 }
 0x394   :  { %2446 = vpow2.f32 %v453_v54 }
 0x395   :  { %v417_v58 = vpop.xlane.xlu2 %416 }
 0x396   :  { %v439_v12 = vsub.f32 %v2779_v23, %v417_v58 }
 0x398   :  { %v447_v19 = vmul.f32 1.442695, %v439_v12 }
 0x39a   :  { %v2809_v7 = vpop.eup %2446 }
 0x39b   :  { %v472_v55 = vsel %vm217_vm8, %v2809_v7, 0.0 }
 0x39c   :  { %473 = vadd.xlane.f32.xlu2 %v472_v55 }
 0x39d   :  { %v432_v63 = vpop.xlane.xlu2 %431 }
 0x39e   :  { %742 = vrot.lane.b32.xlu1 %v2713_v11, %s2588_s30  ;;  %v444_v3 = vsub.f32 %v412_v30, %v432_v63 }
 0x39f   :  { %v438_v1 = vpop.xlane.xlu0 %437 }
 0x3a0   :  { %v446_v56 = vsub.f32 %v414_v35, %v438_v1  ;;  %v457_v9 = vmul.f32 1.442695, %v444_v3 }
 0x3a2   :  { %v461_v57 = vmul.f32 1.442695, %v446_v56 }
 0x3a4   :  { %2448 = vpow2.f32 %v461_v57 }
 0x3a5   :  { %v429_v59 = vpop.xlane.xlu1 %428 }
 0x3a6   :  { %v443_v32 = vsub.f32 %v2791_v38, %v429_v59 }
 0x3a8   :  { %v455_v33 = vmul.f32 1.442695, %v443_v32 }
 0x3aa   :  { %v2815_v60 = vpop.eup %2448 }
 0x3ab   :  { %v484_v62 = vsel %vm217_vm8, %v2815_v60, 0.0 }
 0x3ac   :  { %485 = vadd.xlane.f32.xlu2 %v484_v62 }
 0x3ad   :  { %v423_v61 = vpop.xlane.xlu1 %422 }
 0x3ae   :  { %v441_v0 = vsub.f32 %v409_v41, %v423_v61 }
 0x3b0   :  { %v451_v6 = vmul.f32 1.442695, %v441_v0 }
 0x3b2   :  { %2450 = vpow2.f32 %v451_v6  ;;  %v659_v11 = vpop.permute.xlu0 %658 }
 0x3b3   :  { %v664_v8 = vsel %vm620_vm10, %v659_v11, 0  ;;  %2452 = vpow2.f32 %v457_v9 }
 0x3b4   :  { %673 = vmatpush.bf16.msra.mxu3 %v664_v8 }
 0x3b5   :  { %v435_v10 = vpop.xlane.xlu1 %434 }
 0x3b6   :  { %v445_v14 = vsub.f32 %v413_v45, %v435_v10 }
 0x3b8   :  { %v2821_v15 = vpop.eup %2450  ;;  %v459_v17 = vmul.f32 1.442695, %v445_v14 }
 0x3b9   :  { %v469_v18 = vsel %vm217_vm8, %v2821_v15, 0.0  ;;  %v2825_v20 = vpop.eup %2452 }
 0x3ba   :  { %2454 = vpow2.f32 %v459_v17  ;;  %470 = vadd.xlane.f32.xlu0 %v469_v18  ;;  %v478_v22 = vsel %vm217_vm8, %v2825_v20, 0.0 }
 0x3bb   :  { %2456 = vpow2.f32 %v447_v19 }
 0x3bc   :  { %2458 = vpow2.f32 %v455_v33 }
 0x3c0   :  { %v2827_v21 = vpop.eup %2454 }
 0x3c1   :  { %v481_v23 = vsel %vm217_vm8, %v2827_v21, 0.0  ;;  %v2833_v24 = vpop.eup %2456 }
 0x3c2   :  { %479 = vadd.xlane.f32.xlu0 %v478_v22  ;;  %482 = vadd.xlane.f32.xlu2 %v481_v23  ;;  %v463_v27 = vsel %vm217_vm8, %v2833_v24, 0.0  ;;  %v2849_v35 = vpop.eup %2458 }
 0x3c8   :  { %464 = vadd.xlane.f32.xlu1 %v463_v27 }
 0x3cd   :  { %v638_v29 = vpop.permute.xlu1 %637 }
 0x3ce   :  { %v643_v30 = vsel %vm620_vm10, %v638_v29, 0 }
 0x3cf   :  { %652 = vmatpush.bf16.msrb.mxu2 %v643_v30 }
 0x3d6   :  { %721 = vrot.lane.b32.xlu0 %v2725_v25, %s2588_s30 }
 0x3da   :  { %679 = vrot.lane.b32.xlu2 %v2717_v16, %s2588_s30 }
 0x3de   :  { %763 = vrot.lane.b32.xlu0 %v2735_v28, %s2588_s30  ;;  %v475_v28 = vsel %vm217_vm8, %v2849_v35, 0.0 }
 0x3e6   :  { %615 = vrot.lane.b32.xlu0 %v2727_v26, %s2588_s30 }
 0x3ee   :  { %700 = vrot.lane.b32.xlu0 %v2741_v31, %s2588_s30 }
 0x3f8   :  { %v468_v34 = vpop.xlane.xlu1 %467 }
 0x3f9   :  { %2460 = vrcp.f32 %v468_v34  ;;  %v513_v37 = vand.u32 2147483648, %v468_v34  ;;  %v511_v39 = vand.u32 2147483647, %v468_v34  ;;  %vm507_vm12 = vweird.f32 %v468_v34 }
 0x3fb   :  { %v514_v38 = vor.u32 1.1754944e-38, %v513_v37  ;;  %vm512_vm14 = vcmp.eq.f32.partialorder %v511_v39, 8.507059e+37 }
 0x3ff   :  { %v2461_v25 = vpop.eup %2460 }
 0x400   :  { %v503_v36 = vmul.f32 %v2461_v25, %v468_v34  ;;  %vm508_vm11 = vweird.f32 %v2461_v25 }
 0x401   :  { %vm509_vm13 = vmor %vm507_vm12, %vm508_vm11 }
 0x402   :  { %v504_v16 = vsub.f32 1.0, %v503_v36 }
 0x403   :  { %476 = vadd.xlane.f32.xlu2 %v475_v28 }
 0x404   :  { %v505_v26 = vmul.f32 %v2461_v25, %v504_v16 }
 0x406   :  { %v506_v31 = vadd.f32 %v2461_v25, %v505_v26 }
 0x408   :  { %v510_v40 = vsel %vm509_vm13, %v2461_v25, %v506_v31 }
 0x409   :  { %v515_v41 = vsel %vm512_vm14, %v514_v38, %v510_v40 }
 0x40a   :  { %v516_v42 = vmul.f32 %v2805_v50, %v515_v41 }
 0x40c   :  { %v608_v44 = vpack.c.bf16 %v516_v42, %v516_v42 }
 0x40e   :  { %2191 = vmatmul.msk.bf16.vlgmr.msrb.gmra.mxu2 %vm217_vm8, %v608_v44 }
 0x40f   :  { %v474_v47 = vpop.xlane.xlu2 %473 }
 0x410   :  { %v743_v45 = vpop.permute.xlu1 %742  ;;  %2462 = vrcp.f32 %v474_v47  ;;  %v543_v1 = vand.u32 2147483648, %v474_v47  ;;  %vm537_vm1 = vweird.f32 %v474_v47  ;;  %v541_v57 = vand.u32 2147483647, %v474_v47 }
 0x411   :  { %v748_v46 = vsel %vm620_vm10, %v743_v45, 0 }
 0x412   :  { %757 = vmatpush.bf16.msrb.mxu3 %v748_v46  ;;  %v544_v0 = vor.u32 1.1754944e-38, %v543_v1  ;;  %vm542_vm3 = vcmp.eq.f32.partialorder %v541_v57, 8.507059e+37 }
 0x416   :  { %v2463_v48 = vpop.eup %2462 }
 0x417   :  { %v533_v49 = vmul.f32 %v2463_v48, %v474_v47  ;;  %vm538_vm15 = vweird.f32 %v2463_v48 }
 0x418   :  { %vm539_vm2 = vmor %vm537_vm1, %vm538_vm15 }
 0x419   :  { %v534_v51 = vsub.f32 1.0, %v533_v49 }
 0x41b   :  { %v535_v54 = vmul.f32 %v2463_v48, %v534_v51 }
 0x41d   :  { %v536_v50 = vadd.f32 %v2463_v48, %v535_v54 }
 0x41f   :  { %v2856_v52 = vpop.xlane.xlu2 %485  ;;  %v540_v63 = vsel %vm539_vm2, %v2463_v48, %v536_v50 }
 0x420   :  { %2464 = vrcp.f32 %v2856_v52  ;;  %v545_v11 = vsel %vm542_vm3, %v544_v0, %v540_v63  ;;  %v603_v49 = vand.u32 2147483648, %v2856_v52 }
 0x421   :  { %v546_v18 = vmul.f32 %v2809_v7, %v545_v11 }
 0x423   :  { %v610_v28 = vpack.c.bf16 %v546_v18, %v546_v18 }
 0x426   :  { %v2859_v55 = vpop.eup %2464 }
 0x427   :  { %v593_v61 = vmul.f32 %v2859_v55, %v2856_v52  ;;  %vm598_vm12 = vweird.f32 %v2859_v55 }
 0x429   :  { %v594_v10 = vsub.f32 1.0, %v593_v61 }
 0x42b   :  { %v595_v30 = vmul.f32 %v2859_v55, %v594_v10 }
 0x42d   :  { %v471_v53 = vpop.xlane.xlu0 %470  ;;  %v596_v38 = vadd.f32 %v2859_v55, %v595_v30 }
 0x42e   :  { %2466 = vrcp.f32 %v471_v53  ;;  %v528_v6 = vand.u32 2147483648, %v471_v53  ;;  %v526_v9 = vand.u32 2147483647, %v471_v53  ;;  %vm522_vm5 = vweird.f32 %v471_v53 }
 0x430   :  { %v529_v19 = vor.u32 1.1754944e-38, %v528_v6  ;;  %vm527_vm7 = vcmp.eq.f32.partialorder %v526_v9, 8.507059e+37 }
 0x434   :  { %v2467_v56 = vpop.eup %2466 }
 0x435   :  { %v518_v58 = vmul.f32 %v2467_v56, %v471_v53  ;;  %v480_v59 = vpop.xlane.xlu0 %479  ;;  %v2861_v62 = vpop.xlane.xlu2 %482  ;;  %vm523_vm4 = vweird.f32 %v2467_v56  ;;  %v601_v53 = vand.u32 2147483647, %v2856_v52 }
 0x436   :  { %2468 = vrcp.f32 %v480_v59  ;;  %vm524_vm6 = vmor %vm522_vm5, %vm523_vm4  ;;  %v573_v7 = vand.u32 2147483648, %v480_v59  ;;  %v571_v26 = vand.u32 2147483647, %v480_v59  ;;  %vm567_vm13 = vweird.f32 %v480_v59 }
 0x437   :  { %v519_v3 = vsub.f32 1.0, %v518_v58  ;;  %2470 = vrcp.f32 %v2861_v62  ;;  %vm582_vm1 = vweird.f32 %v2861_v62  ;;  %v588_v45 = vand.u32 2147483648, %v2861_v62 }
 0x438   :  { %v574_v42 = vor.u32 1.1754944e-38, %v573_v7  ;;  %vm572_vm2 = vcmp.eq.f32.partialorder %v571_v26, 8.507059e+37  ;;  %v586_v47 = vand.u32 2147483647, %v2861_v62  ;;  %vm597_vm4 = vweird.f32 %v2856_v52 }
 0x439   :  { %v520_v8 = vmul.f32 %v2467_v56, %v519_v3  ;;  %vm599_vm5 = vmor %vm597_vm4, %vm598_vm12  ;;  %v589_v1 = vor.u32 1.1754944e-38, %v588_v45  ;;  %vm797_vm4 = vcmask 130048  }
 0x43a   :  { %v600_v57 = vsel %vm599_vm5, %v2859_v55, %v596_v38  ;;  %vm799_vm5 = vcmask 195584  }
 0x43b   :  { %v521_v12 = vadd.f32 %v2467_v56, %v520_v8  ;;  %v2866_v14 = vpop.xlane.xlu1 %464 }
 0x43c   :  { %v2469_v17 = vpop.eup %2468  ;;  %2472 = vrcp.f32 %v2866_v14  ;;  %v498_v3 = vand.u32 2147483648, %v2866_v14  ;;  %vm492_vm12 = vweird.f32 %v2866_v14  ;;  %v496_v6 = vand.u32 2147483647, %v2866_v14 }
 0x43d   :  { %v2471_v22 = vpop.eup %2470  ;;  %v525_v23 = vsel %vm524_vm6, %v2467_v56, %v521_v12  ;;  %v563_v27 = vmul.f32 %v2469_v17, %v480_v59  ;;  %v680_v29 = vpop.permute.xlu2 %679  ;;  %vm568_vm11 = vweird.f32 %v2469_v17  ;;  %vm587_vm6 = vcmp.eq.f32.partialorder %v586_v47, 8.507059e+37 }
 0x43e   :  { %v530_v32 = vsel %vm527_vm7, %v529_v19, %v525_v23  ;;  %v578_v33 = vmul.f32 %v2471_v22, %v2861_v62  ;;  %v685_v36 = vsel %vm620_vm10, %v680_v29, 0  ;;  %vm583_vm14 = vweird.f32 %v2471_v22  ;;  %vm569_vm15 = vmor %vm567_vm13, %vm568_vm11 }
 0x43f   :  { %v531_v34 = vmul.f32 %v2821_v15, %v530_v32  ;;  %v564_v25 = vsub.f32 1.0, %v563_v27  ;;  %694 = vmatpush.bf16.msra.mxu0 %v685_v36  ;;  %vm584_vm3 = vmor %vm582_vm1, %vm583_vm14  ;;  %v604_v62 = vor.u32 1.1754944e-38, %v603_v49  ;;  %vm602_vm7 = vcmp.eq.f32.partialorder %v601_v53, 8.507059e+37 }
 0x440   :  { %v579_v16 = vsub.f32 1.0, %v578_v33  ;;  %v499_v12 = vor.u32 1.1754944e-38, %v498_v3  ;;  %vm497_vm14 = vcmp.eq.f32.partialorder %v496_v6, 8.507059e+37 }
 0x441   :  { %v565_v37 = vmul.f32 %v2469_v17, %v564_v25  ;;  %v609_v39 = vpack.c.bf16 %v531_v34, %v531_v34  ;;  %v605_v52 = vsel %vm602_vm7, %v604_v62, %v600_v57 }
 0x442   :  { %v2473_v31 = vpop.eup %2472  ;;  %v580_v40 = vmul.f32 %v2471_v22, %v579_v16  ;;  %2193 = vmatmul.msk.bf16.vlgmr.msra.gmra.mxu0 %vm217_vm8, %v610_v28  ;;  %v606_v55 = vmul.f32 %v2815_v60, %v605_v52 }
 0x443   :  { %v566_v41 = vadd.f32 %v2469_v17, %v565_v37  ;;  %v488_v15 = vmul.f32 %v2473_v31, %v2866_v14  ;;  %2192 = vmatmul.msk.bf16.vlgmr.msra.gmra.mxu3 %vm217_vm8, %v609_v39  ;;  %vm493_vm11 = vweird.f32 %v2473_v31 }
 0x444   :  { %v581_v44 = vadd.f32 %v2471_v22, %v580_v40  ;;  %vm494_vm13 = vmor %vm492_vm12, %vm493_vm11 }
 0x445   :  { %v570_v46 = vsel %vm569_vm15, %v2469_v17, %v566_v41  ;;  %v489_v48 = vsub.f32 1.0, %v488_v15 }
 0x446   :  { %v575_v51 = vsel %vm572_vm2, %v574_v42, %v570_v46  ;;  %v585_v50 = vsel %vm584_vm3, %v2471_v22, %v581_v44 }
 0x447   :  { %v576_v54 = vmul.f32 %v2825_v20, %v575_v51  ;;  %v490_v58 = vmul.f32 %v2473_v31, %v489_v48  ;;  %v590_v63 = vsel %vm587_vm6, %v589_v1, %v585_v50  ;;  %v2370_v1 = vld [vmem:[%s3296_s4 + $0x8] sm:$0xff] }
 0x448   :  { %v722_v56 = vpop.permute.xlu0 %721  ;;  %v591_v20 = vmul.f32 %v2827_v21, %v590_v63  ;;  %v614_v21 = vpack.c.bf16 %v606_v55, %v606_v55 }
 0x449   :  { %v727_v59 = vsel %vm620_vm10, %v722_v56, 0  ;;  %v612_v61 = vpack.c.bf16 %v576_v54, %v576_v54  ;;  %v491_v0 = vadd.f32 %v2473_v31, %v490_v58  ;;  %v2369_v56 = vld [vmem:[%s3296_s4] sm:$0xff] }
 0x44a   :  { %736 = vmatpush.bf16.msra.mxu2 %v727_v59  ;;  %v613_v10 = vpack.c.bf16 %v591_v20, %v591_v20 }
 0x44b   :  { %v495_v8 = vsel %vm494_vm13, %v2473_v31, %v491_v0 }
 0x44c   :  { %v500_v17 = vsel %vm497_vm14, %v499_v12, %v495_v8  ;;  %v821_v12 = vperm.slane %v2687_v43, 3 }
 0x44d   :  { %2195 = vmatmul.msk.bf16.vlgmr.msra.gmra.mxu2 %vm217_vm8, %v612_v61  ;;  %v501_v60 = vmul.f32 %v2833_v24, %v500_v17 }
 0x44f   :  { %v607_v19 = vpack.c.bf16 %v501_v60, %v501_v60 }
 0x450   :  { %v764_v11 = vpop.permute.xlu0 %763 }
 0x451   :  { %v769_v9 = vsel %vm620_vm10, %v764_v11, 0 }
 0x452   :  { %778 = vmatpush.bf16.msrb.mxu0 %v769_v9 }
 0x453   :  { %2196 = vmatmul.msk.bf16.vlgmr.msrb.gmra.mxu3 %vm217_vm8, %v613_v10 }
 0x455   :  { %2197 = vmatmul.msk.bf16.vlgmr.msrb.gmra.mxu0 %vm217_vm8, %v614_v21 }
 0x458   :  { %v616_v18 = vpop.permute.xlu0 %615 }
 0x459   :  { %v622_v14 = vsel %vm620_vm10, %v616_v18, 0 }
 0x45a   :  { %631 = vmatpush.bf16.msra.mxu1 %v622_v14 }
 0x45d   :  { %2190 = vmatmul.msk.bf16.vlgmr.msra.gmra.mxu1 %vm217_vm8, %v607_v19 }
 0x460   :  { %v701_v22 = vpop.permute.xlu0 %700 }
 0x461   :  { %v706_v23 = vsel %vm620_vm10, %v701_v22, 0 }
 0x462   :  { %715 = vmatpush.bf16.msrb.mxu1 %v706_v23 }
 0x466   :  { %843 = vmatpush.bf16.msra.mxu1 %v2370_v1  ;;  %v2951_v1 = vld [vmem:[%s3299_s7] sm:$0xff] }
 0x46a   :  { %844 = vmatpush.bf16.msra.mxu1 %v2369_v56  ;;  %v900_v56 = vperm.slane %v2951_v1, 5 }
 0x476   :  { %v477_v27 = vpop.xlane.xlu2 %476 }
 0x477   :  { %2474 = vrcp.f32 %v477_v27  ;;  %v558_v33 = vand.u32 2147483648, %v477_v27  ;;  %v556_v24 = vand.u32 2147483647, %v477_v27  ;;  %vm552_vm1 = vweird.f32 %v477_v27 }
 0x479   :  { %v559_v36 = vor.u32 1.1754944e-38, %v558_v33  ;;  %vm557_vm3 = vcmp.eq.f32.partialorder %v556_v24, 8.507059e+37 }
 0x47d   :  { %v2475_v29 = vpop.eup %2474 }
 0x47e   :  { %v548_v30 = vmul.f32 %v2475_v29, %v477_v27  ;;  %vm553_vm15 = vweird.f32 %v2475_v29 }
 0x47f   :  { %vm554_vm2 = vmor %vm552_vm1, %vm553_vm15 }
 0x480   :  { %v549_v32 = vsub.f32 1.0, %v548_v30 }
 0x482   :  { %v550_v34 = vmul.f32 %v2475_v29, %v549_v32 }
 0x484   :  { %v551_v25 = vadd.f32 %v2475_v29, %v550_v34 }
 0x486   :  { %v555_v7 = vsel %vm554_vm2, %v2475_v29, %v551_v25 }
 0x487   :  { %v560_v16 = vsel %vm557_vm3, %v559_v36, %v555_v7  ;;  %v2372_v7 = vld [vmem:[%s3297_s5 + $0x8] sm:$0xff] }
 0x488   :  { %v561_v28 = vmul.f32 %v2849_v35, %v560_v16  ;;  %930 = vmatpush.bf16.msrb.mxu2 %v2372_v7 }
 0x48a   :  { %v611_v37 = vpack.c.bf16 %v561_v28, %v561_v28 }
 0x48c   :  { %2194 = vmatmul.msk.bf16.vlgmr.msrb.gmra.mxu1 %vm217_vm8, %v611_v37  ;;  %v2371_v37 = vld [vmem:[%s3297_s5] sm:$0xff] }
 0x48d   :  { %931 = vmatpush.bf16.msrb.mxu2 %v2371_v37 }
 0x491   :  { %v654_v26 = vpop.f32.mrf.mxu2 }
 0x499   :  { %v656_v39 = vpop.f32.mrf.mxu2 }
 0x4bf   :  { %v696_v31 = vpop.f32.mrf.mxu0 }
 0x4c6   :  { %v675_v38 = vpop.f32.mrf.mxu3 }
 0x4c7   :  { %v698_v40 = vpop.f32.mrf.mxu0 }
 0x4ce   :  { %v677_v41 = vpop.f32.mrf.mxu3 }
 0x4d0   :  { %v738_v15 = vpop.f32.mrf.mxu2 }
 0x4d1   :  { %v2408_v42 = vpack.i.bf16 %v738_v15, %v654_v26 }
 0x4d2   :  { %v780_v44 = vpop.f32.mrf.mxu0 }
 0x4d3   :  { %2409 = vrot.lane.b32.xlu0 %v2408_v42, %s2589_s11  ;;  %v2418_v51 = vpack.i.bf16 %v780_v44, %v696_v31 }
 0x4d6   :  { %v759_v45 = vpop.f32.mrf.mxu3 }
 0x4d7   :  { %v2413_v47 = vpack.i.bf16 %v759_v45, %v675_v38 }
 0x4d8   :  { %v740_v46 = vpop.f32.mrf.mxu2 }
 0x4da   :  { %v633_v48 = vpop.f32.mrf.mxu1  ;;  %v782_v35 = vpop.f32.mrf.mxu0 }
 0x4db   :  { %2414 = vrot.lane.b32.xlu0 %v2413_v47, %s2590_s12 }
 0x4de   :  { %v761_v49 = vpop.f32.mrf.mxu3 }
 0x4e2   :  { %v635_v53 = vpop.f32.mrf.mxu1 }
 0x4e3   :  { %2419 = vrot.lane.b32.xlu0 %v2418_v51, %s2591_s13  ;;  %v897_v51 = vperm.slane %v2687_v43, 4  ;;  %v2380_v43 = vld [vmem:[%s3298_s6 + $0x38] sm:$0xff] }
 0x4e4   :  { %1046 = vmatpush.bf16.msra.mxu3 %v2380_v43 }
 0x509   :  { %v717_v54 = vpop.f32.mrf.mxu1 }
 0x511   :  { %v719_v50 = vpop.f32.mrf.mxu1 }
 0x545   :  { %v2410_v57 = vpop.permute.xlu0 %2409 }
 0x546   :  { %v2412_v59 = vunpack.i.h.bf16 %v2410_v57  ;;  %v2411_v62 = vunpack.i.l.bf16 %v2410_v57 }
 0x548   :  { %v796_v20 = vsel %vm217_vm8, %v633_v48, %v2411_v62  ;;  %v813_v0 = vsel %vm217_vm8, %v717_v54, %v2412_v59 }
 0x54d   :  { %v2415_v58 = vpop.permute.xlu0 %2414 }
 0x54e   :  { %v2417_v63 = vunpack.i.h.bf16 %v2415_v58  ;;  %v2416_v61 = vunpack.i.l.bf16 %v2415_v58 }
 0x550   :  { %v798_v6 = vsel %vm797_vm4, %v796_v20, %v2416_v61  ;;  %v814_v11 = vsel %vm797_vm4, %v813_v0, %v2417_v63  ;;  %v2378_v20 = vld [vmem:[%s3298_s6 + $0x28] sm:$0xff]  ;;  %v2377_v0 = vld [vmem:[%s3298_s6 + $0x20] sm:$0xff] }
 0x555   :  { %v2420_v52 = vpop.permute.xlu0 %2419 }
 0x556   :  { %v2422_v3 = vunpack.i.h.bf16 %v2420_v52  ;;  %v2421_v55 = vunpack.i.l.bf16 %v2420_v52  ;;  %v2379_v52 = vld [vmem:[%s3298_s6 + $0x30] sm:$0xff] }
 0x557   :  { %1047 = vmatpush.bf16.msra.mxu3 %v2379_v52 }
 0x558   :  { %v800_v8 = vsel %vm799_vm5, %v798_v6, %v2421_v55  ;;  %v815_v9 = vsel %vm799_vm5, %v814_v11, %v2422_v3  ;;  %v908_v3 = vperm.slane %v2951_v1, 6  ;;  %v2376_v55 = vld [vmem:[%s3298_s6 + $0x18] sm:$0xff] }
 0x559   :  { %v816_v10 = vpack.c.bf16 %v815_v9, %v800_v8  ;;  %v2375_v8 = vld [vmem:[%s3298_s6 + $0x10] sm:$0xff] }
 0x55b   :  { %2206 = vmatmul.msk.bf16.vlgmr.msra.gmra.mxu1 %vm61_vm0, %v816_v10  ;;  %1048 = vmatpush.bf16.msra.mxu3 %v2378_v20  ;;  %v2382_v20 = vld [vmem:[%s3295_s3 + $0x18] sm:$0xff] }
 0x55c   :  { %1142 = vmatpush.bf16.msra.mxu0 %v2382_v20 }
 0x55f   :  { %1049 = vmatpush.bf16.msra.mxu3 %v2377_v0 }
 0x563   :  { %1050 = vmatpush.bf16.msra.mxu3 %v2376_v55  ;;  %v2381_v55 = vld [vmem:[%s3295_s3 + $0x10] sm:$0xff] }
 0x564   :  { %1143 = vmatpush.bf16.msra.mxu0 %v2381_v55 }
 0x567   :  { %1051 = vmatpush.bf16.msra.mxu3 %v2375_v8 }
 0x5d8   :  { %v846_v21 = vpop.f32.mrf.mxu1 }
 0x5d9   :  { %v847_v17 = vadd.f32 %v846_v21, %v821_v12 }
 0x5db   :  { %v2924_v60 = vadd.f32 %v847_v17, %v2657_v2 }
 0x5dd   :  { %v853_v18 = vsel %vm61_vm0, %v2924_v60, 0.0 }
 0x5de   :  { %854 = vadd.xlane.f32.xlu1 %v853_v18  ;;  %v2373_v18 = vld [vmem:[%s3298_s6] sm:$0xff] }
 0x5e0   :  { %v848_v14 = vpop.f32.mrf.mxu1 }
 0x5e1   :  { %v849_v19 = vadd.f32 %v848_v14, %v821_v12  ;;  %v2374_v12 = vld [vmem:[%s3298_s6 + $0x8] sm:$0xff] }
 0x5e2   :  { %1052 = vmatpush.bf16.msra.mxu3 %v2374_v12 }
 0x5e3   :  { %v2929_v22 = vadd.f32 %v849_v19, %v2664_v5 }
 0x5e5   :  { %v856_v23 = vsel %vm61_vm0, %v2929_v22, 0.0 }
 0x5e6   :  { %857 = vadd.xlane.f32.xlu0 %v856_v23  ;;  %1053 = vmatpush.bf16.msra.mxu3 %v2373_v18 }
 0x651   :  { %v855_v27 = vpop.xlane.xlu1 %854 }
 0x652   :  { %v859_v29 = vmul.f32 %v855_v27, %v2668_v13 }
 0x654   :  { %v861_v30 = vsub.f32 %v2924_v60, %v859_v29 }
 0x656   :  { %v863_v2 = vmul.f32 %v861_v30, %v861_v30 }
 0x658   :  { %v865_v32 = vsel %vm61_vm0, %v863_v2, 0.0 }
 0x659   :  { %v858_v33 = vpop.xlane.xlu0 %857  ;;  %866 = vadd.xlane.f32.xlu2 %v865_v32 }
 0x65a   :  { %v860_v34 = vmul.f32 %v858_v33, %v2668_v13 }
 0x65c   :  { %v862_v24 = vsub.f32 %v2929_v22, %v860_v34 }
 0x65e   :  { %v864_v5 = vmul.f32 %v862_v24, %v862_v24 }
 0x660   :  { %v868_v25 = vsel %vm61_vm0, %v864_v5, 0.0 }
 0x661   :  { %869 = vadd.xlane.f32.xlu1 %v868_v25 }
 0x6cc   :  { %v867_v36 = vpop.xlane.xlu2 %866 }
 0x6cd   :  { %v871_v16 = vmul.f32 %v867_v36, %v2668_v13 }
 0x6cf   :  { %v873_v28 = vadd.f32 1e-05, %v871_v16 }
 0x6d1   :  { %2476 = vrsqrt.f32 %v873_v28  ;;  %vm881_vm7 = vweird.f32 %v873_v28 }
 0x6d4   :  { %v870_v26 = vpop.xlane.xlu1 %869 }
 0x6d5   :  { %v872_v39 = vmul.f32 %v870_v26, %v2668_v13 }
 0x6d7   :  { %v2477_v31 = vpop.eup %2476  ;;  %v874_v38 = vadd.f32 1e-05, %v872_v39 }
 0x6d8   :  { %v876_v40 = vmul.f32 %v2477_v31, %v873_v28  ;;  %vm882_vm6 = vweird.f32 %v2477_v31 }
 0x6d9   :  { %2478 = vrsqrt.f32 %v874_v38  ;;  %vm883_vm11 = vmor %vm881_vm7, %vm882_vm6  ;;  %vm891_vm13 = vweird.f32 %v874_v38 }
 0x6da   :  { %v877_v41 = vmul.f32 %v2477_v31, %v876_v40 }
 0x6dc   :  { %v878_v15 = vmul.f32 0.5, %v877_v41 }
 0x6de   :  { %v879_v42 = vsub.f32 1.5, %v878_v15 }
 0x6df   :  { %v2479_v44 = vpop.eup %2478 }
 0x6e0   :  { %v880_v45 = vmul.f32 %v2477_v31, %v879_v42  ;;  %v886_v46 = vmul.f32 %v2479_v44, %v874_v38  ;;  %vm892_vm12 = vweird.f32 %v2479_v44 }
 0x6e1   :  { %vm893_vm14 = vmor %vm891_vm13, %vm892_vm12 }
 0x6e2   :  { %v887_v47 = vmul.f32 %v2479_v44, %v886_v46  ;;  %v884_v48 = vsel %vm883_vm11, %v2477_v31, %v880_v45 }
 0x6e3   :  { %v895_v53 = vmul.f32 %v884_v48, %v861_v30 }
 0x6e4   :  { %v888_v35 = vmul.f32 0.5, %v887_v47  ;;  %v997_v47 = vperm.slane %v2951_v1, 7 }
 0x6e5   :  { %v898_v57 = vmul.f32 %v897_v51, %v895_v53 }
 0x6e6   :  { %v889_v49 = vsub.f32 1.5, %v888_v35 }
 0x6e7   :  { %v901_v62 = vadd.f32 %v900_v56, %v898_v57 }
 0x6e8   :  { %v890_v54 = vmul.f32 %v2479_v44, %v889_v49 }
 0x6ea   :  { %v894_v50 = vsel %vm893_vm14, %v2479_v44, %v890_v54 }
 0x6eb   :  { %v896_v58 = vmul.f32 %v894_v50, %v862_v24 }
 0x6ed   :  { %v899_v59 = vmul.f32 %v897_v51, %v896_v58 }
 0x6ef   :  { %v902_v63 = vadd.f32 %v900_v56, %v899_v59 }
 0x6f1   :  { %v903_v61 = vpack.c.bf16 %v902_v63, %v901_v62 }
 0x6f3   :  { %2215 = vmatmul.msk.bf16.vlgmr.msrb.gmra.mxu2 %vm61_vm0, %v903_v61 }
 0x776   :  { %v933_v6 = vpop.f32.mrf.mxu2 }
 0x777   :  { %v934_v11 = vadd.f32 %v933_v6, %v908_v3 }
 0x779   :  { %v2216_v9 = vmul.f32 -1.702, %v934_v11 }
 0x77b   :  { %v942_v10 = vmul.f32 1.442695, %v2216_v9 }
 0x77d   :  { %2480 = vpow2.f32 %v942_v10 }
 0x77e   :  { %v935_v21 = vpop.f32.mrf.mxu2 }
 0x77f   :  { %v936_v17 = vadd.f32 %v935_v21, %v908_v3 }
 0x781   :  { %v2217_v14 = vmul.f32 -1.702, %v936_v17 }
 0x783   :  { %v2481_v19 = vpop.eup %2480  ;;  %v944_v23 = vmul.f32 1.442695, %v2217_v14 }
 0x784   :  { %v946_v27 = vadd.f32 1.0, %v2481_v19 }
 0x785   :  { %2482 = vpow2.f32 %v944_v23 }
 0x786   :  { %2484 = vrcp.f32 %v946_v27  ;;  %v959_v36 = vand.u32 2147483648, %v946_v27  ;;  %vm953_vm1 = vweird.f32 %v946_v27  ;;  %v957_v7 = vand.u32 2147483647, %v946_v27 }
 0x788   :  { %v960_v31 = vor.u32 1.1754944e-38, %v959_v36  ;;  %vm958_vm6 = vcmp.eq.f32.partialorder %v957_v7, 8.507059e+37 }
 0x78b   :  { %v2483_v29 = vpop.eup %2482 }
 0x78c   :  { %v2485_v30 = vpop.eup %2484  ;;  %v947_v2 = vadd.f32 1.0, %v2483_v29 }
 0x78d   :  { %v949_v32 = vmul.f32 %v2485_v30, %v946_v27  ;;  %vm954_vm15 = vweird.f32 %v2485_v30  ;;  %v3008_v27 = vld [vmem:[%s3299_s7 + $0x8] sm:$0xff] }
 0x78e   :  { %2486 = vrcp.f32 %v947_v2  ;;  %vm955_vm2 = vmor %vm953_vm1, %vm954_vm15  ;;  %v974_v28 = vand.u32 2147483648, %v947_v2  ;;  %v972_v39 = vand.u32 2147483647, %v947_v2  ;;  %vm968_vm7 = vweird.f32 %v947_v2 }
 0x78f   :  { %v950_v33 = vsub.f32 1.0, %v949_v32  ;;  %v1108_v32 = vperm.slane %v3008_v27, 0 }
 0x790   :  { %v975_v41 = vor.u32 1.1754944e-38, %v974_v28  ;;  %vm973_vm12 = vcmp.eq.f32.partialorder %v972_v39, 8.507059e+37 }
 0x791   :  { %v951_v34 = vmul.f32 %v2485_v30, %v950_v33 }
 0x793   :  { %v952_v5 = vadd.f32 %v2485_v30, %v951_v34 }
 0x794   :  { %v2487_v24 = vpop.eup %2486 }
 0x795   :  { %v964_v25 = vmul.f32 %v2487_v24, %v947_v2  ;;  %v956_v37 = vsel %vm955_vm2, %v2485_v30, %v952_v5  ;;  %vm969_vm3 = vweird.f32 %v2487_v24  ;;  %v1111_v5 = vperm.slane %v3008_v27, 1 }
 0x796   :  { %v961_v40 = vsel %vm958_vm6, %v960_v31, %v956_v37  ;;  %vm970_vm11 = vmor %vm968_vm7, %vm969_vm3 }
 0x797   :  { %v965_v16 = vsub.f32 1.0, %v964_v25  ;;  %v978_v44 = vmul.f32 %v961_v40, %v934_v11 }
 0x799   :  { %v966_v26 = vmul.f32 %v2487_v24, %v965_v16 }
 0x79b   :  { %v967_v38 = vadd.f32 %v2487_v24, %v966_v26  ;;  %v1120_v26 = vperm.slane %v3008_v27, 2 }
 0x79d   :  { %v971_v15 = vsel %vm970_vm11, %v2487_v24, %v967_v38 }
 0x79e   :  { %v976_v42 = vsel %vm973_vm12, %v975_v41, %v971_v15 }
 0x79f   :  { %v979_v45 = vmul.f32 %v976_v42, %v936_v17 }
 0x7a1   :  { %v980_v46 = vpack.c.bf16 %v979_v45, %v978_v44 }
 0x7a3   :  { %1054 = vmatmul.bf16.vlgmr.msra.gmra.mxu3 %v980_v46 }
 0x826   :  { %v1055_v48 = vpop.f32.mrf.mxu3 }
 0x827   :  { %v1056_v35 = vadd.f32 %v1055_v48, %v997_v47 }
 0x829   :  { %v2982_v49 = vadd.f32 %v1056_v35, %v2924_v60 }
 0x82b   :  { %v1064_v51 = vsel %vm61_vm0, %v2982_v49, 0.0 }
 0x82c   :  { %1065 = vadd.xlane.f32.xlu2 %v1064_v51 }
 0x82e   :  { %v1057_v53 = vpop.f32.mrf.mxu3 }
 0x82f   :  { %v1058_v54 = vadd.f32 %v1057_v53, %v997_v47 }
 0x831   :  { %v2987_v50 = vadd.f32 %v1058_v54, %v2929_v22 }
 0x833   :  { %v1067_v56 = vsel %vm61_vm0, %v2987_v50, 0.0 }
 0x834   :  { %1068 = vadd.xlane.f32.xlu1 %v1067_v56 }
 0x89f   :  { %v1066_v57 = vpop.xlane.xlu2 %1065 }
 0x8a0   :  { %v1070_v1 = vmul.f32 %v1066_v57, %v2668_v13 }
 0x8a2   :  { %v1072_v58 = vsub.f32 %v2982_v49, %v1070_v1 }
 0x8a4   :  { %v1074_v60 = vmul.f32 %v1072_v58, %v1072_v58 }
 0x8a6   :  { %v1076_v59 = vsel %vm61_vm0, %v1074_v60, 0.0 }
 0x8a7   :  { %v1069_v62 = vpop.xlane.xlu1 %1068  ;;  %1077 = vadd.xlane.f32.xlu2 %v1076_v59 }
 0x8a8   :  { %v1071_v63 = vmul.f32 %v1069_v62, %v2668_v13 }
 0x8aa   :  { %v1073_v61 = vsub.f32 %v2987_v50, %v1071_v63 }
 0x8ac   :  { %v1075_v22 = vmul.f32 %v1073_v61, %v1073_v61 }
 0x8ae   :  { %v1079_v43 = vsel %vm61_vm0, %v1075_v22, 0.0 }
 0x8af   :  { %1080 = vadd.xlane.f32.xlu1 %v1079_v43 }
 0x91a   :  { %v1078_v52 = vpop.xlane.xlu2 %1077 }
 0x91b   :  { %v1082_v0 = vmul.f32 %v1078_v52, %v2668_v13 }
 0x91d   :  { %v1084_v3 = vadd.f32 1e-05, %v1082_v0 }
 0x91f   :  { %2488 = vrsqrt.f32 %v1084_v3  ;;  %vm1092_vm14 = vweird.f32 %v1084_v3 }
 0x922   :  { %v1081_v6 = vpop.xlane.xlu1 %1080 }
 0x923   :  { %v1083_v11 = vmul.f32 %v1081_v6, %v2668_v13 }
 0x925   :  { %v2489_v8 = vpop.eup %2488  ;;  %v1085_v9 = vadd.f32 1e-05, %v1083_v11 }
 0x926   :  { %v1087_v10 = vmul.f32 %v2489_v8, %v1084_v3  ;;  %vm1093_vm13 = vweird.f32 %v2489_v8 }
 0x927   :  { %2490 = vrsqrt.f32 %v1085_v9  ;;  %vm1094_vm15 = vmor %vm1092_vm14, %vm1093_vm13  ;;  %vm1102_vm2 = vweird.f32 %v1085_v9 }
 0x928   :  { %v1088_v12 = vmul.f32 %v2489_v8, %v1087_v10 }
 0x92a   :  { %v1089_v21 = vmul.f32 0.5, %v1088_v12 }
 0x92c   :  { %v1090_v17 = vsub.f32 1.5, %v1089_v21 }
 0x92d   :  { %v2491_v18 = vpop.eup %2490 }
 0x92e   :  { %v1091_v14 = vmul.f32 %v2489_v8, %v1090_v17  ;;  %v1097_v19 = vmul.f32 %v2491_v18, %v1085_v9  ;;  %vm1103_vm1 = vweird.f32 %v2491_v18 }
 0x92f   :  { %vm1104_vm3 = vmor %vm1102_vm2, %vm1103_vm1 }
 0x930   :  { %v1098_v23 = vmul.f32 %v2491_v18, %v1097_v19  ;;  %v1095_v29 = vsel %vm1094_vm15, %v2489_v8, %v1091_v14 }
 0x931   :  { %v1106_v33 = vmul.f32 %v1095_v29, %v1072_v58 }
 0x932   :  { %v1099_v30 = vmul.f32 0.5, %v1098_v23 }
 0x933   :  { %v1109_v25 = vmul.f32 %v1108_v32, %v1106_v33 }
 0x934   :  { %v1100_v2 = vsub.f32 1.5, %v1099_v30 }
 0x935   :  { %v1112_v16 = vadd.f32 %v1111_v5, %v1109_v25 }
 0x936   :  { %v1101_v34 = vmul.f32 %v2491_v18, %v1100_v2 }
 0x938   :  { %v1105_v24 = vsel %vm1104_vm3, %v2491_v18, %v1101_v34 }
 0x939   :  { %v1107_v36 = vmul.f32 %v1105_v24, %v1073_v61 }
 0x93b   :  { %v1110_v7 = vmul.f32 %v1108_v32, %v1107_v36 }
 0x93d   :  { %v1113_v28 = vadd.f32 %v1111_v5, %v1110_v7 }
 0x93f   :  { %v1114_v37 = vpack.c.bf16 %v1113_v28, %v1112_v16 }
 0x941   :  { %2263 = vmatmul.msk.bf16.vlgmr.msra.gmra.mxu0 %vm61_vm0, %v1114_v37 }
 0x9be   :  { %v1145_v39 = vpop.f32.mrf.mxu0 }
 0x9bf   :  { %v1146_v31 = vadd.f32 %v1145_v39, %v1120_v26 }
 0x9c1   :  { %1179 = vrot.lane.b32.xlu0 %v1146_v31, %s2584_s26  ;;  %1176 = vrot.lane.b32.xlu1 %v1146_v31, %s2586_s28  ;;  %v1200_v41 = vpack.c.bf16 %v1146_v31, %v1146_v31  ;;  %v1150_v44 = vmul.f32 0.35355338, %v1146_v31 }
 0x9c2   :  { %1173 = vrot.lane.b32.xlu2 %v1146_v31, %s2585_s27 }
 0x9c3   :  { %v1209_v15 = vunpack.c.l.b16 %v1200_v41  ;;  %v1192_v10 = vpack.c.bf16 %v1150_v44, %v1150_v44 }
 0x9c5   :  { %v3019_v42 = vpack.c.b16 %v1209_v15, %v1209_v15 }
 0x9c6   :  { %v1147_v38 = vpop.f32.mrf.mxu0 }
 0x9c7   :  { %v1148_v40 = vadd.f32 %v1147_v38, %v1120_v26 }
 0x9c9   :  { %1186 = vrot.lane.b32.xlu1 %v1148_v40, %s2586_s28  ;;  %v3033_v56 = vmul.f32 0.35355338, %v1148_v40  ;;  %v1204_v9 = vpack.c.bf16 %v1148_v40, %v1148_v40 }
 0x9ca   :  { %1183 = vrot.lane.b32.xlu2 %v1148_v40, %s2585_s27 }
 0x9cb   :  { %v1305_v12 = vunpack.c.l.b16 %v1204_v9 }
 0x9cd   :  { %v3059_v21 = vpack.c.b16 %v1305_v12, %v1305_v12 }
 0x9d1   :  { %1211 = vrot.lane.b32.xlu1 %v3019_v42, %s2587_s29 }
 0x9d2   :  { %1189 = vrot.lane.b32.xlu2 %v1148_v40, %s2584_s26 }
 0x9da   :  { %1153 = vrot.lane.b32.xlu2 %v1150_v44, %s2585_s27 }
 0xa1c   :  { %v1174_v45 = vpop.permute.xlu2 %1173 }
 0xa1d   :  { %v1201_v46 = vpack.c.bf16 %v1174_v45, %v1174_v45 }
 0xa1f   :  { %v1233_v47 = vunpack.c.l.b16 %v1201_v46 }
 0xa21   :  { %v3025_v48 = vpack.c.b16 %v1233_v47, %v1233_v47  ;;  %v1196_v47 = vpack.c.bf16 %v3033_v56, %v3033_v56 }
 0xa23   :  { %1235 = vrot.lane.b32.xlu0 %v3025_v48, %s2587_s29 }
 0xa24   :  { %v1184_v35 = vpop.permute.xlu2 %1183 }
 0xa25   :  { %v1205_v51 = vpack.c.bf16 %v1184_v35, %v1184_v35 }
 0xa27   :  { %v1329_v53 = vunpack.c.l.b16 %v1205_v51 }
 0xa29   :  { %v3029_v54 = vpack.c.b16 %v1329_v53, %v1329_v53 }
 0xa2b   :  { %1331 = vrot.lane.b32.xlu2 %v3029_v54, %s2587_s29 }
 0xa2c   :  { %v1190_v43 = vpop.permute.xlu2 %1189 }
 0xa2d   :  { %v1207_v52 = vpack.c.bf16 %v1190_v43, %v1190_v43 }
 0xa2f   :  { %v1377_v3 = vunpack.c.l.b16 %v1207_v52 }
 0xa31   :  { %v3050_v11 = vpack.c.b16 %v1377_v3, %v1377_v3 }
 0xa33   :  { %1163 = vrot.lane.b32.xlu2 %v3033_v56, %s2585_s27  ;;  %v1180_v57 = vpop.permute.xlu0 %1179  ;;  %v1177_v1 = vpop.permute.xlu1 %1176 }
 0xa34   :  { %v1203_v58 = vpack.c.bf16 %v1180_v57, %v1180_v57  ;;  %v1202_v60 = vpack.c.bf16 %v1177_v1, %v1177_v1  ;;  %v1154_v17 = vpop.permute.xlu2 %1153 }
 0xa35   :  { %v1193_v2 = vpack.c.bf16 %v1154_v17, %v1154_v17 }
 0xa36   :  { %v1281_v59 = vunpack.c.l.b16 %v1203_v58  ;;  %v1257_v62 = vunpack.c.l.b16 %v1202_v60 }
 0xa38   :  { %v3037_v63 = vpack.c.b16 %v1281_v59, %v1281_v59  ;;  %v3039_v61 = vpack.c.b16 %v1257_v62, %v1257_v62 }
 0xa3a   :  { %1283 = vrot.lane.b32.xlu0 %v3037_v63, %s2587_s29  ;;  %1259 = vrot.lane.b32.xlu1 %v3039_v61, %s2587_s29 }
 0xa3b   :  { %1166 = vrot.lane.b32.xlu2 %v3033_v56, %s2586_s28  ;;  %v1187_v22 = vpop.permute.xlu1 %1186 }
 0xa3c   :  { %v1206_v20 = vpack.c.bf16 %v1187_v22, %v1187_v22 }
 0xa3e   :  { %v1353_v55 = vunpack.c.l.b16 %v1206_v20 }
 0xa40   :  { %v3052_v8 = vpack.c.b16 %v1353_v55, %v1353_v55 }
 0xa42   :  { %1159 = vrot.lane.b32.xlu0 %v1150_v44, %s2584_s26  ;;  %1156 = vrot.lane.b32.xlu1 %v1150_v44, %s2586_s28 }
 0xa43   :  { %v1212_v0 = vpop.permute.xlu1 %1211 }
 0xa44   :  { %v1217_v6 = vsel %vm217_vm8, %v1212_v0, 0 }
 0xa45   :  { %1226 = vmatpush.bf16.xpose.msrb.mxu1 %v1217_v6 }
 0xa4a   :  { %1379 = vrot.lane.b32.xlu0 %v3050_v11, %s2587_s29  ;;  %1355 = vrot.lane.b32.xlu1 %v3052_v8, %s2587_s29 }
 0xa4c   :  { %2264 = vmatmul.msk.bf16.vlgmr.msrb.gmra.mxu1 %vm217_vm8, %v1192_v10 }
 0xa52   :  { %1307 = vrot.lane.b32.xlu0 %v3059_v21, %s2587_s29  ;;  %1169 = vrot.lane.b32.xlu1 %v3033_v56, %s2584_s26 }
 0xa85   :  { %v1332_v18 = vpop.permute.xlu2 %1331 }
 0xa86   :  { %v1337_v14 = vsel %vm217_vm8, %v1332_v18, 0 }
 0xa87   :  { %1346 = vmatpush.bf16.xpose.msrb.mxu3 %v1337_v14 }
 0xa8d   :  { %v1164_v19 = vpop.permute.xlu2 %1163 }
 0xa8e   :  { %v1197_v23 = vpack.c.bf16 %v1164_v19, %v1164_v19 }
 0xa90   :  { %2269 = vmatmul.msk.bf16.vlgmr.msrb.gmra.mxu3 %vm217_vm8, %v1197_v23 }
 0xa95   :  { %v1236_v29 = vpop.permute.xlu0 %1235  ;;  %v1167_v39 = vpop.permute.xlu2 %1166 }
 0xa96   :  { %v1241_v30 = vsel %vm217_vm8, %v1236_v29, 0  ;;  %v1198_v40 = vpack.c.bf16 %v1167_v39, %v1167_v39 }
 0xa97   :  { %1250 = vmatpush.bf16.xpose.msra.mxu2 %v1241_v30 }
 0xa9e   :  { %2265 = vmatmul.msk.bf16.vlgmr.msra.gmra.mxu2 %vm217_vm8, %v1193_v2 }
 0xaac   :  { %v1284_v32 = vpop.permute.xlu0 %1283  ;;  %v1260_v33 = vpop.permute.xlu1 %1259 }
 0xaad   :  { %v1289_v34 = vsel %vm217_vm8, %v1284_v32, 0  ;;  %v1265_v24 = vsel %vm217_vm8, %v1260_v33, 0 }
 0xaae   :  { %1274 = vmatpush.bf16.xpose.msrb.mxu0 %v1265_v24  ;;  %1298 = vmatpush.bf16.xpose.msra.mxu1 %v1289_v34 }
 0xab4   :  { %v1160_v5 = vpop.permute.xlu0 %1159  ;;  %v1157_v25 = vpop.permute.xlu1 %1156 }
 0xab5   :  { %v1195_v36 = vpack.c.bf16 %v1160_v5, %v1160_v5  ;;  %v1194_v7 = vpack.c.bf16 %v1157_v25, %v1157_v25 }
 0xab7   :  { %2266 = vmatmul.msk.bf16.vlgmr.msrb.gmra.mxu0 %vm217_vm8, %v1194_v7  ;;  %2267 = vmatmul.msk.bf16.vlgmr.msra.gmra.mxu1 %vm217_vm8, %v1195_v36 }
 0xabc   :  { %v1380_v16 = vpop.permute.xlu0 %1379  ;;  %v1356_v28 = vpop.permute.xlu1 %1355 }
 0xabd   :  { %v1385_v37 = vsel %vm217_vm8, %v1380_v16, 0  ;;  %v1361_v26 = vsel %vm217_vm8, %v1356_v28, 0 }
 0xabe   :  { %1370 = vmatpush.bf16.xpose.msra.mxu0 %v1361_v26  ;;  %1394 = vmatpush.bf16.xpose.msrb.mxu1 %v1385_v37 }
 0xac4   :  { %v1308_v31 = vpop.permute.xlu0 %1307  ;;  %v1170_v38 = vpop.permute.xlu1 %1169 }
 0xac5   :  { %v1313_v41 = vsel %vm217_vm8, %v1308_v31, 0  ;;  %v1199_v15 = vpack.c.bf16 %v1170_v38, %v1170_v38 }
 0xac6   :  { %1322 = vmatpush.bf16.xpose.msrb.mxu2 %v1313_v41 }
 0xac7   :  { %2270 = vmatmul.msk.bf16.vlgmr.msra.gmra.mxu0 %vm217_vm8, %v1198_v40  ;;  %2271 = vmatmul.msk.bf16.vlgmr.msrb.gmra.mxu1 %vm217_vm8, %v1199_v15 }
 0xac9   :  { %v1228_v44 = vpop.f32.mrf.mxu1 }
 0xaca   :  { %v3080_v45 = vsel %vm2767_vm9, %v1228_v44, -1e+30 }
 0xacb   :  { %v1408_v46 = vsel %vm217_vm8, %v3080_v45, -inf }
 0xacc   :  { %1409 = vmax.xlane.f32.xlu2 %v1408_v46 }
 0xacd   :  { %2268 = vmatmul.msk.bf16.vlgmr.msrb.gmra.mxu2 %vm217_vm8, %v1196_v47 }
 0xad1   :  { %v1230_v35 = vpop.f32.mrf.mxu1 }
 0xb13   :  { %v1348_v51 = vpop.f32.mrf.mxu3 }
 0xb14   :  { %v1405_v60 = vsel %vm2767_vm9, %v1348_v51, -1e+30 }
 0xb15   :  { %v1423_v62 = vsel %vm217_vm8, %v1405_v60, -inf }
 0xb1b   :  { %v1350_v53 = vpop.f32.mrf.mxu3 }
 0xb21   :  { %v1252_v57 = vpop.f32.mrf.mxu2 }
 0xb22   :  { %v1401_v1 = vsel %vm2767_vm9, %v1252_v57, -1e+30 }
 0xb23   :  { %v1411_v58 = vsel %vm217_vm8, %v1401_v1, -inf }
 0xb24   :  { %1412 = vmax.xlane.f32.xlu2 %v1411_v58 }
 0xb29   :  { %v1254_v59 = vpop.f32.mrf.mxu2 }
 0xb2c   :  { %1424 = vmax.xlane.f32.xlu2 %v1423_v62 }
 0xb34   :  { %v1276_v56 = vpop.f32.mrf.mxu0  ;;  %v1300_v22 = vpop.f32.mrf.mxu1 }
 0xb35   :  { %v1402_v43 = vsel %vm2767_vm9, %v1276_v56, -1e+30  ;;  %v1403_v52 = vsel %vm2767_vm9, %v1300_v22, -1e+30 }
 0xb36   :  { %v1414_v20 = vsel %vm217_vm8, %v1402_v43, -inf  ;;  %v1417_v0 = vsel %vm217_vm8, %v1403_v52, -inf }
 0xb37   :  { %1415 = vmax.xlane.f32.xlu1 %v1414_v20  ;;  %1418 = vmax.xlane.f32.xlu0 %v1417_v0 }
 0xb3c   :  { %v1278_v3 = vpop.f32.mrf.mxu0  ;;  %v1302_v55 = vpop.f32.mrf.mxu1 }
 0xb3f   :  { %v1410_v30 = vpop.xlane.xlu2 %1409 }
 0xb40   :  { %v1432_v59 = vsub.f32 %v3080_v45, %v1410_v30 }
 0xb42   :  { %v1440_v22 = vmul.f32 1.442695, %v1432_v59 }
 0xb44   :  { %1629 = vrot.lane.b32.xlu2 %v3025_v48, %s2588_s30  ;;  %v1372_v6 = vpop.f32.mrf.mxu0  ;;  %v1396_v9 = vpop.f32.mrf.mxu1 }
 0xb45   :  { %v1406_v10 = vsel %vm2767_vm9, %v1372_v6, -1e+30  ;;  %v1407_v48 = vsel %vm2767_vm9, %v1396_v9, -1e+30 }
 0xb46   :  { %v1426_v12 = vsel %vm217_vm8, %v1406_v10, -inf  ;;  %v1429_v23 = vsel %vm217_vm8, %v1407_v48, -inf }
 0xb47   :  { %1427 = vmax.xlane.f32.xlu1 %v1426_v12 }
 0xb4b   :  { %1671 = vrot.lane.b32.xlu0 %v3037_v63, %s2588_s30 }
 0xb4c   :  { %v1374_v17 = vpop.f32.mrf.mxu0  ;;  %v1398_v18 = vpop.f32.mrf.mxu1 }
 0xb50   :  { %v1324_v14 = vpop.f32.mrf.mxu2 }
 0xb51   :  { %v3113_v29 = vsel %vm2767_vm9, %v1324_v14, -1e+30 }
 0xb52   :  { %v1420_v63 = vsel %vm217_vm8, %v3113_v29, -inf }
 0xb58   :  { %v1326_v19 = vpop.f32.mrf.mxu2 }
 0xb60   :  { %1650 = vrot.lane.b32.xlu1 %v3039_v61, %s2588_s30 }
 0xb75   :  { %1430 = vmax.xlane.f32.xlu0 %v1429_v23 }
 0xb7d   :  { %1421 = vmax.xlane.f32.xlu0 %v1420_v63 }
 0xb97   :  { %v1413_v2 = vpop.xlane.xlu2 %1412 }
 0xb98   :  { %v1433_v26 = vsub.f32 %v1401_v1, %v1413_v2 }
 0xb9a   :  { %v1442_v39 = vmul.f32 1.442695, %v1433_v26 }
 0xb9f   :  { %v1425_v32 = vpop.xlane.xlu2 %1424 }
 0xba0   :  { %v1437_v33 = vsub.f32 %v1405_v60, %v1425_v32 }
 0xba2   :  { %v1450_v34 = vmul.f32 1.442695, %v1437_v33 }
 0xba4   :  { %2492 = vpow2.f32 %v1450_v34 }
 0xba7   :  { %v1630_v61 = vpop.permute.xlu2 %1629 }
 0xba8   :  { %v1635_v24 = vsel %vm620_vm10, %v1630_v61, 0 }
 0xba9   :  { %1644 = vmatpush.bf16.msra.mxu3 %v1635_v24 }
 0xbaa   :  { %v3118_v5 = vpop.eup %2492  ;;  %v1416_v25 = vpop.xlane.xlu1 %1415 }
 0xbab   :  { %v1419_v4 = vpop.xlane.xlu0 %1418  ;;  %v1434_v36 = vsub.f32 %v1402_v43, %v1416_v25  ;;  %v1471_v16 = vsel %vm217_vm8, %v3118_v5, 0.0 }
 0xbac   :  { %v1435_v7 = vsub.f32 %v1403_v52, %v1419_v4  ;;  %1472 = vadd.xlane.f32.xlu0 %v1471_v16 }
 0xbad   :  { %v1444_v28 = vmul.f32 1.442695, %v1434_v36 }
 0xbae   :  { %v1446_v37 = vmul.f32 1.442695, %v1435_v7 }
 0xbaf   :  { %2494 = vpow2.f32 %v1444_v28 }
 0xbb0   :  { %2496 = vpow2.f32 %v1446_v37 }
 0xbb1   :  { %2498 = vpow2.f32 %v1442_v39 }
 0xbb5   :  { %v3122_v31 = vpop.eup %2494 }
 0xbb6   :  { %v3124_v38 = vpop.eup %2496  ;;  %v1462_v40 = vsel %vm217_vm8, %v3122_v31, 0.0 }
 0xbb7   :  { %1463 = vadd.xlane.f32.xlu2 %v1462_v40  ;;  %v1465_v41 = vsel %vm217_vm8, %v3124_v38, 0.0  ;;  %v3130_v46 = vpop.eup %2498 }
 0xbb8   :  { %1466 = vadd.xlane.f32.xlu1 %v1465_v41  ;;  %v1459_v53 = vsel %vm217_vm8, %v3130_v46, 0.0 }
 0xbba   :  { %v1428_v15 = vpop.xlane.xlu1 %1427 }
 0xbbb   :  { %v1438_v44 = vsub.f32 %v1406_v10, %v1428_v15 }
 0xbbd   :  { %v1452_v47 = vmul.f32 1.442695, %v1438_v44  ;;  %v1672_v35 = vpop.permute.xlu0 %1671 }
 0xbbe   :  { %v1677_v51 = vsel %vm620_vm10, %v1672_v35, 0 }
 0xbbf   :  { %2500 = vpow2.f32 %v1452_v47  ;;  %1686 = vmatpush.bf16.msra.mxu1 %v1677_v51 }
 0xbc0   :  { %1460 = vadd.xlane.f32.xlu1 %v1459_v53 }
 0xbc5   :  { %v3135_v57 = vpop.eup %2500 }
 0xbc6   :  { %v1474_v1 = vsel %vm217_vm8, %v3135_v57, 0.0 }
 0xbc8   :  { %1475 = vadd.xlane.f32.xlu1 %v1474_v1 }
 0xbcf   :  { %1713 = vrot.lane.b32.xlu2 %v3029_v54, %s2588_s30 }
 0xbd2   :  { %v1651_v58 = vpop.permute.xlu1 %1650 }
 0xbd3   :  { %v1656_v60 = vsel %vm620_vm10, %v1651_v58, 0 }
 0xbd4   :  { %1665 = vmatpush.bf16.msrb.mxu0 %v1656_v60 }
 0xbe1   :  { %1755 = vrot.lane.b32.xlu1 %v3050_v11, %s2588_s30 }
 0xbe8   :  { %v1431_v62 = vpop.xlane.xlu0 %1430 }
 0xbe9   :  { %1608 = vrot.lane.b32.xlu1 %v3019_v42, %s2588_s30  ;;  %v1439_v56 = vsub.f32 %v1407_v48, %v1431_v62 }
 0xbeb   :  { %v1454_v43 = vmul.f32 1.442695, %v1439_v56 }
 0xbed   :  { %2502 = vpow2.f32 %v1454_v43 }
 0xbee   :  { %2504 = vpow2.f32 %v1440_v22 }
 0xbf0   :  { %v1422_v42 = vpop.xlane.xlu0 %1421 }
 0xbf1   :  { %1692 = vrot.lane.b32.xlu1 %v3059_v21, %s2588_s30  ;;  %v1436_v20 = vsub.f32 %v3113_v29, %v1422_v42 }
 0xbf3   :  { %v3149_v54 = vpop.eup %2502  ;;  %v1448_v0 = vmul.f32 1.442695, %v1436_v20 }
 0xbf4   :  { %v3151_v52 = vpop.eup %2504  ;;  %v1477_v11 = vsel %vm217_vm8, %v3149_v54, 0.0 }
 0xbf5   :  { %1478 = vadd.xlane.f32.xlu0 %v1477_v11  ;;  %v1456_v45 = vsel %vm217_vm8, %v3151_v52, 0.0  ;;  %2506 = vpow2.f32 %v1448_v0 }
 0xbf8   :  { %1457 = vadd.xlane.f32.xlu2 %v1456_v45 }
 0xbfb   :  { %v3160_v55 = vpop.eup %2506 }
 0xc09   :  { %1734 = vrot.lane.b32.xlu0 %v3052_v8, %s2588_s30  ;;  %v1468_v8 = vsel %vm217_vm8, %v3160_v55, 0.0 }
 0xc1f   :  { %v3162_v6 = vpop.xlane.xlu0 %1472 }
 0xc20   :  { %v1566_v43 = vand.u32 2147483648, %v3162_v6  ;;  %v1564_v11 = vand.u32 2147483647, %v3162_v6 }
 0xc22   :  { %v1567_v20 = vor.u32 1.1754944e-38, %v1566_v43 }
 0xc2a   :  { %v1464_v21 = vpop.xlane.xlu2 %1463 }
 0xc2b   :  { %2508 = vrcp.f32 %v1464_v21  ;;  %v1467_v3 = vpop.xlane.xlu1 %1466  ;;  %v1521_v23 = vand.u32 2147483648, %v1464_v21  ;;  %v1519_v30 = vand.u32 2147483647, %v1464_v21  ;;  %vm1515_vm7 = vweird.f32 %v1464_v21 }
 0xc2c   :  { %2510 = vrcp.f32 %v1467_v3  ;;  %v1536_v2 = vand.u32 2147483648, %v1467_v3  ;;  %v1534_v33 = vand.u32 2147483647, %v1467_v3  ;;  %vm1530_vm12 = vweird.f32 %v1467_v3 }
 0xc2d   :  { %2512 = vrcp.f32 %v3162_v6  ;;  %v1522_v24 = vor.u32 1.1754944e-38, %v1521_v23  ;;  %vm1520_vm13 = vcmp.eq.f32.partialorder %v1519_v30, 8.507059e+37 }
 0xc2e   :  { %v1537_v7 = vor.u32 1.1754944e-38, %v1536_v2  ;;  %vm1535_vm15 = vcmp.eq.f32.partialorder %v1534_v33, 8.507059e+37 }
 0xc31   :  { %v2509_v9 = vpop.eup %2508 }
 0xc32   :  { %v2511_v10 = vpop.eup %2510  ;;  %v1511_v12 = vmul.f32 %v2509_v9, %v1464_v21  ;;  %v1714_v17 = vpop.permute.xlu2 %1713  ;;  %vm1516_vm9 = vweird.f32 %v2509_v9 }
 0xc33   :  { %v1526_v18 = vmul.f32 %v2511_v10, %v1467_v3  ;;  %v1719_v14 = vsel %vm620_vm10, %v1714_v17, 0  ;;  %v1461_v19 = vpop.xlane.xlu1 %1460  ;;  %1469 = vadd.xlane.f32.xlu0 %v1468_v8  ;;  %vm1531_vm6 = vweird.f32 %v2511_v10  ;;  %v2513_v61 = vpop.eup %2512  ;;  %vm1517_vm11 = vmor %vm1515_vm7, %vm1516_vm9  ;;  %vm1560_vm7 = vweird.f32 %v3162_v6 }
 0xc34   :  { %v1512_v48 = vsub.f32 1.0, %v1511_v12  ;;  %2514 = vrcp.f32 %v1461_v19  ;;  %1728 = vmatpush.bf16.msrb.mxu3 %v1719_v14  ;;  %vm1532_vm14 = vmor %vm1530_vm12, %vm1531_vm6  ;;  %v1556_v40 = vmul.f32 %v2513_v61, %v3162_v6  ;;  %v1506_v44 = vand.u32 2147483648, %v1461_v19 }
 0xc35   :  { %v1527_v29 = vsub.f32 1.0, %v1526_v18  ;;  %v1504_v51 = vand.u32 2147483647, %v1461_v19  ;;  %vm1500_vm2 = vweird.f32 %v1461_v19  ;;  %vm1561_vm6 = vweird.f32 %v2513_v61 }
 0xc36   :  { %v1513_v63 = vmul.f32 %v2509_v9, %v1512_v48  ;;  %v1557_v1 = vsub.f32 1.0, %v1556_v40  ;;  %vm1565_vm12 = vcmp.eq.f32.partialorder %v1564_v11, 8.507059e+37 }
 0xc37   :  { %v1528_v32 = vmul.f32 %v2511_v10, %v1527_v29  ;;  %vm1505_vm9 = vcmp.eq.f32.partialorder %v1504_v51, 8.507059e+37 }
 0xc38   :  { %v1514_v34 = vadd.f32 %v2509_v9, %v1513_v63 }
 0xc39   :  { %v1529_v25 = vadd.f32 %v2511_v10, %v1528_v32 }
 0xc3a   :  { %v2515_v4 = vpop.eup %2514  ;;  %v1518_v36 = vsel %vm1517_vm11, %v2509_v9, %v1514_v34  ;;  %vm1562_vm11 = vmor %vm1560_vm7, %vm1561_vm6 }
 0xc3b   :  { %v1523_v16 = vsel %vm1520_vm13, %v1522_v24, %v1518_v36  ;;  %v1533_v28 = vsel %vm1532_vm14, %v2511_v10, %v1529_v25  ;;  %v1496_v37 = vmul.f32 %v2515_v4, %v1461_v19  ;;  %vm1501_vm1 = vweird.f32 %v2515_v4  ;;  %v1476_v45 = vpop.xlane.xlu1 %1475 }
 0xc3c   :  { %v1524_v26 = vmul.f32 %v3122_v31, %v1523_v16  ;;  %v1538_v39 = vsel %vm1535_vm15, %v1537_v7, %v1533_v28  ;;  %vm1502_vm3 = vmor %vm1500_vm2, %vm1501_vm1  ;;  %v1507_v31 = vor.u32 1.1754944e-38, %v1506_v44  ;;  %2516 = vrcp.f32 %v1476_v45 }
 0xc3d   :  { %v1539_v41 = vmul.f32 %v3124_v38, %v1538_v39  ;;  %v1497_v15 = vsub.f32 1.0, %v1496_v37  ;;  %v1558_v38 = vmul.f32 %v2513_v61, %v1557_v1  ;;  %v1581_v63 = vand.u32 2147483648, %v1476_v45 }
 0xc3e   :  { %v1602_v47 = vpack.c.bf16 %v1524_v26, %v1524_v26  ;;  %vm1575_vm14 = vweird.f32 %v1476_v45  ;;  %v1579_v2 = vand.u32 2147483647, %v1476_v45 }
 0xc3f   :  { %v1498_v35 = vmul.f32 %v2515_v4, %v1497_v15  ;;  %v1603_v53 = vpack.c.bf16 %v1539_v41, %v1539_v41  ;;  %v1559_v22 = vadd.f32 %v2513_v61, %v1558_v38  ;;  %v1582_v25 = vor.u32 1.1754944e-38, %v1581_v63 }
 0xc40   :  { %2274 = vmatmul.msk.bf16.vlgmr.msrb.gmra.mxu0 %vm217_vm8, %v1602_v47  ;;  %vm1580_vm2 = vcmp.eq.f32.partialorder %v1579_v2, 8.507059e+37  ;;  %v2384_v2 = vld [vmem:[%s3296_s4 + $0x18] sm:$0xff] }
 0xc41   :  { %v1499_v58 = vadd.f32 %v2515_v4, %v1498_v35  ;;  %2275 = vmatmul.msk.bf16.vlgmr.msra.gmra.mxu1 %vm217_vm8, %v1603_v53  ;;  %v1563_v42 = vsel %vm1562_vm11, %v2513_v61, %v1559_v22 }
 0xc42   :  { %v1568_v0 = vsel %vm1565_vm12, %v1567_v20, %v1563_v42  ;;  %v2517_v6 = vpop.eup %2516 }
 0xc43   :  { %v1503_v60 = vsel %vm1502_vm3, %v2515_v4, %v1499_v58  ;;  %v1569_v21 = vmul.f32 %v3118_v5, %v1568_v0  ;;  %v1571_v17 = vmul.f32 %v2517_v6, %v1476_v45  ;;  %vm1576_vm13 = vweird.f32 %v2517_v6 }
 0xc44   :  { %v1508_v59 = vsel %vm1505_vm9, %v1507_v31, %v1503_v60  ;;  %vm1577_vm15 = vmor %vm1575_vm14, %vm1576_vm13 }
 0xc45   :  { %v1509_v62 = vmul.f32 %v3130_v46, %v1508_v59  ;;  %v1605_v9 = vpack.c.bf16 %v1569_v21, %v1569_v21  ;;  %v1572_v14 = vsub.f32 1.0, %v1571_v17 }
 0xc47   :  { %v1601_v56 = vpack.c.bf16 %v1509_v62, %v1509_v62  ;;  %v1573_v19 = vmul.f32 %v2517_v6, %v1572_v14 }
 0xc49   :  { %2273 = vmatmul.msk.bf16.vlgmr.msra.gmra.mxu3 %vm217_vm8, %v1601_v56  ;;  %v1574_v29 = vadd.f32 %v2517_v6, %v1573_v19 }
 0xc4b   :  { %v1578_v34 = vsel %vm1577_vm15, %v2517_v6, %v1574_v29 }
 0xc4c   :  { %v1583_v16 = vsel %vm1580_vm2, %v1582_v25, %v1578_v34  ;;  %v2383_v34 = vld [vmem:[%s3296_s4 + $0x10] sm:$0xff] }
 0xc4d   :  { %v1584_v47 = vmul.f32 %v3135_v57, %v1583_v16 }
 0xc4f   :  { %v1606_v38 = vpack.c.bf16 %v1584_v47, %v1584_v47 }
 0xc53   :  { %v1756_v46 = vpop.permute.xlu1 %1755 }
 0xc54   :  { %v1761_v3 = vsel %vm620_vm10, %v1756_v46, 0 }
 0xc55   :  { %1770 = vmatpush.bf16.msrb.mxu1 %v1761_v3 }
 0xc59   :  { %2277 = vmatmul.msk.bf16.vlgmr.msrb.gmra.mxu3 %vm217_vm8, %v1605_v9 }
 0xc5b   :  { %v1609_v10 = vpop.permute.xlu1 %1608 }
 0xc5c   :  { %v1614_v12 = vsel %vm620_vm10, %v1609_v10, 0 }
 0xc5d   :  { %1623 = vmatpush.bf16.msra.mxu2 %v1614_v12 }
 0xc63   :  { %v1693_v8 = vpop.permute.xlu1 %1692 }
 0xc64   :  { %v1698_v18 = vsel %vm620_vm10, %v1693_v8, 0 }
 0xc65   :  { %1707 = vmatpush.bf16.msrb.mxu2 %v1698_v18 }
 0xc68   :  { %v1479_v5 = vpop.xlane.xlu0 %1478 }
 0xc69   :  { %2518 = vrcp.f32 %v1479_v5  ;;  %v1596_v61 = vand.u32 2147483648, %v1479_v5  ;;  %v1594_v36 = vand.u32 2147483647, %v1479_v5  ;;  %vm1590_vm3 = vweird.f32 %v1479_v5 }
 0xc6b   :  { %v1458_v48 = vpop.xlane.xlu2 %1457  ;;  %v1597_v26 = vor.u32 1.1754944e-38, %v1596_v61  ;;  %vm1595_vm7 = vcmp.eq.f32.partialorder %v1594_v36, 8.507059e+37 }
 0xc6c   :  { %2520 = vrcp.f32 %v1458_v48  ;;  %v1491_v37 = vand.u32 2147483648, %v1458_v48  ;;  %v1489_v40 = vand.u32 2147483647, %v1458_v48  ;;  %vm1485_vm11 = vweird.f32 %v1458_v48 }
 0xc6e   :  { %v1492_v51 = vor.u32 1.1754944e-38, %v1491_v37  ;;  %vm1490_vm13 = vcmp.eq.f32.partialorder %v1489_v40, 8.507059e+37 }
 0xc6f   :  { %v2519_v23 = vpop.eup %2518 }
 0xc70   :  { %v1586_v30 = vmul.f32 %v2519_v23, %v1479_v5  ;;  %vm1591_vm1 = vweird.f32 %v2519_v23 }
 0xc71   :  { %vm1592_vm9 = vmor %vm1590_vm3, %vm1591_vm1 }
 0xc72   :  { %v2521_v32 = vpop.eup %2520  ;;  %v1587_v33 = vsub.f32 1.0, %v1586_v30 }
 0xc73   :  { %v1481_v24 = vmul.f32 %v2521_v32, %v1458_v48  ;;  %vm1486_vm6 = vweird.f32 %v2521_v32 }
 0xc74   :  { %v1588_v4 = vmul.f32 %v2519_v23, %v1587_v33  ;;  %vm1487_vm12 = vmor %vm1485_vm11, %vm1486_vm6 }
 0xc75   :  { %v1482_v7 = vsub.f32 1.0, %v1481_v24 }
 0xc76   :  { %v1589_v28 = vadd.f32 %v2519_v23, %v1588_v4 }
 0xc77   :  { %v1483_v39 = vmul.f32 %v2521_v32, %v1482_v7 }
 0xc78   :  { %v1593_v41 = vsel %vm1592_vm9, %v2519_v23, %v1589_v28 }
 0xc79   :  { %v1598_v15 = vsel %vm1595_vm7, %v1597_v26, %v1593_v41  ;;  %v1484_v44 = vadd.f32 %v2521_v32, %v1483_v39 }
 0xc7a   :  { %v1599_v35 = vmul.f32 %v3149_v54, %v1598_v15 }
 0xc7b   :  { %v1488_v53 = vsel %vm1487_vm12, %v2521_v32, %v1484_v44  ;;  %v1735_v1 = vpop.permute.xlu0 %1734 }
 0xc7c   :  { %v1493_v58 = vsel %vm1490_vm13, %v1492_v51, %v1488_v53  ;;  %v1740_v31 = vsel %vm620_vm10, %v1735_v1, 0  ;;  %v1607_v60 = vpack.c.bf16 %v1599_v35, %v1599_v35  ;;  %v1812_v35 = vperm.slane %v3008_v27, 3 }
 0xc7d   :  { %v1494_v59 = vmul.f32 %v3151_v52, %v1493_v58  ;;  %1749 = vmatpush.bf16.msra.mxu0 %v1740_v31 }
 0xc7e   :  { %2279 = vmatmul.msk.bf16.vlgmr.msrb.gmra.mxu1 %vm217_vm8, %v1607_v60 }
 0xc7f   :  { %v1600_v62 = vpack.c.bf16 %v1494_v59, %v1494_v59 }
 0xc80   :  { %2278 = vmatmul.msk.bf16.vlgmr.msra.gmra.mxu0 %vm217_vm8, %v1606_v38 }
 0xc81   :  { %2272 = vmatmul.msk.bf16.vlgmr.msra.gmra.mxu2 %vm217_vm8, %v1600_v62 }
 0xc82   :  { %1834 = vmatpush.bf16.msra.mxu2 %v2384_v2 }
 0xc86   :  { %1835 = vmatpush.bf16.msra.mxu2 %v2383_v34 }
 0xca6   :  { %v1470_v57 = vpop.xlane.xlu0 %1469 }
 0xca7   :  { %2522 = vrcp.f32 %v1470_v57  ;;  %v1551_v43 = vand.u32 2147483648, %v1470_v57  ;;  %v1549_v45 = vand.u32 2147483647, %v1470_v57  ;;  %vm1545_vm14 = vweird.f32 %v1470_v57 }
 0xca9   :  { %v1552_v52 = vor.u32 1.1754944e-38, %v1551_v43  ;;  %vm1550_vm1 = vcmp.eq.f32.partialorder %v1549_v45, 8.507059e+37 }
 0xcad   :  { %v2523_v54 = vpop.eup %2522 }
 0xcae   :  { %v1541_v56 = vmul.f32 %v2523_v54, %v1470_v57  ;;  %vm1546_vm10 = vweird.f32 %v2523_v54 }
 0xcaf   :  { %vm1547_vm15 = vmor %vm1545_vm14, %vm1546_vm10 }
 0xcb0   :  { %v1542_v22 = vsub.f32 1.0, %v1541_v56 }
 0xcb2   :  { %v1543_v11 = vmul.f32 %v2523_v54, %v1542_v22 }
 0xcb4   :  { %v1544_v42 = vadd.f32 %v2523_v54, %v1543_v11 }
 0xcb6   :  { %v1548_v20 = vsel %vm1547_vm15, %v2523_v54, %v1544_v42 }
 0xcb7   :  { %v1553_v0 = vsel %vm1550_vm1, %v1552_v52, %v1548_v20  ;;  %v2386_v52 = vld [vmem:[%s3297_s5 + $0x18] sm:$0xff] }
 0xcb8   :  { %v1554_v21 = vmul.f32 %v3160_v55, %v1553_v0  ;;  %1922 = vmatpush.bf16.msra.mxu3 %v2386_v52 }
 0xcba   :  { %v1604_v46 = vpack.c.bf16 %v1554_v21, %v1554_v21  ;;  %v2385_v21 = vld [vmem:[%s3297_s5 + $0x10] sm:$0xff] }
 0xcbc   :  { %2276 = vmatmul.msk.bf16.vlgmr.msrb.gmra.mxu2 %vm217_vm8, %v1604_v46  ;;  %1923 = vmatpush.bf16.msra.mxu3 %v2385_v21 }
 0xcbd   :  { %v1667_v3 = vpop.f32.mrf.mxu0 }
 0xcbe   :  { %v1688_v9 = vpop.f32.mrf.mxu1 }
 0xcc5   :  { %v1669_v10 = vpop.f32.mrf.mxu0 }
 0xcc6   :  { %v1690_v12 = vpop.f32.mrf.mxu1 }
 0xccc   :  { %v1646_v6 = vpop.f32.mrf.mxu3 }
 0xcd4   :  { %v1648_v17 = vpop.f32.mrf.mxu3 }
 0xcdc   :  { %v1730_v8 = vpop.f32.mrf.mxu3 }
 0xcdd   :  { %v2423_v18 = vpack.i.bf16 %v1730_v8, %v1646_v6 }
 0xcdf   :  { %2424 = vrot.lane.b32.xlu1 %v2423_v18, %s2589_s11  ;;  %s2592_s11 = smov [#allocation7]  }
 0xce4   :  { %v1732_v14 = vpop.f32.mrf.mxu3 }
 0xcfb   :  { %v1772_v5 = vpop.f32.mrf.mxu1 }
 0xcfc   :  { %v2433_v19 = vpack.i.bf16 %v1772_v5, %v1688_v9 }
 0xcfd   :  { %v1751_v48 = vpop.f32.mrf.mxu0 }
 0xcfe   :  { %v2428_v23 = vpack.i.bf16 %v1751_v48, %v1667_v3  ;;  %2434 = vrot.lane.b32.xlu2 %v2433_v19, %s2591_s13 }
 0xd00   :  { %2429 = vrot.lane.b32.xlu1 %v2428_v23, %s2590_s12  ;;  %s2158_s12 = sshll.u32 %s2592_s11, 4  ;;  %s2159_s12 = int_to_ptr.vmem [resolvable:$true] %s2158_s12 }
 0xd03   :  { %v1774_v55 = vpop.f32.mrf.mxu1 }
 0xd04   :  { %v1625_v29 = vpop.f32.mrf.mxu2 }
 0xd05   :  { %v1753_v63 = vpop.f32.mrf.mxu0 }
 0xd0c   :  { %v1627_v30 = vpop.f32.mrf.mxu2 }
 0xd3f   :  { %v1709_v32 = vpop.f32.mrf.mxu2 }
 0xd47   :  { %v1711_v33 = vpop.f32.mrf.mxu2 }
 0xd51   :  { %v2425_v61 = vpop.permute.xlu1 %2424 }
 0xd52   :  { %v2427_v24 = vunpack.i.h.bf16 %v2425_v61  ;;  %v2426_v25 = vunpack.i.l.bf16 %v2425_v61 }
 0xd54   :  { %v1788_v28 = vsel %vm217_vm8, %v1625_v29, %v2426_v25  ;;  %v1803_v37 = vsel %vm217_vm8, %v1709_v32, %v2427_v24  ;;  %v1888_v29 = vperm.slane %v3008_v27, 4  ;;  %v1891_v32 = vperm.slane %v3008_v27, 5  ;;  %v2392_v27 = vld [vmem:[%s3298_s6 + $0x68] sm:$0xff] }
 0xd58   :  { %v2435_v4 = vpop.permute.xlu2 %2434 }
 0xd59   :  { %v2437_v26 = vunpack.i.h.bf16 %v2435_v4  ;;  %v2436_v39 = vunpack.i.l.bf16 %v2435_v4 }
 0xd72   :  { %v2430_v36 = vpop.permute.xlu1 %2429 }
 0xd73   :  { %v2432_v7 = vunpack.i.h.bf16 %v2430_v36  ;;  %v2431_v16 = vunpack.i.l.bf16 %v2430_v36  ;;  %v2394_v36 = vld [vmem:[%s3298_s6 + $0x78] sm:$0xff] }
 0xd74   :  { %2039 = vmatpush.bf16.msrb.mxu0 %v2394_v36 }
 0xd75   :  { %v1789_v40 = vsel %vm797_vm4, %v1788_v28, %v2431_v16  ;;  %v1804_v41 = vsel %vm797_vm4, %v1803_v37, %v2432_v7  ;;  %v2393_v7 = vld [vmem:[%s3298_s6 + $0x70] sm:$0xff]  ;;  %v2391_v16 = vld [vmem:[%s3298_s6 + $0x60] sm:$0xff]  ;;  %v3251_v28 = vld [vmem:[%s3299_s7 + $0x8] sm:$0xff] }
 0xd76   :  { %v1790_v15 = vsel %vm799_vm5, %v1789_v40, %v2436_v39  ;;  %v1805_v44 = vsel %vm799_vm5, %v1804_v41, %v2437_v26  ;;  %v1900_v37 = vperm.slane %v3251_v28, 6  ;;  %v2390_v26 = vld [vmem:[%s3298_s6 + $0x58] sm:$0xff]  ;;  %v2389_v41 = vld [vmem:[%s3298_s6 + $0x50] sm:$0xff] }
 0xd77   :  { %v1806_v47 = vpack.c.bf16 %v1805_v44, %v1790_v15 }
 0xd78   :  { %2040 = vmatpush.bf16.msrb.mxu0 %v2393_v7 }
 0xd79   :  { %2292 = vmatmul.msk.bf16.vlgmr.msra.gmra.mxu2 %vm61_vm0, %v1806_v47  ;;  %v2388_v47 = vld [vmem:[%s3298_s6 + $0x48] sm:$0xff] }
 0xd7c   :  { %2041 = vmatpush.bf16.msrb.mxu0 %v2392_v27 }
 0xd80   :  { %2042 = vmatpush.bf16.msrb.mxu0 %v2391_v16 }
 0xd84   :  { %2043 = vmatpush.bf16.msrb.mxu0 %v2390_v26 }
 0xd88   :  { %2044 = vmatpush.bf16.msrb.mxu0 %v2389_v41 }
 0xd8c   :  { %2045 = vmatpush.bf16.msrb.mxu0 %v2388_v47 }
 0xdfc   :  { %v1837_v51 = vpop.f32.mrf.mxu2 }
 0xdfd   :  { %v1838_v53 = vadd.f32 %v1837_v51, %v1812_v35 }
 0xdff   :  { %v3210_v1 = vadd.f32 %v1838_v53, %v2982_v49  ;;  %v2387_v53 = vld [vmem:[%s3298_s6 + $0x40] sm:$0xff] }
 0xe00   :  { %2046 = vmatpush.bf16.msrb.mxu0 %v2387_v53 }
 0xe01   :  { %v1844_v58 = vsel %vm61_vm0, %v3210_v1, 0.0 }
 0xe02   :  { %1845 = vadd.xlane.f32.xlu1 %v1844_v58 }
 0xe04   :  { %v1839_v31 = vpop.f32.mrf.mxu2 }
 0xe05   :  { %v1840_v60 = vadd.f32 %v1839_v31, %v1812_v35 }
 0xe07   :  { %v3215_v59 = vadd.f32 %v1840_v60, %v2987_v50 }
 0xe09   :  { %v1847_v38 = vsel %vm61_vm0, %v3215_v59, 0.0 }
 0xe0a   :  { %1848 = vadd.xlane.f32.xlu0 %v1847_v38 }
 0xe75   :  { %v1846_v62 = vpop.xlane.xlu1 %1845 }
 0xe76   :  { %v1850_v57 = vmul.f32 %v1846_v62, %v2668_v13 }
 0xe78   :  { %v1852_v54 = vsub.f32 %v3210_v1, %v1850_v57 }
 0xe7a   :  { %v1854_v49 = vmul.f32 %v1852_v54, %v1852_v54 }
 0xe7c   :  { %v1856_v56 = vsel %vm61_vm0, %v1854_v49, 0.0 }
 0xe7d   :  { %v1849_v22 = vpop.xlane.xlu0 %1848  ;;  %1857 = vadd.xlane.f32.xlu0 %v1856_v56 }
 0xe7e   :  { %v1851_v43 = vmul.f32 %v1849_v22, %v2668_v13 }
 0xe80   :  { %v1853_v11 = vsub.f32 %v3215_v59, %v1851_v43 }
 0xe82   :  { %v1855_v50 = vmul.f32 %v1853_v11, %v1853_v11 }
 0xe84   :  { %v1859_v45 = vsel %vm61_vm0, %v1855_v50, 0.0 }
 0xe85   :  { %1860 = vadd.xlane.f32.xlu2 %v1859_v45 }
 0xef0   :  { %v1858_v42 = vpop.xlane.xlu0 %1857 }
 0xef1   :  { %v1862_v20 = vmul.f32 %v1858_v42, %v2668_v13 }
 0xef3   :  { %v1864_v0 = vadd.f32 1e-05, %v1862_v20 }
 0xef5   :  { %2524 = vrsqrt.f32 %v1864_v0  ;;  %vm1872_vm4 = vweird.f32 %v1864_v0 }
 0xef8   :  { %v1861_v46 = vpop.xlane.xlu2 %1860 }
 0xef9   :  { %v1863_v3 = vmul.f32 %v1861_v46, %v2668_v13 }
 0xefb   :  { %v2525_v9 = vpop.eup %2524  ;;  %v1865_v10 = vadd.f32 1e-05, %v1863_v3 }
 0xefc   :  { %v1867_v12 = vmul.f32 %v2525_v9, %v1864_v0  ;;  %vm1873_vm8 = vweird.f32 %v2525_v9 }
 0xefd   :  { %2526 = vrsqrt.f32 %v1865_v10  ;;  %vm1874_vm5 = vmor %vm1872_vm4, %vm1873_vm8  ;;  %vm1882_vm3 = vweird.f32 %v1865_v10 }
 0xefe   :  { %v1868_v6 = vmul.f32 %v2525_v9, %v1867_v12 }
 0xf00   :  { %v1869_v17 = vmul.f32 0.5, %v1868_v6 }
 0xf02   :  { %v1870_v8 = vsub.f32 1.5, %v1869_v17 }
 0xf03   :  { %v2527_v18 = vpop.eup %2526 }
 0xf04   :  { %v1871_v14 = vmul.f32 %v2525_v9, %v1870_v8  ;;  %v1877_v5 = vmul.f32 %v2527_v18, %v1865_v10  ;;  %vm1883_vm2 = vweird.f32 %v2527_v18 }
 0xf05   :  { %vm1884_vm9 = vmor %vm1882_vm3, %vm1883_vm2 }
 0xf06   :  { %v1878_v19 = vmul.f32 %v2527_v18, %v1877_v5  ;;  %v1875_v48 = vsel %vm1874_vm5, %v2525_v9, %v1871_v14  ;;  %v1990_v5 = vperm.slane %v3251_v28, 7  ;;  %v2396_v28 = vld [vmem:[%s3301_s9 + $0x8] sm:$0xff] }
 0xf07   :  { %v1886_v63 = vmul.f32 %v1875_v48, %v1852_v54  ;;  %2145 = vmatpush.bf16.msra.mxu1 %v2396_v28 }
 0xf08   :  { %v1879_v23 = vmul.f32 0.5, %v1878_v19 }
 0xf09   :  { %v1889_v33 = vmul.f32 %v1888_v29, %v1886_v63 }
 0xf0a   :  { %v1880_v55 = vsub.f32 1.5, %v1879_v23 }
 0xf0b   :  { %v1892_v24 = vadd.f32 %v1891_v32, %v1889_v33 }
 0xf0c   :  { %v1881_v30 = vmul.f32 %v2527_v18, %v1880_v55 }
 0xf0e   :  { %v1885_v2 = vsel %vm1884_vm9, %v2527_v18, %v1881_v30  ;;  %vm2111_vm9 = vcmask 253952  }
 0xf0f   :  { %v1887_v34 = vmul.f32 %v1885_v2, %v1853_v11 }
 0xf11   :  { %v1890_v61 = vmul.f32 %v1888_v29, %v1887_v34 }
 0xf13   :  { %v1893_v25 = vadd.f32 %v1891_v32, %v1890_v61 }
 0xf15   :  { %v1894_v4 = vpack.c.bf16 %v1893_v25, %v1892_v24 }
 0xf17   :  { %2305 = vmatmul.msk.bf16.vlgmr.msra.gmra.mxu3 %vm61_vm0, %v1894_v4 }
 0xf9a   :  { %v1925_v39 = vpop.f32.mrf.mxu3 }
 0xf9b   :  { %v1926_v40 = vadd.f32 %v1925_v39, %v1900_v37 }
 0xf9d   :  { %v2306_v15 = vmul.f32 -1.702, %v1926_v40 }
 0xf9f   :  { %v1934_v44 = vmul.f32 1.442695, %v2306_v15 }
 0xfa1   :  { %2528 = vpow2.f32 %v1934_v44 }
 0xfa2   :  { %v1927_v35 = vpop.f32.mrf.mxu3 }
 0xfa3   :  { %v1928_v51 = vadd.f32 %v1927_v35, %v1900_v37  ;;  %v2395_v37 = vld [vmem:[%s3301_s9] sm:$0xff]  ;;  %s2356_s9 = sld [smem:[#allocation4 + $0x1]] }
 0xfa4   :  { %2146 = vmatpush.bf16.msra.mxu1 %v2395_v37  ;;  %v2055_v35 = vld [vmem:[%s3300_s8] sm:$0x3]  ;;  %s2108_s8 = sld [smem:[#allocation4]] }
 0xfa5   :  { %v2307_v58 = vmul.f32 -1.702, %v1928_v51 }
 0xfa7   :  { %v2529_v31 = vpop.eup %2528  ;;  %v1936_v60 = vmul.f32 1.442695, %v2307_v58 }
 0xfa8   :  { %v1938_v38 = vadd.f32 1.0, %v2529_v31 }
 0xfa9   :  { %2530 = vpow2.f32 %v1936_v60  ;;  %v2100_v60 = vperm.slane %v2055_v35, 0  ;;  %s2171_s30 = scalar_lea.vmem [#allocation2], %s2356_s9 }
 0xfaa   :  { %2532 = vrcp.f32 %v1938_v38  ;;  %v1951_v45 = vand.u32 2147483648, %v1938_v38  ;;  %vm1945_vm7 = vweird.f32 %v1938_v38  ;;  %v1949_v42 = vand.u32 2147483647, %v1938_v38  ;;  %s2109_s4 = scalar_lea.vmem [#allocation2], %s2108_s8 }
 0xfac   :  { %v1952_v3 = vor.u32 1.1754944e-38, %v1951_v45  ;;  %vm1950_vm13 = vcmp.eq.f32.partialorder %v1949_v42, 8.507059e+37 }
 0xfaf   :  { %v2531_v62 = vpop.eup %2530 }
 0xfb0   :  { %v2533_v57 = vpop.eup %2532  ;;  %v1939_v54 = vadd.f32 1.0, %v2531_v62  ;;  %v2103_v62 = vperm.slane %v2055_v35, 1 }
 0xfb1   :  { %v1941_v49 = vmul.f32 %v2533_v57, %v1938_v38  ;;  %vm1946_vm6 = vweird.f32 %v2533_v57 }
 0xfb2   :  { %2534 = vrcp.f32 %v1939_v54  ;;  %vm1947_vm11 = vmor %vm1945_vm7, %vm1946_vm6  ;;  %v1966_v20 = vand.u32 2147483648, %v1939_v54  ;;  %v1964_v46 = vand.u32 2147483647, %v1939_v54  ;;  %vm1960_vm10 = vweird.f32 %v1939_v54 }
 0xfb3   :  { %v1942_v56 = vsub.f32 1.0, %v1941_v49 }
 0xfb4   :  { %v1967_v12 = vor.u32 1.1754944e-38, %v1966_v20  ;;  %vm1965_vm15 = vcmp.eq.f32.partialorder %v1964_v46, 8.507059e+37 }
 0xfb5   :  { %v1943_v22 = vmul.f32 %v2533_v57, %v1942_v56 }
 0xfb7   :  { %v1944_v11 = vadd.f32 %v2533_v57, %v1943_v22 }
 0xfb8   :  { %v2535_v43 = vpop.eup %2534 }
 0xfb9   :  { %v1956_v50 = vmul.f32 %v2535_v43, %v1939_v54  ;;  %v1948_v0 = vsel %vm1947_vm11, %v2533_v57, %v1944_v11  ;;  %vm1961_vm12 = vweird.f32 %v2535_v43 }
 0xfba   :  { %v1953_v10 = vsel %vm1950_vm13, %v1952_v3, %v1948_v0  ;;  %vm1962_vm14 = vmor %vm1960_vm10, %vm1961_vm12 }
 0xfbb   :  { %v1957_v52 = vsub.f32 1.0, %v1956_v50  ;;  %v1970_v8 = vmul.f32 %v1953_v10, %v1926_v40 }
 0xfbd   :  { %v1958_v21 = vmul.f32 %v2535_v43, %v1957_v52 }
 0xfbf   :  { %v1959_v9 = vadd.f32 %v2535_v43, %v1958_v21 }
 0xfc1   :  { %v1963_v6 = vsel %vm1962_vm14, %v2535_v43, %v1959_v9 }
 0xfc2   :  { %v1968_v17 = vsel %vm1965_vm15, %v1967_v12, %v1963_v6 }
 0xfc3   :  { %v1971_v18 = vmul.f32 %v1968_v17, %v1928_v51 }
 0xfc5   :  { %v1972_v14 = vpack.c.bf16 %v1971_v18, %v1970_v8 }
 0xfc7   :  { %2047 = vmatmul.bf16.vlgmr.msrb.gmra.mxu0 %v1972_v14 }
0x1044   :  { %v2048_v19 = vpop.f32.mrf.mxu0 }
0x1045   :  { %v2049_v48 = vadd.f32 %v2048_v19, %v1990_v5 }
0x1047   :  { %v2053_v23 = vadd.f32 %v2049_v48, %v3210_v1 }
0x1049   :  { %v2056_v55 = vsel %vm61_vm0, %v2053_v23, 0.0 }
0x104a   :  { %2057 = vadd.xlane.f32.xlu0 %v2056_v55 }
0x104c   :  { %v2050_v29 = vpop.f32.mrf.mxu0 }
0x104d   :  { %v2051_v63 = vadd.f32 %v2050_v29, %v1990_v5 }
0x104f   :  { %v2054_v30 = vadd.f32 %v2051_v63, %v3215_v59 }
0x1051   :  { %v2059_v2 = vsel %vm61_vm0, %v2054_v30, 0.0 }
0x1052   :  { %2060 = vadd.xlane.f32.xlu0 %v2059_v2 }
0x10bd   :  { %v2058_v32 = vpop.xlane.xlu0 %2057 }
0x10be   :  { %v2062_v33 = vmul.f32 %v2058_v32, %v2668_v13 }
0x10c0   :  { %v2064_v34 = vsub.f32 %v2053_v23, %v2062_v33 }
0x10c2   :  { %v2066_v61 = vmul.f32 %v2064_v34, %v2064_v34 }
0x10c4   :  { %v2068_v24 = vsel %vm61_vm0, %v2066_v61, 0.0 }
0x10c5   :  { %2069 = vadd.xlane.f32.xlu0 %v2068_v24  ;;  %v2061_v25 = vpop.xlane.xlu0 %2060 }
0x10c6   :  { %v2063_v1 = vmul.f32 %v2061_v25, %v2668_v13 }
0x10c8   :  { %v2065_v4 = vsub.f32 %v2054_v30, %v2063_v1 }
0x10ca   :  { %v2067_v36 = vmul.f32 %v2065_v4, %v2065_v4 }
0x10cc   :  { %v2071_v7 = vsel %vm61_vm0, %v2067_v36, 0.0 }
0x10cd   :  { %2072 = vadd.xlane.f32.xlu1 %v2071_v7 }
0x1138   :  { %v2070_v59 = vpop.xlane.xlu0 %2069 }
0x1139   :  { %v2074_v27 = vmul.f32 %v2070_v59, %v2668_v13 }
0x113b   :  { %v2076_v16 = vadd.f32 1e-05, %v2074_v27 }
0x113d   :  { %2536 = vrsqrt.f32 %v2076_v16  ;;  %vm2084_vm8 = vweird.f32 %v2076_v16 }
0x1140   :  { %v2073_v26 = vpop.xlane.xlu1 %2072 }
0x1141   :  { %v2075_v39 = vmul.f32 %v2073_v26, %v2668_v13 }
0x1143   :  { %v2537_v40 = vpop.eup %2536  ;;  %v2077_v41 = vadd.f32 1e-05, %v2075_v39 }
0x1144   :  { %v2079_v15 = vmul.f32 %v2537_v40, %v2076_v16  ;;  %vm2085_vm1 = vweird.f32 %v2537_v40 }
0x1145   :  { %2538 = vrsqrt.f32 %v2077_v41  ;;  %vm2086_vm4 = vmor %vm2084_vm8, %vm2085_vm1  ;;  %vm2094_vm2 = vweird.f32 %v2077_v41 }
0x1146   :  { %v2080_v44 = vmul.f32 %v2537_v40, %v2079_v15 }
0x1148   :  { %v2081_v47 = vmul.f32 0.5, %v2080_v44 }
0x114a   :  { %v2082_v51 = vsub.f32 1.5, %v2081_v47 }
0x114b   :  { %v2539_v53 = vpop.eup %2538 }
0x114c   :  { %v2083_v58 = vmul.f32 %v2537_v40, %v2082_v51  ;;  %v2089_v31 = vmul.f32 %v2539_v53, %v2077_v41  ;;  %vm2095_vm5 = vweird.f32 %v2539_v53 }
0x114d   :  { %vm2096_vm3 = vmor %vm2094_vm2, %vm2095_vm5 }
0x114e   :  { %v2087_v13 = vsel %vm2086_vm4, %v2537_v40, %v2083_v58  ;;  %v2090_v38 = vmul.f32 %v2539_v53, %v2089_v31 }
0x114f   :  { %v2098_v57 = vmul.f32 %v2087_v13, %v2064_v34 }
0x1150   :  { %v2091_v54 = vmul.f32 0.5, %v2090_v38 }
0x1151   :  { %v2101_v49 = vmul.f32 %v2100_v60, %v2098_v57 }
0x1152   :  { %v2092_v56 = vsub.f32 1.5, %v2091_v54 }
0x1153   :  { %v2104_v22 = vadd.f32 %v2103_v62, %v2101_v49 }
0x1154   :  { %v2093_v43 = vmul.f32 %v2539_v53, %v2092_v56 }
0x1155   :  { %2106 = vst.msk [vmem:[#allocation2] sm:$0xff] %vm61_vm0, %v2104_v22 }
0x1156   :  { %v2097_v11 = vsel %vm2096_vm3, %v2539_v53, %v2093_v43 }
0x1157   :  { %v2099_v50 = vmul.f32 %v2097_v11, %v2065_v4 }
0x1159   :  { %v2102_v45 = vmul.f32 %v2100_v60, %v2099_v50 }
0x115b   :  { %v2105_v42 = vadd.f32 %v2103_v62, %v2102_v45 }
0x115d   :  { %2107 = vst.msk [vmem:[#allocation2 + $0x8] sm:$0xff] %vm61_vm0, %v2105_v42 }
0x1164   :  { %v2110_v52 = vld [vmem:[%s2109_s4] sm:$0x1]  ;;  %v2357_v20 = vld [vmem:[%s2171_s30 + $0x8] sm:$0x1] }
0x1165   :  { %2112 = vst.msk [vmem:[#allocation3] sm:$0x1] %vm2111_vm9, %v2110_v52 }
0x1166   :  { %2117 = vst.msk [vmem:[#allocation3 + $0x1] sm:$0x1] %vm2111_vm9, %v2357_v20 }
0x116d   :  { %v2118_v0 = vld [vmem:[#allocation3] sm:$0x3] }
0x116e   :  { %v2119_v21 = vpack.c.bf16 %v2118_v0, %v2118_v0 }
0x1170   :  { %2366 = vmatmul.msk.bf16.vlgmr.msra.gmra.mxu1 %vm61_vm0, %v2119_v21 }
0x11ed   :  { %v2148_v46 = vpop.f32.mrf.mxu1 }
0x11ee   :  { %2152 = vst [vmem:[#allocation7] sm:$0x3] %v2148_v46 }
0x11ef   :  { %2163 = dma.vmem_to_hbm [thread:$0]  %s2159_s12, 32, %s2161_s15, [#allocation5]  }
0x11f5   :  { %v2150_v3 = vpop.f32.mrf.mxu1 }
0x11f6   :  { %2580 = dma.done.wait [#allocation5], 32  }
0x11f7   :  { %2581 = vsyncadd [#allocation5], 4294967264 }
0x11f8   :  { %2168 = vsyncpa [#allocation5], 1 }
0x11f9   :  { %2169 = vsyncpa [#allocation6], 1 }

</bundles_post_ra>
